<compile_context>
chip_gen: v7x
topology: tpu7x:2x2x1
jax: 0.10.0
libtpu: 0.0.40
codegen_flags: <defaults>
</compile_context>

<pallas_src>
import functools
import math

import jax
import jax.numpy as jnp
from jax.experimental import pallas as pl
from jax.experimental.pallas import tpu as pltpu


# ----------------------------------------------------------------------------- #
# Fused forward kernel: whole batch, all layers, single invocation, all in VMEM.
# ----------------------------------------------------------------------------- #
def _fused_forward_kernel(
    patches_ref, tokens_ref, embed_w_ref, layer_mats_ref, layer_vecs_ref,
    dec_w_ref, glob_vecs_ref, out_ref,
    *, B, T, nP, D, nH, I, L, Cpp, num_layers, eps):
    dh = D // nH
    scale = 1.0 / math.sqrt(dh)

    def layernorm(x, g, b):
        mean = jnp.mean(x, axis=-1, keepdims=True)
        xc = x - mean
        var = jnp.mean(xc * xc, axis=-1, keepdims=True)
        return xc * jax.lax.rsqrt(var + eps) * g + b

    # --- patch embedding (unfolded stride-p conv == one [B*nP, Cpp] x [Cpp, D]) -- #
    patch_w = embed_w_ref[0:Cpp, :]                       # [Cpp, D]
    pos     = embed_w_ref[Cpp:Cpp + nP, :]                # [nP, D]
    patch_b = glob_vecs_ref[0:1, 0:D]                     # [1, D]
    patch_tok = (jnp.dot(patches_ref[...], patch_w,
                         preferred_element_type=jnp.float32) + patch_b)  # [B*nP, D]

    # --- assemble token sequence with the batch folded into rows: [B*L, D] ------ #
    chunks = []
    for b in range(B):
        chunks.append(tokens_ref[b * T:(b + 1) * T, :])             # latent tokens
        chunks.append(patch_tok[b * nP:(b + 1) * nP, :] + pos)      # patch tokens
    x = jnp.concatenate(chunks, axis=0)                             # [B*L, D]

    # --- transformer encoder layers (pre-LN ViT) -------------------------------- #
    for li in range(num_layers):
        wqkv = layer_mats_ref[li, 0:D, 0:3 * D]                     # [D, 3D]
        wo   = layer_mats_ref[li, D:2 * D, 0:D]                     # [D, D]
        w1   = layer_mats_ref[li, 2 * D:3 * D, 0:I]                 # [D, I]
        w2   = layer_mats_ref[li, 3 * D:3 * D + I, 0:D]             # [I, D]
        ln1_g = layer_vecs_ref[li, 0:1, 0:D]
        ln1_b = layer_vecs_ref[li, 1:2, 0:D]
        bqkv  = layer_vecs_ref[li, 2:3, 0:3 * D]
        bo    = layer_vecs_ref[li, 3:4, 0:D]
        ln2_g = layer_vecs_ref[li, 4:5, 0:D]
        ln2_b = layer_vecs_ref[li, 5:6, 0:D]
        b1    = layer_vecs_ref[li, 6:7, 0:I]
        b2    = layer_vecs_ref[li, 7:8, 0:D]

        h = layernorm(x, ln1_g, ln1_b)
        qkv = jnp.dot(h, wqkv, preferred_element_type=jnp.float32) + bqkv  # [B*L, 3D]

        # scores for all (batch, head) pairs; contract last dims directly (no k.T)
        score_blocks = []
        for b in range(B):
            for hd in range(nH):
                q = qkv[b * L:(b + 1) * L, hd * dh:(hd + 1) * dh]
                k = qkv[b * L:(b + 1) * L, D + hd * dh:D + (hd + 1) * dh]
                s = jax.lax.dot_general(q, k, (((1,), (1,)), ((), ())),
                                        preferred_element_type=jnp.float32)
                score_blocks.append(s)                               # [L, L]
        # batched softmax across all B*nH heads (single max/exp/recip pass)
        s_all = jnp.concatenate(score_blocks, axis=0) * scale        # [B*nH*L, L]
        m = jnp.max(s_all, axis=-1, keepdims=True)
        p_all = jnp.exp(s_all - m)
        p_all = p_all * pl.reciprocal(jnp.sum(p_all, axis=-1, keepdims=True),
                                      approx=True)

        # PV matmuls; assemble heads along lanes / batches along sublanes in regs
        batch_outs = []
        for b in range(B):
            head_outs = []
            for hd in range(nH):
                idx = b * nH + hd
                pbh = p_all[idx * L:(idx + 1) * L, :]
                v = qkv[b * L:(b + 1) * L, 2 * D + hd * dh:2 * D + (hd + 1) * dh]
                head_outs.append(jnp.dot(pbh, v,
                                         preferred_element_type=jnp.float32))
            batch_outs.append(jnp.concatenate(head_outs, axis=1))    # [L, D]
        attn = jnp.concatenate(batch_outs, axis=0)                   # [B*L, D]

        x = x + jnp.dot(attn, wo, preferred_element_type=jnp.float32) + bo

        h2 = layernorm(x, ln2_g, ln2_b)
        m1 = jnp.dot(h2, w1, preferred_element_type=jnp.float32) + b1
        # TODO(synk): tanh-approx GELU; PyTorch nn.GELU default is the exact erf form.
        c = math.sqrt(2.0 / math.pi)
        m1 = 0.5 * m1 * (1.0 + jnp.tanh(c * (m1 + 0.044715 * m1 * m1 * m1)))
        x = x + jnp.dot(m1, w2, preferred_element_type=jnp.float32) + b2

    # --- final LN, keep last nP tokens per batch, 1x1-conv decoder matmul ------- #
    lnf_g = glob_vecs_ref[1:2, 0:D]
    lnf_b = glob_vecs_ref[2:3, 0:D]
    dec_b = glob_vecs_ref[3:4, :]                                    # [1, 128] (padded)
    x = layernorm(x, lnf_g, lnf_b)

    seq = jnp.concatenate([x[b * L + T:(b + 1) * L, :] for b in range(B)],
                          axis=0)                                    # [B*nP, D]
    # dec_w padded to 128 lanes -> unmasked, lane-dense output store.
    out_ref[...] = (jnp.dot(seq, dec_w_ref[...],
                            preferred_element_type=jnp.float32)
                    + dec_b).astype(out_ref.dtype)


# ----------------------------------------------------------------------------- #
# Config / params
# ----------------------------------------------------------------------------- #
class Config:
    hidden_size = 32
    num_channels = 3
    encoder_stride = 4          # also the patch size
    image_size = 16
    num_hidden_layers = 2
    num_attention_heads = 4
    intermediate_size = 64
    num_latent_motion_tokens = 8
    initializer_range = 0.02
    layer_norm_eps = 1e-12

    @property
    def num_patches(self):
        return (self.image_size // self.encoder_stride) ** 2


def _trunc_normal(key, shape, std):
    return std * jax.random.truncated_normal(key, -2.0, 2.0, shape, dtype=jnp.float32)


def init_params(cfg, key):
    D = cfg.hidden_size
    C = cfg.num_channels
    p = cfg.encoder_stride
    I = cfg.intermediate_size
    nL = cfg.num_hidden_layers
    std = cfg.initializer_range
    keys = iter(jax.random.split(key, 16))

    return {
        "patch_w": _trunc_normal(next(keys), (C * p * p, D), std),
        "patch_b": jnp.zeros((1, D), jnp.float32),
        "pos_emb": _trunc_normal(next(keys), (cfg.num_patches, D), std),
        "ln1_g": jnp.ones((nL, 1, D), jnp.float32),
        "ln1_b": jnp.zeros((nL, 1, D), jnp.float32),
        "wqkv": _trunc_normal(next(keys), (nL, D, 3 * D), std),
        "bqkv": jnp.zeros((nL, 1, 3 * D), jnp.float32),
        "wo": _trunc_normal(next(keys), (nL, D, D), std),
        "bo": jnp.zeros((nL, 1, D), jnp.float32),
        "ln2_g": jnp.ones((nL, 1, D), jnp.float32),
        "ln2_b": jnp.zeros((nL, 1, D), jnp.float32),
        "w1": _trunc_normal(next(keys), (nL, D, I), std),
        "b1": jnp.zeros((nL, 1, I), jnp.float32),
        "w2": _trunc_normal(next(keys), (nL, I, D), std),
        "b2": jnp.zeros((nL, 1, D), jnp.float32),
        "lnf_g": jnp.ones((1, D), jnp.float32),
        "lnf_b": jnp.zeros((1, D), jnp.float32),
        # decoder: Conv2d(D -> encoder_stride**2 * C, kernel=1), trunc_normal init
        "dec_w": _trunc_normal(next(keys), (D, p * p * C), std),
        "dec_b": jnp.zeros((1, p * p * C), jnp.float32),
    }


def pack_params(params, cfg):
    """Pack 21 parameter tensors into 5 VMEM blobs (fewer prologue DMAs)."""
    D = cfg.hidden_size
    I = cfg.intermediate_size
    W = 3 * D  # lane width of the per-layer blobs

    def padL(a, w=W):
        pad = [(0, 0)] * (a.ndim - 1) + [(0, w - a.shape[-1])]
        return jnp.pad(a, pad)

    embed_w = jnp.concatenate([params["patch_w"], params["pos_emb"]], axis=0)

    # per-layer matrices stacked along sublanes: rows [0:D]=wqkv, [D:2D]=wo,
    # [2D:3D]=w1, [3D:3D+I]=w2; all lane-padded to 3D.
    layer_mats = jnp.concatenate(
        [padL(params["wqkv"]), padL(params["wo"]),
         padL(params["w1"]), padL(params["w2"])], axis=1)

    # per-layer vectors: one row each, order matched by the kernel.
    layer_vecs = jnp.concatenate(
        [padL(params[k]) for k in
         ("ln1_g", "ln1_b", "bqkv", "bo", "ln2_g", "ln2_b", "b1", "b2")], axis=1)

    # decoder weight/bias padded to 128 output lanes -> lane-dense output store.
    dec_w = jnp.pad(params["dec_w"], ((0, 0), (0, 128 - params["dec_w"].shape[1])))
    glob_vecs = jnp.concatenate(
        [padL(params["patch_b"], 128), padL(params["lnf_g"], 128),
         padL(params["lnf_b"], 128), padL(params["dec_b"], 128)], axis=0)

    return {"embed_w": embed_w, "layer_mats": layer_mats, "layer_vecs": layer_vecs,
            "dec_w": dec_w, "glob_vecs": glob_vecs}


# ----------------------------------------------------------------------------- #
# Forward: layout plumbing in XLA, all compute in the single fused Pallas kernel.
# ----------------------------------------------------------------------------- #
def _full_spec(arr):
    nd = arr.ndim
    return pl.BlockSpec(arr.shape, lambda i, _nd=nd: (0,) * _nd)


def latent_motion_decoder_forward(packed, cond_input, latent_motion_tokens, cfg):
    """cond_input: NCHW [B, C, H, W]; latent_motion_tokens: [B, T, D]."""
    B, C, Hi, Wi = cond_input.shape
    D = cfg.hidden_size
    p = cfg.encoder_stride
    nP = cfg.num_patches
    T = cfg.num_latent_motion_tokens
    L = T + nP
    Hp = Wp = Hi // p
    Cpp = C * p * p

    # unfold NCHW into per-patch rows [B*nP, C*p*p]  (pure layout plumbing)
    patches = cond_input.reshape(B, C, Hp, p, Wp, p)
    patches = patches.transpose(0, 2, 4, 1, 3, 5).reshape(B * nP, Cpp)
    tokens = latent_motion_tokens.reshape(B * T, D)

    kernel = functools.partial(
        _fused_forward_kernel,
        B=B, T=T, nP=nP, D=D, nH=cfg.num_attention_heads, I=cfg.intermediate_size,
        L=L, Cpp=Cpp, num_layers=cfg.num_hidden_layers, eps=cfg.layer_norm_eps)

    inputs = (patches, tokens, packed["embed_w"], packed["layer_mats"],
              packed["layer_vecs"], packed["dec_w"], packed["glob_vecs"])

    out = pl.pallas_call(
        kernel,
        out_shape=jax.ShapeDtypeStruct((B * nP, 128), jnp.float32),
        grid=(1,),                                   # single fused step, whole batch
        in_specs=[_full_spec(a) for a in inputs],
        out_specs=pl.BlockSpec((B * nP, 128), lambda i: (0, 0)),
        compiler_params=pltpu.CompilerParams(
            dimension_semantics=("arbitrary",)),
    )(*inputs)

    out = out[:, :Cpp]                               # drop lane padding (48 real chans)
    # decoder[1]: PixelShuffle(encoder_stride): channel index o = c*p*p + i*p + j
    y = out.reshape(B, Hp, Wp, C, p, p)
    y = y.transpose(0, 3, 1, 4, 2, 5).reshape(B, C, Hp * p, Wp * p)
    return y


# ----------------------------------------------------------------------------- #
if __name__ == "__main__":
    cfg = Config()
    key = jax.random.PRNGKey(0)
    k_param, k_img, k_tok = jax.random.split(key, 3)

    params = init_params(cfg, k_param)
    packed = pack_params(params, cfg)                # one-time packing, outside jit

    cond_input = jax.random.normal(
        k_img, (2, cfg.num_channels, cfg.image_size, cfg.image_size),
        dtype=jnp.float32)
    latent_motion_tokens = jax.random.normal(
        k_tok, (2, cfg.num_latent_motion_tokens, cfg.hidden_size),
        dtype=jnp.float32)

    fwd = jax.jit(functools.partial(latent_motion_decoder_forward, cfg=cfg))
    out = jax.block_until_ready(fwd(packed, cond_input, latent_motion_tokens))

    expected = (2, cfg.num_channels, cfg.image_size, cfg.image_size)
    assert out.shape == expected, (out.shape, expected)
    assert bool(jnp.all(jnp.isfinite(out)))
    print("KERNEL_OK")
</pallas_src>

<mosaic_0001>
module attributes {stable_mosaic.version = 11 : i64} {
  func.func @_fused_forward_kernel(%arg0: i32, %arg1: memref<32x48xf32, #tpu.memory_space<vmem>>, %arg2: memref<16x32xf32, #tpu.memory_space<vmem>>, %arg3: memref<64x32xf32, #tpu.memory_space<vmem>>, %arg4: memref<2x160x96xf32, #tpu.memory_space<vmem>>, %arg5: memref<2x8x96xf32, #tpu.memory_space<vmem>>, %arg6: memref<32x128xf32, #tpu.memory_space<vmem>>, %arg7: memref<4x128xf32, #tpu.memory_space<vmem>>, %arg8: memref<32x128xf32, #tpu.memory_space<vmem>>) attributes {dimension_semantics = [#tpu.dimension_semantics<arbitrary>], iteration_bounds = array<i64: 1>, scalar_prefetch = 0 : i64, scratch_operands = 0 : i64, tpu.core_type = #tpu.core_type<tc>, window_params = [{pipeline_mode = #tpu.pipeline_mode<synchronous>, transform_indices = @transform_0, window_bounds = array<i64: 32, 48>}, {pipeline_mode = #tpu.pipeline_mode<synchronous>, transform_indices = @transform_1, window_bounds = array<i64: 16, 32>}, {pipeline_mode = #tpu.pipeline_mode<synchronous>, transform_indices = @transform_2, window_bounds = array<i64: 64, 32>}, {pipeline_mode = #tpu.pipeline_mode<synchronous>, transform_indices = @transform_3, window_bounds = array<i64: 2, 160, 96>}, {pipeline_mode = #tpu.pipeline_mode<synchronous>, transform_indices = @transform_4, window_bounds = array<i64: 2, 8, 96>}, {pipeline_mode = #tpu.pipeline_mode<synchronous>, transform_indices = @transform_5, window_bounds = array<i64: 32, 128>}, {pipeline_mode = #tpu.pipeline_mode<synchronous>, transform_indices = @transform_6, window_bounds = array<i64: 4, 128>}, {pipeline_mode = #tpu.pipeline_mode<synchronous>, transform_indices = @transform_7, window_bounds = array<i64: 32, 128>}]} {
    %c0 = arith.constant 0 : index
    %c0_0 = arith.constant 0 : index
    %0 = vector.load %arg3[%c0, %c0_0] : memref<64x32xf32, #tpu.memory_space<vmem>>, vector<48x32xf32>
    %c48 = arith.constant 48 : index
    %c0_1 = arith.constant 0 : index
    %1 = vector.load %arg3[%c48, %c0_1] : memref<64x32xf32, #tpu.memory_space<vmem>>, vector<16x32xf32>
    %c0_2 = arith.constant 0 : index
    %c0_3 = arith.constant 0 : index
    %2 = vector.load %arg7[%c0_2, %c0_3] : memref<4x128xf32, #tpu.memory_space<vmem>>, vector<1x32xf32>
    %c0_4 = arith.constant 0 : index
    %c0_5 = arith.constant 0 : index
    %3 = vector.load %arg1[%c0_4, %c0_5] : memref<32x48xf32, #tpu.memory_space<vmem>>, vector<32x48xf32>
    %cst = arith.constant dense<0.000000e+00> : vector<32x32xf32>
    %4 = tpu.matmul %3, %0, %cst {dimension_numbers = #tpu.dot_dimension_numbers<[1], [0], [0], [1], [0, 0, 1, 1], [], []>} : vector<32x48xf32>, vector<48x32xf32>, vector<32x32xf32> -> vector<32x32xf32>
    %5 = vector.broadcast %2 : vector<1x32xf32> to vector<32x32xf32>
    %6 = arith.addf %4, %5 : vector<32x32xf32>
    %c0_6 = arith.constant 0 : index
    %c0_7 = arith.constant 0 : index
    %7 = vector.load %arg2[%c0_6, %c0_7] : memref<16x32xf32, #tpu.memory_space<vmem>>, vector<8x32xf32>
    %8 = vector.extract_strided_slice %6 {offsets = [0, 0], sizes = [16, 32], strides = [1, 1]} : vector<32x32xf32> to vector<16x32xf32>
    %9 = arith.addf %8, %1 : vector<16x32xf32>
    %c8 = arith.constant 8 : index
    %c0_8 = arith.constant 0 : index
    %10 = vector.load %arg2[%c8, %c0_8] : memref<16x32xf32, #tpu.memory_space<vmem>>, vector<8x32xf32>
    %11 = vector.extract_strided_slice %6 {offsets = [16, 0], sizes = [16, 32], strides = [1, 1]} : vector<32x32xf32> to vector<16x32xf32>
    %12 = arith.addf %11, %1 : vector<16x32xf32>
    %13 = tpu.concatenate %7, %9, %10, %12 in 0 : vector<8x32xf32>, vector<16x32xf32>, vector<8x32xf32>, vector<16x32xf32> -> vector<48x32xf32>
    %c0_9 = arith.constant 0 : index
    %c0_10 = arith.constant 0 : index
    %c0_11 = arith.constant 0 : index
    %14 = vector.load %arg4[%c0_9, %c0_10, %c0_11] : memref<2x160x96xf32, #tpu.memory_space<vmem>>, vector<1x32x96xf32>
    %15 = vector.shape_cast %14 : vector<1x32x96xf32> to vector<32x96xf32>
    %c0_12 = arith.constant 0 : index
    %c32 = arith.constant 32 : index
    %c0_13 = arith.constant 0 : index
    %16 = vector.load %arg4[%c0_12, %c32, %c0_13] : memref<2x160x96xf32, #tpu.memory_space<vmem>>, vector<1x32x32xf32>
    %17 = vector.shape_cast %16 : vector<1x32x32xf32> to vector<32x32xf32>
    %c0_14 = arith.constant 0 : index
    %c64 = arith.constant 64 : index
    %c0_15 = arith.constant 0 : index
    %18 = vector.load %arg4[%c0_14, %c64, %c0_15] : memref<2x160x96xf32, #tpu.memory_space<vmem>>, vector<1x32x64xf32>
    %19 = vector.shape_cast %18 : vector<1x32x64xf32> to vector<32x64xf32>
    %c0_16 = arith.constant 0 : index
    %c96 = arith.constant 96 : index
    %c0_17 = arith.constant 0 : index
    %20 = vector.load %arg4[%c0_16, %c96, %c0_17] : memref<2x160x96xf32, #tpu.memory_space<vmem>>, vector<1x64x32xf32>
    %21 = vector.shape_cast %20 : vector<1x64x32xf32> to vector<64x32xf32>
    %c0_18 = arith.constant 0 : index
    %c0_19 = arith.constant 0 : index
    %c0_20 = arith.constant 0 : index
    %22 = vector.load %arg5[%c0_18, %c0_19, %c0_20] : memref<2x8x96xf32, #tpu.memory_space<vmem>>, vector<1x1x32xf32>
    %23 = vector.shape_cast %22 : vector<1x1x32xf32> to vector<1x32xf32>
    %c0_21 = arith.constant 0 : index
    %c1 = arith.constant 1 : index
    %c0_22 = arith.constant 0 : index
    %24 = vector.load %arg5[%c0_21, %c1, %c0_22] : memref<2x8x96xf32, #tpu.memory_space<vmem>>, vector<1x1x32xf32>
    %25 = vector.shape_cast %24 : vector<1x1x32xf32> to vector<1x32xf32>
    %c0_23 = arith.constant 0 : index
    %c2 = arith.constant 2 : index
    %c0_24 = arith.constant 0 : index
    %26 = vector.load %arg5[%c0_23, %c2, %c0_24] : memref<2x8x96xf32, #tpu.memory_space<vmem>>, vector<1x1x96xf32>
    %27 = vector.shape_cast %26 : vector<1x1x96xf32> to vector<1x96xf32>
    %c0_25 = arith.constant 0 : index
    %c3 = arith.constant 3 : index
    %c0_26 = arith.constant 0 : index
    %28 = vector.load %arg5[%c0_25, %c3, %c0_26] : memref<2x8x96xf32, #tpu.memory_space<vmem>>, vector<1x1x32xf32>
    %29 = vector.shape_cast %28 : vector<1x1x32xf32> to vector<1x32xf32>
    %c0_27 = arith.constant 0 : index
    %c4 = arith.constant 4 : index
    %c0_28 = arith.constant 0 : index
    %30 = vector.load %arg5[%c0_27, %c4, %c0_28] : memref<2x8x96xf32, #tpu.memory_space<vmem>>, vector<1x1x32xf32>
    %31 = vector.shape_cast %30 : vector<1x1x32xf32> to vector<1x32xf32>
    %c0_29 = arith.constant 0 : index
    %c5 = arith.constant 5 : index
    %c0_30 = arith.constant 0 : index
    %32 = vector.load %arg5[%c0_29, %c5, %c0_30] : memref<2x8x96xf32, #tpu.memory_space<vmem>>, vector<1x1x32xf32>
    %33 = vector.shape_cast %32 : vector<1x1x32xf32> to vector<1x32xf32>
    %c0_31 = arith.constant 0 : index
    %c6 = arith.constant 6 : index
    %c0_32 = arith.constant 0 : index
    %34 = vector.load %arg5[%c0_31, %c6, %c0_32] : memref<2x8x96xf32, #tpu.memory_space<vmem>>, vector<1x1x64xf32>
    %35 = vector.shape_cast %34 : vector<1x1x64xf32> to vector<1x64xf32>
    %c0_33 = arith.constant 0 : index
    %c7 = arith.constant 7 : index
    %c0_34 = arith.constant 0 : index
    %36 = vector.load %arg5[%c0_33, %c7, %c0_34] : memref<2x8x96xf32, #tpu.memory_space<vmem>>, vector<1x1x32xf32>
    %37 = vector.shape_cast %36 : vector<1x1x32xf32> to vector<1x32xf32>
    %cst_35 = arith.constant dense<0.000000e+00> : vector<48xf32>
    %38 = vector.multi_reduction <add>, %13, %cst_35 [1] : vector<48x32xf32> to vector<48xf32>
    %39 = vector.shape_cast %38 : vector<48xf32> to vector<48x1xf32>
    %cst_36 = arith.constant 3.200000e+01 : f32
    %40 = vector.broadcast %cst_36 : f32 to vector<48x1xf32>
    %41 = arith.divf %39, %40 : vector<48x1xf32>
    %42 = vector.broadcast %41 : vector<48x1xf32> to vector<48x32xf32>
    %43 = arith.subf %13, %42 : vector<48x32xf32>
    %44 = arith.mulf %43, %43 : vector<48x32xf32>
    %cst_37 = arith.constant dense<0.000000e+00> : vector<48xf32>
    %45 = vector.multi_reduction <add>, %44, %cst_37 [1] : vector<48x32xf32> to vector<48xf32>
    %46 = vector.shape_cast %45 : vector<48xf32> to vector<48x1xf32>
    %cst_38 = arith.constant 3.200000e+01 : f32
    %47 = vector.broadcast %cst_38 : f32 to vector<48x1xf32>
    %48 = arith.divf %46, %47 : vector<48x1xf32>
    %cst_39 = arith.constant 9.99999996E-13 : f32
    %49 = vector.broadcast %cst_39 : f32 to vector<48x1xf32>
    %50 = arith.addf %48, %49 : vector<48x1xf32>
    %51 = math.rsqrt %50 : vector<48x1xf32>
    %52 = vector.broadcast %51 : vector<48x1xf32> to vector<48x32xf32>
    %53 = arith.mulf %43, %52 : vector<48x32xf32>
    %54 = vector.broadcast %23 : vector<1x32xf32> to vector<48x32xf32>
    %55 = arith.mulf %53, %54 : vector<48x32xf32>
    %56 = vector.broadcast %25 : vector<1x32xf32> to vector<48x32xf32>
    %57 = arith.addf %55, %56 : vector<48x32xf32>
    %cst_40 = arith.constant dense<0.000000e+00> : vector<48x96xf32>
    %58 = tpu.matmul %57, %15, %cst_40 {dimension_numbers = #tpu.dot_dimension_numbers<[1], [0], [0], [1], [0, 0, 1, 1], [], []>} : vector<48x32xf32>, vector<32x96xf32>, vector<48x96xf32> -> vector<48x96xf32>
    %59 = vector.broadcast %27 : vector<1x96xf32> to vector<48x96xf32>
    %60 = arith.addf %58, %59 : vector<48x96xf32>
    %61 = vector.extract_strided_slice %60 {offsets = [0, 0], sizes = [24, 8], strides = [1, 1]} : vector<48x96xf32> to vector<24x8xf32>
    %62 = vector.extract_strided_slice %60 {offsets = [0, 32], sizes = [24, 8], strides = [1, 1]} : vector<48x96xf32> to vector<24x8xf32>
    %cst_41 = arith.constant dense<0.000000e+00> : vector<24x24xf32>
    %63 = tpu.matmul %61, %62, %cst_41 {dimension_numbers = #tpu.dot_dimension_numbers<[1], [1], [0], [0], [0, 0, 1, 0], [], []>} : vector<24x8xf32>, vector<24x8xf32>, vector<24x24xf32> -> vector<24x24xf32>
    %64 = vector.extract_strided_slice %60 {offsets = [0, 8], sizes = [24, 8], strides = [1, 1]} : vector<48x96xf32> to vector<24x8xf32>
    %65 = vector.extract_strided_slice %60 {offsets = [0, 40], sizes = [24, 8], strides = [1, 1]} : vector<48x96xf32> to vector<24x8xf32>
    %cst_42 = arith.constant dense<0.000000e+00> : vector<24x24xf32>
    %66 = tpu.matmul %64, %65, %cst_42 {dimension_numbers = #tpu.dot_dimension_numbers<[1], [1], [0], [0], [0, 0, 1, 0], [], []>} : vector<24x8xf32>, vector<24x8xf32>, vector<24x24xf32> -> vector<24x24xf32>
    %67 = vector.extract_strided_slice %60 {offsets = [0, 16], sizes = [24, 8], strides = [1, 1]} : vector<48x96xf32> to vector<24x8xf32>
    %68 = vector.extract_strided_slice %60 {offsets = [0, 48], sizes = [24, 8], strides = [1, 1]} : vector<48x96xf32> to vector<24x8xf32>
    %cst_43 = arith.constant dense<0.000000e+00> : vector<24x24xf32>
    %69 = tpu.matmul %67, %68, %cst_43 {dimension_numbers = #tpu.dot_dimension_numbers<[1], [1], [0], [0], [0, 0, 1, 0], [], []>} : vector<24x8xf32>, vector<24x8xf32>, vector<24x24xf32> -> vector<24x24xf32>
    %70 = vector.extract_strided_slice %60 {offsets = [0, 24], sizes = [24, 8], strides = [1, 1]} : vector<48x96xf32> to vector<24x8xf32>
    %71 = vector.extract_strided_slice %60 {offsets = [0, 56], sizes = [24, 8], strides = [1, 1]} : vector<48x96xf32> to vector<24x8xf32>
    %cst_44 = arith.constant dense<0.000000e+00> : vector<24x24xf32>
    %72 = tpu.matmul %70, %71, %cst_44 {dimension_numbers = #tpu.dot_dimension_numbers<[1], [1], [0], [0], [0, 0, 1, 0], [], []>} : vector<24x8xf32>, vector<24x8xf32>, vector<24x24xf32> -> vector<24x24xf32>
    %73 = vector.extract_strided_slice %60 {offsets = [24, 0], sizes = [24, 8], strides = [1, 1]} : vector<48x96xf32> to vector<24x8xf32>
    %74 = vector.extract_strided_slice %60 {offsets = [24, 32], sizes = [24, 8], strides = [1, 1]} : vector<48x96xf32> to vector<24x8xf32>
    %cst_45 = arith.constant dense<0.000000e+00> : vector<24x24xf32>
    %75 = tpu.matmul %73, %74, %cst_45 {dimension_numbers = #tpu.dot_dimension_numbers<[1], [1], [0], [0], [0, 0, 1, 0], [], []>} : vector<24x8xf32>, vector<24x8xf32>, vector<24x24xf32> -> vector<24x24xf32>
    %76 = vector.extract_strided_slice %60 {offsets = [24, 8], sizes = [24, 8], strides = [1, 1]} : vector<48x96xf32> to vector<24x8xf32>
    %77 = vector.extract_strided_slice %60 {offsets = [24, 40], sizes = [24, 8], strides = [1, 1]} : vector<48x96xf32> to vector<24x8xf32>
    %cst_46 = arith.constant dense<0.000000e+00> : vector<24x24xf32>
    %78 = tpu.matmul %76, %77, %cst_46 {dimension_numbers = #tpu.dot_dimension_numbers<[1], [1], [0], [0], [0, 0, 1, 0], [], []>} : vector<24x8xf32>, vector<24x8xf32>, vector<24x24xf32> -> vector<24x24xf32>
    %79 = vector.extract_strided_slice %60 {offsets = [24, 16], sizes = [24, 8], strides = [1, 1]} : vector<48x96xf32> to vector<24x8xf32>
    %80 = vector.extract_strided_slice %60 {offsets = [24, 48], sizes = [24, 8], strides = [1, 1]} : vector<48x96xf32> to vector<24x8xf32>
    %cst_47 = arith.constant dense<0.000000e+00> : vector<24x24xf32>
    %81 = tpu.matmul %79, %80, %cst_47 {dimension_numbers = #tpu.dot_dimension_numbers<[1], [1], [0], [0], [0, 0, 1, 0], [], []>} : vector<24x8xf32>, vector<24x8xf32>, vector<24x24xf32> -> vector<24x24xf32>
    %82 = vector.extract_strided_slice %60 {offsets = [24, 24], sizes = [24, 8], strides = [1, 1]} : vector<48x96xf32> to vector<24x8xf32>
    %83 = vector.extract_strided_slice %60 {offsets = [24, 56], sizes = [24, 8], strides = [1, 1]} : vector<48x96xf32> to vector<24x8xf32>
    %cst_48 = arith.constant dense<0.000000e+00> : vector<24x24xf32>
    %84 = tpu.matmul %82, %83, %cst_48 {dimension_numbers = #tpu.dot_dimension_numbers<[1], [1], [0], [0], [0, 0, 1, 0], [], []>} : vector<24x8xf32>, vector<24x8xf32>, vector<24x24xf32> -> vector<24x24xf32>
    %85 = tpu.concatenate %63, %66, %69, %72, %75, %78, %81, %84 in 0 : vector<24x24xf32>, vector<24x24xf32>, vector<24x24xf32>, vector<24x24xf32>, vector<24x24xf32>, vector<24x24xf32>, vector<24x24xf32>, vector<24x24xf32> -> vector<192x24xf32>
    %cst_49 = arith.constant 0.353553385 : f32
    %86 = vector.broadcast %cst_49 : f32 to vector<192x24xf32>
    %87 = arith.mulf %85, %86 : vector<192x24xf32>
    %cst_50 = arith.constant dense<0xFF800000> : vector<192xf32>
    %88 = vector.multi_reduction <maximumf>, %87, %cst_50 [1] : vector<192x24xf32> to vector<192xf32>
    %89 = vector.shape_cast %88 : vector<192xf32> to vector<192x1xf32>
    %90 = vector.broadcast %89 : vector<192x1xf32> to vector<192x24xf32>
    %91 = arith.subf %87, %90 : vector<192x24xf32>
    %92 = math.exp %91 : vector<192x24xf32>
    %cst_51 = arith.constant dense<0.000000e+00> : vector<192xf32>
    %93 = vector.multi_reduction <add>, %92, %cst_51 [1] : vector<192x24xf32> to vector<192xf32>
    %94 = vector.shape_cast %93 : vector<192xf32> to vector<192x1xf32>
    %95 = tpu.reciprocal %94 {approx = true} : vector<192x1xf32> -> vector<192x1xf32>
    %96 = vector.broadcast %95 : vector<192x1xf32> to vector<192x24xf32>
    %97 = arith.mulf %92, %96 : vector<192x24xf32>
    %98 = vector.extract_strided_slice %97 {offsets = [0, 0], sizes = [24, 24], strides = [1, 1]} : vector<192x24xf32> to vector<24x24xf32>
    %99 = vector.extract_strided_slice %60 {offsets = [0, 64], sizes = [24, 8], strides = [1, 1]} : vector<48x96xf32> to vector<24x8xf32>
    %cst_52 = arith.constant dense<0.000000e+00> : vector<24x8xf32>
    %100 = tpu.matmul %98, %99, %cst_52 {dimension_numbers = #tpu.dot_dimension_numbers<[1], [0], [0], [1], [0, 0, 1, 1], [], []>} : vector<24x24xf32>, vector<24x8xf32>, vector<24x8xf32> -> vector<24x8xf32>
    %101 = vector.extract_strided_slice %97 {offsets = [24, 0], sizes = [24, 24], strides = [1, 1]} : vector<192x24xf32> to vector<24x24xf32>
    %102 = vector.extract_strided_slice %60 {offsets = [0, 72], sizes = [24, 8], strides = [1, 1]} : vector<48x96xf32> to vector<24x8xf32>
    %cst_53 = arith.constant dense<0.000000e+00> : vector<24x8xf32>
    %103 = tpu.matmul %101, %102, %cst_53 {dimension_numbers = #tpu.dot_dimension_numbers<[1], [0], [0], [1], [0, 0, 1, 1], [], []>} : vector<24x24xf32>, vector<24x8xf32>, vector<24x8xf32> -> vector<24x8xf32>
    %104 = vector.extract_strided_slice %97 {offsets = [48, 0], sizes = [24, 24], strides = [1, 1]} : vector<192x24xf32> to vector<24x24xf32>
    %105 = vector.extract_strided_slice %60 {offsets = [0, 80], sizes = [24, 8], strides = [1, 1]} : vector<48x96xf32> to vector<24x8xf32>
    %cst_54 = arith.constant dense<0.000000e+00> : vector<24x8xf32>
    %106 = tpu.matmul %104, %105, %cst_54 {dimension_numbers = #tpu.dot_dimension_numbers<[1], [0], [0], [1], [0, 0, 1, 1], [], []>} : vector<24x24xf32>, vector<24x8xf32>, vector<24x8xf32> -> vector<24x8xf32>
    %107 = vector.extract_strided_slice %97 {offsets = [72, 0], sizes = [24, 24], strides = [1, 1]} : vector<192x24xf32> to vector<24x24xf32>
    %108 = vector.extract_strided_slice %60 {offsets = [0, 88], sizes = [24, 8], strides = [1, 1]} : vector<48x96xf32> to vector<24x8xf32>
    %cst_55 = arith.constant dense<0.000000e+00> : vector<24x8xf32>
    %109 = tpu.matmul %107, %108, %cst_55 {dimension_numbers = #tpu.dot_dimension_numbers<[1], [0], [0], [1], [0, 0, 1, 1], [], []>} : vector<24x24xf32>, vector<24x8xf32>, vector<24x8xf32> -> vector<24x8xf32>
    %110 = tpu.concatenate %100, %103, %106, %109 in 1 : vector<24x8xf32>, vector<24x8xf32>, vector<24x8xf32>, vector<24x8xf32> -> vector<24x32xf32>
    %111 = vector.extract_strided_slice %97 {offsets = [96, 0], sizes = [24, 24], strides = [1, 1]} : vector<192x24xf32> to vector<24x24xf32>
    %112 = vector.extract_strided_slice %60 {offsets = [24, 64], sizes = [24, 8], strides = [1, 1]} : vector<48x96xf32> to vector<24x8xf32>
    %cst_56 = arith.constant dense<0.000000e+00> : vector<24x8xf32>
    %113 = tpu.matmul %111, %112, %cst_56 {dimension_numbers = #tpu.dot_dimension_numbers<[1], [0], [0], [1], [0, 0, 1, 1], [], []>} : vector<24x24xf32>, vector<24x8xf32>, vector<24x8xf32> -> vector<24x8xf32>
    %114 = vector.extract_strided_slice %97 {offsets = [120, 0], sizes = [24, 24], strides = [1, 1]} : vector<192x24xf32> to vector<24x24xf32>
    %115 = vector.extract_strided_slice %60 {offsets = [24, 72], sizes = [24, 8], strides = [1, 1]} : vector<48x96xf32> to vector<24x8xf32>
    %cst_57 = arith.constant dense<0.000000e+00> : vector<24x8xf32>
    %116 = tpu.matmul %114, %115, %cst_57 {dimension_numbers = #tpu.dot_dimension_numbers<[1], [0], [0], [1], [0, 0, 1, 1], [], []>} : vector<24x24xf32>, vector<24x8xf32>, vector<24x8xf32> -> vector<24x8xf32>
    %117 = vector.extract_strided_slice %97 {offsets = [144, 0], sizes = [24, 24], strides = [1, 1]} : vector<192x24xf32> to vector<24x24xf32>
    %118 = vector.extract_strided_slice %60 {offsets = [24, 80], sizes = [24, 8], strides = [1, 1]} : vector<48x96xf32> to vector<24x8xf32>
    %cst_58 = arith.constant dense<0.000000e+00> : vector<24x8xf32>
    %119 = tpu.matmul %117, %118, %cst_58 {dimension_numbers = #tpu.dot_dimension_numbers<[1], [0], [0], [1], [0, 0, 1, 1], [], []>} : vector<24x24xf32>, vector<24x8xf32>, vector<24x8xf32> -> vector<24x8xf32>
    %120 = vector.extract_strided_slice %97 {offsets = [168, 0], sizes = [24, 24], strides = [1, 1]} : vector<192x24xf32> to vector<24x24xf32>
    %121 = vector.extract_strided_slice %60 {offsets = [24, 88], sizes = [24, 8], strides = [1, 1]} : vector<48x96xf32> to vector<24x8xf32>
    %cst_59 = arith.constant dense<0.000000e+00> : vector<24x8xf32>
    %122 = tpu.matmul %120, %121, %cst_59 {dimension_numbers = #tpu.dot_dimension_numbers<[1], [0], [0], [1], [0, 0, 1, 1], [], []>} : vector<24x24xf32>, vector<24x8xf32>, vector<24x8xf32> -> vector<24x8xf32>
    %123 = tpu.concatenate %113, %116, %119, %122 in 1 : vector<24x8xf32>, vector<24x8xf32>, vector<24x8xf32>, vector<24x8xf32> -> vector<24x32xf32>
    %124 = tpu.concatenate %110, %123 in 0 : vector<24x32xf32>, vector<24x32xf32> -> vector<48x32xf32>
    %cst_60 = arith.constant dense<0.000000e+00> : vector<48x32xf32>
    %125 = tpu.matmul %124, %17, %cst_60 {dimension_numbers = #tpu.dot_dimension_numbers<[1], [0], [0], [1], [0, 0, 1, 1], [], []>} : vector<48x32xf32>, vector<32x32xf32>, vector<48x32xf32> -> vector<48x32xf32>
    %126 = arith.addf %13, %125 : vector<48x32xf32>
    %127 = vector.broadcast %29 : vector<1x32xf32> to vector<48x32xf32>
    %128 = arith.addf %126, %127 : vector<48x32xf32>
    %cst_61 = arith.constant dense<0.000000e+00> : vector<48xf32>
    %129 = vector.multi_reduction <add>, %128, %cst_61 [1] : vector<48x32xf32> to vector<48xf32>
    %130 = vector.shape_cast %129 : vector<48xf32> to vector<48x1xf32>
    %cst_62 = arith.constant 3.200000e+01 : f32
    %131 = vector.broadcast %cst_62 : f32 to vector<48x1xf32>
    %132 = arith.divf %130, %131 : vector<48x1xf32>
    %133 = vector.broadcast %132 : vector<48x1xf32> to vector<48x32xf32>
    %134 = arith.subf %128, %133 : vector<48x32xf32>
    %135 = arith.mulf %134, %134 : vector<48x32xf32>
    %cst_63 = arith.constant dense<0.000000e+00> : vector<48xf32>
    %136 = vector.multi_reduction <add>, %135, %cst_63 [1] : vector<48x32xf32> to vector<48xf32>
    %137 = vector.shape_cast %136 : vector<48xf32> to vector<48x1xf32>
    %cst_64 = arith.constant 3.200000e+01 : f32
    %138 = vector.broadcast %cst_64 : f32 to vector<48x1xf32>
    %139 = arith.divf %137, %138 : vector<48x1xf32>
    %cst_65 = arith.constant 9.99999996E-13 : f32
    %140 = vector.broadcast %cst_65 : f32 to vector<48x1xf32>
    %141 = arith.addf %139, %140 : vector<48x1xf32>
    %142 = math.rsqrt %141 : vector<48x1xf32>
    %143 = vector.broadcast %142 : vector<48x1xf32> to vector<48x32xf32>
    %144 = arith.mulf %134, %143 : vector<48x32xf32>
    %145 = vector.broadcast %31 : vector<1x32xf32> to vector<48x32xf32>
    %146 = arith.mulf %144, %145 : vector<48x32xf32>
    %147 = vector.broadcast %33 : vector<1x32xf32> to vector<48x32xf32>
    %148 = arith.addf %146, %147 : vector<48x32xf32>
    %cst_66 = arith.constant dense<0.000000e+00> : vector<48x64xf32>
    %149 = tpu.matmul %148, %19, %cst_66 {dimension_numbers = #tpu.dot_dimension_numbers<[1], [0], [0], [1], [0, 0, 1, 1], [], []>} : vector<48x32xf32>, vector<32x64xf32>, vector<48x64xf32> -> vector<48x64xf32>
    %150 = vector.broadcast %35 : vector<1x64xf32> to vector<48x64xf32>
    %151 = arith.addf %149, %150 : vector<48x64xf32>
    %cst_67 = arith.constant 5.000000e-01 : f32
    %152 = vector.broadcast %cst_67 : f32 to vector<48x64xf32>
    %153 = arith.mulf %152, %151 : vector<48x64xf32>
    %cst_68 = arith.constant 4.471500e-02 : f32
    %154 = vector.broadcast %cst_68 : f32 to vector<48x64xf32>
    %155 = arith.mulf %154, %151 : vector<48x64xf32>
    %156 = arith.mulf %155, %151 : vector<48x64xf32>
    %157 = arith.mulf %156, %151 : vector<48x64xf32>
    %158 = arith.addf %151, %157 : vector<48x64xf32>
    %cst_69 = arith.constant 0.797884583 : f32
    %159 = vector.broadcast %cst_69 : f32 to vector<48x64xf32>
    %160 = arith.mulf %159, %158 : vector<48x64xf32>
    %161 = math.tanh %160 : vector<48x64xf32>
    %cst_70 = arith.constant 1.000000e+00 : f32
    %162 = vector.broadcast %cst_70 : f32 to vector<48x64xf32>
    %163 = arith.addf %162, %161 : vector<48x64xf32>
    %164 = arith.mulf %153, %163 : vector<48x64xf32>
    %cst_71 = arith.constant dense<0.000000e+00> : vector<48x32xf32>
    %165 = tpu.matmul %164, %21, %cst_71 {dimension_numbers = #tpu.dot_dimension_numbers<[1], [0], [0], [1], [0, 0, 1, 1], [], []>} : vector<48x64xf32>, vector<64x32xf32>, vector<48x32xf32> -> vector<48x32xf32>
    %166 = arith.addf %128, %165 : vector<48x32xf32>
    %167 = vector.broadcast %37 : vector<1x32xf32> to vector<48x32xf32>
    %168 = arith.addf %166, %167 : vector<48x32xf32>
    %c1_72 = arith.constant 1 : index
    %c0_73 = arith.constant 0 : index
    %c0_74 = arith.constant 0 : index
    %169 = vector.load %arg4[%c1_72, %c0_73, %c0_74] : memref<2x160x96xf32, #tpu.memory_space<vmem>>, vector<1x32x96xf32>
    %170 = vector.shape_cast %169 : vector<1x32x96xf32> to vector<32x96xf32>
    %c1_75 = arith.constant 1 : index
    %c32_76 = arith.constant 32 : index
    %c0_77 = arith.constant 0 : index
    %171 = vector.load %arg4[%c1_75, %c32_76, %c0_77] : memref<2x160x96xf32, #tpu.memory_space<vmem>>, vector<1x32x32xf32>
    %172 = vector.shape_cast %171 : vector<1x32x32xf32> to vector<32x32xf32>
    %c1_78 = arith.constant 1 : index
    %c64_79 = arith.constant 64 : index
    %c0_80 = arith.constant 0 : index
    %173 = vector.load %arg4[%c1_78, %c64_79, %c0_80] : memref<2x160x96xf32, #tpu.memory_space<vmem>>, vector<1x32x64xf32>
    %174 = vector.shape_cast %173 : vector<1x32x64xf32> to vector<32x64xf32>
    %c1_81 = arith.constant 1 : index
    %c96_82 = arith.constant 96 : index
    %c0_83 = arith.constant 0 : index
    %175 = vector.load %arg4[%c1_81, %c96_82, %c0_83] : memref<2x160x96xf32, #tpu.memory_space<vmem>>, vector<1x64x32xf32>
    %176 = vector.shape_cast %175 : vector<1x64x32xf32> to vector<64x32xf32>
    %c1_84 = arith.constant 1 : index
    %c0_85 = arith.constant 0 : index
    %c0_86 = arith.constant 0 : index
    %177 = vector.load %arg5[%c1_84, %c0_85, %c0_86] : memref<2x8x96xf32, #tpu.memory_space<vmem>>, vector<1x1x32xf32>
    %178 = vector.shape_cast %177 : vector<1x1x32xf32> to vector<1x32xf32>
    %c1_87 = arith.constant 1 : index
    %c1_88 = arith.constant 1 : index
    %c0_89 = arith.constant 0 : index
    %179 = vector.load %arg5[%c1_87, %c1_88, %c0_89] : memref<2x8x96xf32, #tpu.memory_space<vmem>>, vector<1x1x32xf32>
    %180 = vector.shape_cast %179 : vector<1x1x32xf32> to vector<1x32xf32>
    %c1_90 = arith.constant 1 : index
    %c2_91 = arith.constant 2 : index
    %c0_92 = arith.constant 0 : index
    %181 = vector.load %arg5[%c1_90, %c2_91, %c0_92] : memref<2x8x96xf32, #tpu.memory_space<vmem>>, vector<1x1x96xf32>
    %182 = vector.shape_cast %181 : vector<1x1x96xf32> to vector<1x96xf32>
    %c1_93 = arith.constant 1 : index
    %c3_94 = arith.constant 3 : index
    %c0_95 = arith.constant 0 : index
    %183 = vector.load %arg5[%c1_93, %c3_94, %c0_95] : memref<2x8x96xf32, #tpu.memory_space<vmem>>, vector<1x1x32xf32>
    %184 = vector.shape_cast %183 : vector<1x1x32xf32> to vector<1x32xf32>
    %c1_96 = arith.constant 1 : index
    %c4_97 = arith.constant 4 : index
    %c0_98 = arith.constant 0 : index
    %185 = vector.load %arg5[%c1_96, %c4_97, %c0_98] : memref<2x8x96xf32, #tpu.memory_space<vmem>>, vector<1x1x32xf32>
    %186 = vector.shape_cast %185 : vector<1x1x32xf32> to vector<1x32xf32>
    %c1_99 = arith.constant 1 : index
    %c5_100 = arith.constant 5 : index
    %c0_101 = arith.constant 0 : index
    %187 = vector.load %arg5[%c1_99, %c5_100, %c0_101] : memref<2x8x96xf32, #tpu.memory_space<vmem>>, vector<1x1x32xf32>
    %188 = vector.shape_cast %187 : vector<1x1x32xf32> to vector<1x32xf32>
    %c1_102 = arith.constant 1 : index
    %c6_103 = arith.constant 6 : index
    %c0_104 = arith.constant 0 : index
    %189 = vector.load %arg5[%c1_102, %c6_103, %c0_104] : memref<2x8x96xf32, #tpu.memory_space<vmem>>, vector<1x1x64xf32>
    %190 = vector.shape_cast %189 : vector<1x1x64xf32> to vector<1x64xf32>
    %c1_105 = arith.constant 1 : index
    %c7_106 = arith.constant 7 : index
    %c0_107 = arith.constant 0 : index
    %191 = vector.load %arg5[%c1_105, %c7_106, %c0_107] : memref<2x8x96xf32, #tpu.memory_space<vmem>>, vector<1x1x32xf32>
    %192 = vector.shape_cast %191 : vector<1x1x32xf32> to vector<1x32xf32>
    %cst_108 = arith.constant dense<0.000000e+00> : vector<48xf32>
    %193 = vector.multi_reduction <add>, %168, %cst_108 [1] : vector<48x32xf32> to vector<48xf32>
    %194 = vector.shape_cast %193 : vector<48xf32> to vector<48x1xf32>
    %cst_109 = arith.constant 3.200000e+01 : f32
    %195 = vector.broadcast %cst_109 : f32 to vector<48x1xf32>
    %196 = arith.divf %194, %195 : vector<48x1xf32>
    %197 = vector.broadcast %196 : vector<48x1xf32> to vector<48x32xf32>
    %198 = arith.subf %168, %197 : vector<48x32xf32>
    %199 = arith.mulf %198, %198 : vector<48x32xf32>
    %cst_110 = arith.constant dense<0.000000e+00> : vector<48xf32>
    %200 = vector.multi_reduction <add>, %199, %cst_110 [1] : vector<48x32xf32> to vector<48xf32>
    %201 = vector.shape_cast %200 : vector<48xf32> to vector<48x1xf32>
    %cst_111 = arith.constant 3.200000e+01 : f32
    %202 = vector.broadcast %cst_111 : f32 to vector<48x1xf32>
    %203 = arith.divf %201, %202 : vector<48x1xf32>
    %cst_112 = arith.constant 9.99999996E-13 : f32
    %204 = vector.broadcast %cst_112 : f32 to vector<48x1xf32>
    %205 = arith.addf %203, %204 : vector<48x1xf32>
    %206 = math.rsqrt %205 : vector<48x1xf32>
    %207 = vector.broadcast %206 : vector<48x1xf32> to vector<48x32xf32>
    %208 = arith.mulf %198, %207 : vector<48x32xf32>
    %209 = vector.broadcast %178 : vector<1x32xf32> to vector<48x32xf32>
    %210 = arith.mulf %208, %209 : vector<48x32xf32>
    %211 = vector.broadcast %180 : vector<1x32xf32> to vector<48x32xf32>
    %212 = arith.addf %210, %211 : vector<48x32xf32>
    %cst_113 = arith.constant dense<0.000000e+00> : vector<48x96xf32>
    %213 = tpu.matmul %212, %170, %cst_113 {dimension_numbers = #tpu.dot_dimension_numbers<[1], [0], [0], [1], [0, 0, 1, 1], [], []>} : vector<48x32xf32>, vector<32x96xf32>, vector<48x96xf32> -> vector<48x96xf32>
    %214 = vector.broadcast %182 : vector<1x96xf32> to vector<48x96xf32>
    %215 = arith.addf %213, %214 : vector<48x96xf32>
    %216 = vector.extract_strided_slice %215 {offsets = [0, 0], sizes = [24, 8], strides = [1, 1]} : vector<48x96xf32> to vector<24x8xf32>
    %217 = vector.extract_strided_slice %215 {offsets = [0, 32], sizes = [24, 8], strides = [1, 1]} : vector<48x96xf32> to vector<24x8xf32>
    %cst_114 = arith.constant dense<0.000000e+00> : vector<24x24xf32>
    %218 = tpu.matmul %216, %217, %cst_114 {dimension_numbers = #tpu.dot_dimension_numbers<[1], [1], [0], [0], [0, 0, 1, 0], [], []>} : vector<24x8xf32>, vector<24x8xf32>, vector<24x24xf32> -> vector<24x24xf32>
    %219 = vector.extract_strided_slice %215 {offsets = [0, 8], sizes = [24, 8], strides = [1, 1]} : vector<48x96xf32> to vector<24x8xf32>
    %220 = vector.extract_strided_slice %215 {offsets = [0, 40], sizes = [24, 8], strides = [1, 1]} : vector<48x96xf32> to vector<24x8xf32>
    %cst_115 = arith.constant dense<0.000000e+00> : vector<24x24xf32>
    %221 = tpu.matmul %219, %220, %cst_115 {dimension_numbers = #tpu.dot_dimension_numbers<[1], [1], [0], [0], [0, 0, 1, 0], [], []>} : vector<24x8xf32>, vector<24x8xf32>, vector<24x24xf32> -> vector<24x24xf32>
    %222 = vector.extract_strided_slice %215 {offsets = [0, 16], sizes = [24, 8], strides = [1, 1]} : vector<48x96xf32> to vector<24x8xf32>
    %223 = vector.extract_strided_slice %215 {offsets = [0, 48], sizes = [24, 8], strides = [1, 1]} : vector<48x96xf32> to vector<24x8xf32>
    %cst_116 = arith.constant dense<0.000000e+00> : vector<24x24xf32>
    %224 = tpu.matmul %222, %223, %cst_116 {dimension_numbers = #tpu.dot_dimension_numbers<[1], [1], [0], [0], [0, 0, 1, 0], [], []>} : vector<24x8xf32>, vector<24x8xf32>, vector<24x24xf32> -> vector<24x24xf32>
    %225 = vector.extract_strided_slice %215 {offsets = [0, 24], sizes = [24, 8], strides = [1, 1]} : vector<48x96xf32> to vector<24x8xf32>
    %226 = vector.extract_strided_slice %215 {offsets = [0, 56], sizes = [24, 8], strides = [1, 1]} : vector<48x96xf32> to vector<24x8xf32>
    %cst_117 = arith.constant dense<0.000000e+00> : vector<24x24xf32>
    %227 = tpu.matmul %225, %226, %cst_117 {dimension_numbers = #tpu.dot_dimension_numbers<[1], [1], [0], [0], [0, 0, 1, 0], [], []>} : vector<24x8xf32>, vector<24x8xf32>, vector<24x24xf32> -> vector<24x24xf32>
    %228 = vector.extract_strided_slice %215 {offsets = [24, 0], sizes = [24, 8], strides = [1, 1]} : vector<48x96xf32> to vector<24x8xf32>
    %229 = vector.extract_strided_slice %215 {offsets = [24, 32], sizes = [24, 8], strides = [1, 1]} : vector<48x96xf32> to vector<24x8xf32>
    %cst_118 = arith.constant dense<0.000000e+00> : vector<24x24xf32>
    %230 = tpu.matmul %228, %229, %cst_118 {dimension_numbers = #tpu.dot_dimension_numbers<[1], [1], [0], [0], [0, 0, 1, 0], [], []>} : vector<24x8xf32>, vector<24x8xf32>, vector<24x24xf32> -> vector<24x24xf32>
    %231 = vector.extract_strided_slice %215 {offsets = [24, 8], sizes = [24, 8], strides = [1, 1]} : vector<48x96xf32> to vector<24x8xf32>
    %232 = vector.extract_strided_slice %215 {offsets = [24, 40], sizes = [24, 8], strides = [1, 1]} : vector<48x96xf32> to vector<24x8xf32>
    %cst_119 = arith.constant dense<0.000000e+00> : vector<24x24xf32>
    %233 = tpu.matmul %231, %232, %cst_119 {dimension_numbers = #tpu.dot_dimension_numbers<[1], [1], [0], [0], [0, 0, 1, 0], [], []>} : vector<24x8xf32>, vector<24x8xf32>, vector<24x24xf32> -> vector<24x24xf32>
    %234 = vector.extract_strided_slice %215 {offsets = [24, 16], sizes = [24, 8], strides = [1, 1]} : vector<48x96xf32> to vector<24x8xf32>
    %235 = vector.extract_strided_slice %215 {offsets = [24, 48], sizes = [24, 8], strides = [1, 1]} : vector<48x96xf32> to vector<24x8xf32>
    %cst_120 = arith.constant dense<0.000000e+00> : vector<24x24xf32>
    %236 = tpu.matmul %234, %235, %cst_120 {dimension_numbers = #tpu.dot_dimension_numbers<[1], [1], [0], [0], [0, 0, 1, 0], [], []>} : vector<24x8xf32>, vector<24x8xf32>, vector<24x24xf32> -> vector<24x24xf32>
    %237 = vector.extract_strided_slice %215 {offsets = [24, 24], sizes = [24, 8], strides = [1, 1]} : vector<48x96xf32> to vector<24x8xf32>
    %238 = vector.extract_strided_slice %215 {offsets = [24, 56], sizes = [24, 8], strides = [1, 1]} : vector<48x96xf32> to vector<24x8xf32>
    %cst_121 = arith.constant dense<0.000000e+00> : vector<24x24xf32>
    %239 = tpu.matmul %237, %238, %cst_121 {dimension_numbers = #tpu.dot_dimension_numbers<[1], [1], [0], [0], [0, 0, 1, 0], [], []>} : vector<24x8xf32>, vector<24x8xf32>, vector<24x24xf32> -> vector<24x24xf32>
    %240 = tpu.concatenate %218, %221, %224, %227, %230, %233, %236, %239 in 0 : vector<24x24xf32>, vector<24x24xf32>, vector<24x24xf32>, vector<24x24xf32>, vector<24x24xf32>, vector<24x24xf32>, vector<24x24xf32>, vector<24x24xf32> -> vector<192x24xf32>
    %cst_122 = arith.constant 0.353553385 : f32
    %241 = vector.broadcast %cst_122 : f32 to vector<192x24xf32>
    %242 = arith.mulf %240, %241 : vector<192x24xf32>
    %cst_123 = arith.constant dense<0xFF800000> : vector<192xf32>
    %243 = vector.multi_reduction <maximumf>, %242, %cst_123 [1] : vector<192x24xf32> to vector<192xf32>
    %244 = vector.shape_cast %243 : vector<192xf32> to vector<192x1xf32>
    %245 = vector.broadcast %244 : vector<192x1xf32> to vector<192x24xf32>
    %246 = arith.subf %242, %245 : vector<192x24xf32>
    %247 = math.exp %246 : vector<192x24xf32>
    %cst_124 = arith.constant dense<0.000000e+00> : vector<192xf32>
    %248 = vector.multi_reduction <add>, %247, %cst_124 [1] : vector<192x24xf32> to vector<192xf32>
    %249 = vector.shape_cast %248 : vector<192xf32> to vector<192x1xf32>
    %250 = tpu.reciprocal %249 {approx = true} : vector<192x1xf32> -> vector<192x1xf32>
    %251 = vector.broadcast %250 : vector<192x1xf32> to vector<192x24xf32>
    %252 = arith.mulf %247, %251 : vector<192x24xf32>
    %253 = vector.extract_strided_slice %252 {offsets = [0, 0], sizes = [24, 24], strides = [1, 1]} : vector<192x24xf32> to vector<24x24xf32>
    %254 = vector.extract_strided_slice %215 {offsets = [0, 64], sizes = [24, 8], strides = [1, 1]} : vector<48x96xf32> to vector<24x8xf32>
    %cst_125 = arith.constant dense<0.000000e+00> : vector<24x8xf32>
    %255 = tpu.matmul %253, %254, %cst_125 {dimension_numbers = #tpu.dot_dimension_numbers<[1], [0], [0], [1], [0, 0, 1, 1], [], []>} : vector<24x24xf32>, vector<24x8xf32>, vector<24x8xf32> -> vector<24x8xf32>
    %256 = vector.extract_strided_slice %252 {offsets = [24, 0], sizes = [24, 24], strides = [1, 1]} : vector<192x24xf32> to vector<24x24xf32>
    %257 = vector.extract_strided_slice %215 {offsets = [0, 72], sizes = [24, 8], strides = [1, 1]} : vector<48x96xf32> to vector<24x8xf32>
    %cst_126 = arith.constant dense<0.000000e+00> : vector<24x8xf32>
    %258 = tpu.matmul %256, %257, %cst_126 {dimension_numbers = #tpu.dot_dimension_numbers<[1], [0], [0], [1], [0, 0, 1, 1], [], []>} : vector<24x24xf32>, vector<24x8xf32>, vector<24x8xf32> -> vector<24x8xf32>
    %259 = vector.extract_strided_slice %252 {offsets = [48, 0], sizes = [24, 24], strides = [1, 1]} : vector<192x24xf32> to vector<24x24xf32>
    %260 = vector.extract_strided_slice %215 {offsets = [0, 80], sizes = [24, 8], strides = [1, 1]} : vector<48x96xf32> to vector<24x8xf32>
    %cst_127 = arith.constant dense<0.000000e+00> : vector<24x8xf32>
    %261 = tpu.matmul %259, %260, %cst_127 {dimension_numbers = #tpu.dot_dimension_numbers<[1], [0], [0], [1], [0, 0, 1, 1], [], []>} : vector<24x24xf32>, vector<24x8xf32>, vector<24x8xf32> -> vector<24x8xf32>
    %262 = vector.extract_strided_slice %252 {offsets = [72, 0], sizes = [24, 24], strides = [1, 1]} : vector<192x24xf32> to vector<24x24xf32>
    %263 = vector.extract_strided_slice %215 {offsets = [0, 88], sizes = [24, 8], strides = [1, 1]} : vector<48x96xf32> to vector<24x8xf32>
    %cst_128 = arith.constant dense<0.000000e+00> : vector<24x8xf32>
    %264 = tpu.matmul %262, %263, %cst_128 {dimension_numbers = #tpu.dot_dimension_numbers<[1], [0], [0], [1], [0, 0, 1, 1], [], []>} : vector<24x24xf32>, vector<24x8xf32>, vector<24x8xf32> -> vector<24x8xf32>
    %265 = tpu.concatenate %255, %258, %261, %264 in 1 : vector<24x8xf32>, vector<24x8xf32>, vector<24x8xf32>, vector<24x8xf32> -> vector<24x32xf32>
    %266 = vector.extract_strided_slice %252 {offsets = [96, 0], sizes = [24, 24], strides = [1, 1]} : vector<192x24xf32> to vector<24x24xf32>
    %267 = vector.extract_strided_slice %215 {offsets = [24, 64], sizes = [24, 8], strides = [1, 1]} : vector<48x96xf32> to vector<24x8xf32>
    %cst_129 = arith.constant dense<0.000000e+00> : vector<24x8xf32>
    %268 = tpu.matmul %266, %267, %cst_129 {dimension_numbers = #tpu.dot_dimension_numbers<[1], [0], [0], [1], [0, 0, 1, 1], [], []>} : vector<24x24xf32>, vector<24x8xf32>, vector<24x8xf32> -> vector<24x8xf32>
    %269 = vector.extract_strided_slice %252 {offsets = [120, 0], sizes = [24, 24], strides = [1, 1]} : vector<192x24xf32> to vector<24x24xf32>
    %270 = vector.extract_strided_slice %215 {offsets = [24, 72], sizes = [24, 8], strides = [1, 1]} : vector<48x96xf32> to vector<24x8xf32>
    %cst_130 = arith.constant dense<0.000000e+00> : vector<24x8xf32>
    %271 = tpu.matmul %269, %270, %cst_130 {dimension_numbers = #tpu.dot_dimension_numbers<[1], [0], [0], [1], [0, 0, 1, 1], [], []>} : vector<24x24xf32>, vector<24x8xf32>, vector<24x8xf32> -> vector<24x8xf32>
    %272 = vector.extract_strided_slice %252 {offsets = [144, 0], sizes = [24, 24], strides = [1, 1]} : vector<192x24xf32> to vector<24x24xf32>
    %273 = vector.extract_strided_slice %215 {offsets = [24, 80], sizes = [24, 8], strides = [1, 1]} : vector<48x96xf32> to vector<24x8xf32>
    %cst_131 = arith.constant dense<0.000000e+00> : vector<24x8xf32>
    %274 = tpu.matmul %272, %273, %cst_131 {dimension_numbers = #tpu.dot_dimension_numbers<[1], [0], [0], [1], [0, 0, 1, 1], [], []>} : vector<24x24xf32>, vector<24x8xf32>, vector<24x8xf32> -> vector<24x8xf32>
    %275 = vector.extract_strided_slice %252 {offsets = [168, 0], sizes = [24, 24], strides = [1, 1]} : vector<192x24xf32> to vector<24x24xf32>
    %276 = vector.extract_strided_slice %215 {offsets = [24, 88], sizes = [24, 8], strides = [1, 1]} : vector<48x96xf32> to vector<24x8xf32>
    %cst_132 = arith.constant dense<0.000000e+00> : vector<24x8xf32>
    %277 = tpu.matmul %275, %276, %cst_132 {dimension_numbers = #tpu.dot_dimension_numbers<[1], [0], [0], [1], [0, 0, 1, 1], [], []>} : vector<24x24xf32>, vector<24x8xf32>, vector<24x8xf32> -> vector<24x8xf32>
    %278 = tpu.concatenate %268, %271, %274, %277 in 1 : vector<24x8xf32>, vector<24x8xf32>, vector<24x8xf32>, vector<24x8xf32> -> vector<24x32xf32>
    %279 = tpu.concatenate %265, %278 in 0 : vector<24x32xf32>, vector<24x32xf32> -> vector<48x32xf32>
    %cst_133 = arith.constant dense<0.000000e+00> : vector<48x32xf32>
    %280 = tpu.matmul %279, %172, %cst_133 {dimension_numbers = #tpu.dot_dimension_numbers<[1], [0], [0], [1], [0, 0, 1, 1], [], []>} : vector<48x32xf32>, vector<32x32xf32>, vector<48x32xf32> -> vector<48x32xf32>
    %281 = arith.addf %168, %280 : vector<48x32xf32>
    %282 = vector.broadcast %184 : vector<1x32xf32> to vector<48x32xf32>
    %283 = arith.addf %281, %282 : vector<48x32xf32>
    %cst_134 = arith.constant dense<0.000000e+00> : vector<48xf32>
    %284 = vector.multi_reduction <add>, %283, %cst_134 [1] : vector<48x32xf32> to vector<48xf32>
    %285 = vector.shape_cast %284 : vector<48xf32> to vector<48x1xf32>
    %cst_135 = arith.constant 3.200000e+01 : f32
    %286 = vector.broadcast %cst_135 : f32 to vector<48x1xf32>
    %287 = arith.divf %285, %286 : vector<48x1xf32>
    %288 = vector.broadcast %287 : vector<48x1xf32> to vector<48x32xf32>
    %289 = arith.subf %283, %288 : vector<48x32xf32>
    %290 = arith.mulf %289, %289 : vector<48x32xf32>
    %cst_136 = arith.constant dense<0.000000e+00> : vector<48xf32>
    %291 = vector.multi_reduction <add>, %290, %cst_136 [1] : vector<48x32xf32> to vector<48xf32>
    %292 = vector.shape_cast %291 : vector<48xf32> to vector<48x1xf32>
    %cst_137 = arith.constant 3.200000e+01 : f32
    %293 = vector.broadcast %cst_137 : f32 to vector<48x1xf32>
    %294 = arith.divf %292, %293 : vector<48x1xf32>
    %cst_138 = arith.constant 9.99999996E-13 : f32
    %295 = vector.broadcast %cst_138 : f32 to vector<48x1xf32>
    %296 = arith.addf %294, %295 : vector<48x1xf32>
    %297 = math.rsqrt %296 : vector<48x1xf32>
    %298 = vector.broadcast %297 : vector<48x1xf32> to vector<48x32xf32>
    %299 = arith.mulf %289, %298 : vector<48x32xf32>
    %300 = vector.broadcast %186 : vector<1x32xf32> to vector<48x32xf32>
    %301 = arith.mulf %299, %300 : vector<48x32xf32>
    %302 = vector.broadcast %188 : vector<1x32xf32> to vector<48x32xf32>
    %303 = arith.addf %301, %302 : vector<48x32xf32>
    %cst_139 = arith.constant dense<0.000000e+00> : vector<48x64xf32>
    %304 = tpu.matmul %303, %174, %cst_139 {dimension_numbers = #tpu.dot_dimension_numbers<[1], [0], [0], [1], [0, 0, 1, 1], [], []>} : vector<48x32xf32>, vector<32x64xf32>, vector<48x64xf32> -> vector<48x64xf32>
    %305 = vector.broadcast %190 : vector<1x64xf32> to vector<48x64xf32>
    %306 = arith.addf %304, %305 : vector<48x64xf32>
    %cst_140 = arith.constant 5.000000e-01 : f32
    %307 = vector.broadcast %cst_140 : f32 to vector<48x64xf32>
    %308 = arith.mulf %307, %306 : vector<48x64xf32>
    %cst_141 = arith.constant 4.471500e-02 : f32
    %309 = vector.broadcast %cst_141 : f32 to vector<48x64xf32>
    %310 = arith.mulf %309, %306 : vector<48x64xf32>
    %311 = arith.mulf %310, %306 : vector<48x64xf32>
    %312 = arith.mulf %311, %306 : vector<48x64xf32>
    %313 = arith.addf %306, %312 : vector<48x64xf32>
    %cst_142 = arith.constant 0.797884583 : f32
    %314 = vector.broadcast %cst_142 : f32 to vector<48x64xf32>
    %315 = arith.mulf %314, %313 : vector<48x64xf32>
    %316 = math.tanh %315 : vector<48x64xf32>
    %cst_143 = arith.constant 1.000000e+00 : f32
    %317 = vector.broadcast %cst_143 : f32 to vector<48x64xf32>
    %318 = arith.addf %317, %316 : vector<48x64xf32>
    %319 = arith.mulf %308, %318 : vector<48x64xf32>
    %cst_144 = arith.constant dense<0.000000e+00> : vector<48x32xf32>
    %320 = tpu.matmul %319, %176, %cst_144 {dimension_numbers = #tpu.dot_dimension_numbers<[1], [0], [0], [1], [0, 0, 1, 1], [], []>} : vector<48x64xf32>, vector<64x32xf32>, vector<48x32xf32> -> vector<48x32xf32>
    %321 = arith.addf %283, %320 : vector<48x32xf32>
    %322 = vector.broadcast %192 : vector<1x32xf32> to vector<48x32xf32>
    %323 = arith.addf %321, %322 : vector<48x32xf32>
    %c1_145 = arith.constant 1 : index
    %c0_146 = arith.constant 0 : index
    %324 = vector.load %arg7[%c1_145, %c0_146] : memref<4x128xf32, #tpu.memory_space<vmem>>, vector<1x32xf32>
    %c2_147 = arith.constant 2 : index
    %c0_148 = arith.constant 0 : index
    %325 = vector.load %arg7[%c2_147, %c0_148] : memref<4x128xf32, #tpu.memory_space<vmem>>, vector<1x32xf32>
    %c3_149 = arith.constant 3 : index
    %c0_150 = arith.constant 0 : index
    %326 = vector.load %arg7[%c3_149, %c0_150] : memref<4x128xf32, #tpu.memory_space<vmem>>, vector<1x128xf32>
    %cst_151 = arith.constant dense<0.000000e+00> : vector<48xf32>
    %327 = vector.multi_reduction <add>, %323, %cst_151 [1] : vector<48x32xf32> to vector<48xf32>
    %328 = vector.shape_cast %327 : vector<48xf32> to vector<48x1xf32>
    %cst_152 = arith.constant 3.200000e+01 : f32
    %329 = vector.broadcast %cst_152 : f32 to vector<48x1xf32>
    %330 = arith.divf %328, %329 : vector<48x1xf32>
    %331 = vector.broadcast %330 : vector<48x1xf32> to vector<48x32xf32>
    %332 = arith.subf %323, %331 : vector<48x32xf32>
    %333 = arith.mulf %332, %332 : vector<48x32xf32>
    %cst_153 = arith.constant dense<0.000000e+00> : vector<48xf32>
    %334 = vector.multi_reduction <add>, %333, %cst_153 [1] : vector<48x32xf32> to vector<48xf32>
    %335 = vector.shape_cast %334 : vector<48xf32> to vector<48x1xf32>
    %cst_154 = arith.constant 3.200000e+01 : f32
    %336 = vector.broadcast %cst_154 : f32 to vector<48x1xf32>
    %337 = arith.divf %335, %336 : vector<48x1xf32>
    %cst_155 = arith.constant 9.99999996E-13 : f32
    %338 = vector.broadcast %cst_155 : f32 to vector<48x1xf32>
    %339 = arith.addf %337, %338 : vector<48x1xf32>
    %340 = math.rsqrt %339 : vector<48x1xf32>
    %341 = vector.broadcast %340 : vector<48x1xf32> to vector<48x32xf32>
    %342 = arith.mulf %332, %341 : vector<48x32xf32>
    %343 = vector.broadcast %324 : vector<1x32xf32> to vector<48x32xf32>
    %344 = arith.mulf %342, %343 : vector<48x32xf32>
    %345 = vector.broadcast %325 : vector<1x32xf32> to vector<48x32xf32>
    %346 = arith.addf %344, %345 : vector<48x32xf32>
    %347 = vector.extract_strided_slice %346 {offsets = [8, 0], sizes = [16, 32], strides = [1, 1]} : vector<48x32xf32> to vector<16x32xf32>
    %348 = vector.extract_strided_slice %346 {offsets = [32, 0], sizes = [16, 32], strides = [1, 1]} : vector<48x32xf32> to vector<16x32xf32>
    %349 = tpu.concatenate %347, %348 in 0 : vector<16x32xf32>, vector<16x32xf32> -> vector<32x32xf32>
    %c0_156 = arith.constant 0 : index
    %c0_157 = arith.constant 0 : index
    %350 = vector.load %arg6[%c0_156, %c0_157] : memref<32x128xf32, #tpu.memory_space<vmem>>, vector<32x128xf32>
    %cst_158 = arith.constant dense<0.000000e+00> : vector<32x128xf32>
    %351 = tpu.matmul %349, %350, %cst_158 {dimension_numbers = #tpu.dot_dimension_numbers<[1], [0], [0], [1], [0, 0, 1, 1], [], []>} : vector<32x32xf32>, vector<32x128xf32>, vector<32x128xf32> -> vector<32x128xf32>
    %352 = vector.broadcast %326 : vector<1x128xf32> to vector<32x128xf32>
    %353 = arith.addf %351, %352 : vector<32x128xf32>
    %c0_159 = arith.constant 0 : index
    %c0_160 = arith.constant 0 : index
    %354 = vector.load %arg8[%c0_159, %c0_160] : memref<32x128xf32, #tpu.memory_space<vmem>>, vector<32x128xf32>
    tpu.vector_store %arg8[%c0_159, %c0_160], %353 {strides = array<i32>} : memref<32x128xf32, #tpu.memory_space<vmem>>, vector<32x128xf32>,
    return
  }
  func.func @transform_0(%arg0: i32) -> (i32, i32) {
    %c0_i32 = arith.constant 0 : i32
    %c0_i32_0 = arith.constant 0 : i32
    %c0_i32_1 = arith.constant 0 : i32
    return %c0_i32, %c0_i32_0 : i32, i32
  }
  func.func @transform_1(%arg0: i32) -> (i32, i32) {
    %c0_i32 = arith.constant 0 : i32
    %c0_i32_0 = arith.constant 0 : i32
    %c0_i32_1 = arith.constant 0 : i32
    return %c0_i32, %c0_i32_0 : i32, i32
  }
  func.func @transform_2(%arg0: i32) -> (i32, i32) {
    %c0_i32 = arith.constant 0 : i32
    %c0_i32_0 = arith.constant 0 : i32
    %c0_i32_1 = arith.constant 0 : i32
    return %c0_i32, %c0_i32_0 : i32, i32
  }
  func.func @transform_3(%arg0: i32) -> (i32, i32, i32) {
    %c0_i32 = arith.constant 0 : i32
    %c0_i32_0 = arith.constant 0 : i32
    %c0_i32_1 = arith.constant 0 : i32
    %c0_i32_2 = arith.constant 0 : i32
    return %c0_i32, %c0_i32_0, %c0_i32_1 : i32, i32, i32
  }
  func.func @transform_4(%arg0: i32) -> (i32, i32, i32) {
    %c0_i32 = arith.constant 0 : i32
    %c0_i32_0 = arith.constant 0 : i32
    %c0_i32_1 = arith.constant 0 : i32
    %c0_i32_2 = arith.constant 0 : i32
    return %c0_i32, %c0_i32_0, %c0_i32_1 : i32, i32, i32
  }
  func.func @transform_5(%arg0: i32) -> (i32, i32) {
    %c0_i32 = arith.constant 0 : i32
    %c0_i32_0 = arith.constant 0 : i32
    %c0_i32_1 = arith.constant 0 : i32
    return %c0_i32, %c0_i32_0 : i32, i32
  }
  func.func @transform_6(%arg0: i32) -> (i32, i32) {
    %c0_i32 = arith.constant 0 : i32
    %c0_i32_0 = arith.constant 0 : i32
    %c0_i32_1 = arith.constant 0 : i32
    return %c0_i32, %c0_i32_0 : i32, i32
  }
  func.func @transform_7(%arg0: i32) -> (i32, i32) {
    %c0_i32 = arith.constant 0 : i32
    %c0_i32_0 = arith.constant 0 : i32
    %c0_i32_1 = arith.constant 0 : i32
    return %c0_i32, %c0_i32_0 : i32, i32
  }
}

</mosaic_0001>

<bundles_post_ra>
// kernel: latent_motion_decoder_forward.1
= control target key start
LH: loop header
LB: loop body
LE: loop exit
PB: predicated region body
PF: predicated region fallthrough
CT: control target
= control target key end

     0   :  { %vm43_vm0 = vcmask 392192   ;;  %vm175_vm1 = vcmask 261120   ;;  %s7727_s20 = smov 120   ;;  %s7728_s21 = smov 96   ;;  %vm7730_vm2 = vmmov 0   ;;  %vm401_vm3 = vcmask 64512   ;;  %s9567_s2 = inlined_call_operand.vmem [shape: f32[64,32], index: 2, kind: input, shape index: {}]   ;;  %s9568_s0 = inlined_call_operand.vmem [shape: f32[32,48], index: 0, kind: input, shape index: {}]   ;;  %s9569_s1 = inlined_call_operand.vmem [shape: f32[16,32], index: 1, kind: input, shape index: {}]   ;;  %s9570_s6 = inlined_call_operand.vmem [shape: f32[4,128], index: 6, kind: input, shape index: {}]   ;;  %s9571_s4 = inlined_call_operand.vmem [shape: f32[2,8,96], index: 4, kind: input, shape index: {}]   ;;  %s9572_s3 = inlined_call_operand.vmem [shape: f32[2,160,96], index: 3, kind: input, shape index: {}]   ;;  %s9573_s5 = inlined_call_operand.vmem [shape: f32[32,128], index: 5, kind: input, shape index: {}]   ;;  %s9574_s7 = inlined_call_operand.vmem [shape: f32[32,128], index: 7, kind: output, shape index: {}]  }
   0x1   :  { %v26_v0 = vld [vmem:[%s9567_s2] sm:$0xff]  ;;  %v27_v1 = vld [vmem:[%s9567_s2 + $0x8] sm:$0xff]  ;;  %v28_v2 = vld [vmem:[%s9567_s2 + $0x10] sm:$0xff]  ;;  %s7729_s22 = smov 112   ;;  %s7732_s23 = smov 80   ;;  %vm1243_vm5 = vcmask 195584  }
   0x2   :  { %v7059_v3 = vpack.c.bf16 %v27_v1, %v26_v0  ;;  %v29_v4 = vld [vmem:[%s9567_s2 + $0x18] sm:$0xff]  ;;  %v30_v6 = vld [vmem:[%s9567_s2 + $0x20] sm:$0xff]  ;;  %v31_v7 = vld [vmem:[%s9567_s2 + $0x28] sm:$0xff]  ;;  %s7733_s24 = smov 88   ;;  %s7734_s25 = smov 72   ;;  %vm1939_vm6 = vcmask 130048  }
   0x3   :  { %v7063_v5 = vpack.c.bf16 %v29_v4, %v28_v2  ;;  %v35_v8 = vld [vmem:[%s9568_s0] sm:$0xff]  ;;  %v7067_v11 = vpack.c.bf16 %v31_v7, %v30_v6  ;;  %v36_v12 = vld [vmem:[%s9568_s0 + $0x8] sm:$0xff]  ;;  %v37_v13 = vld [vmem:[%s9568_s0 + $0x10] sm:$0xff]  ;;  %s7735_s26 = smov 104   ;;  %s7736_s27 = smov 56   ;;  %vm2781_vm7 = vcmask 523264  }
   0x4   :  { %7060 = vmatprep.subr.bf16.mxu0 %v7059_v3  ;;  %6407 = vmatprep.mubr.msk.f32.mxu0 %vm43_vm0, %v35_v8  ;;  %v141_v9 = vld [vmem:[%s9569_s1] sm:$0xff]  ;;  %v38_v14 = vld [vmem:[%s9568_s0 + $0x18] sm:$0xff]  ;;  %v32_v21 = vld [vmem:[%s9567_s2 + $0x30] sm:$0xff]  ;;  %s7737_s28 = smov 64   ;;  %s7738_s0 = smov 40  }
   0x5   :  { %7062 = vmatpush3.bf16.msra.mxu0 %v7059_v3  ;;  %v176_v10 = vsel %vm175_vm1, %v141_v9, 0.0  ;;  %v5849_v16 = vld [vmem:[%s9570_s6] ss:$0 sm:$0xff]  ;;  %v33_v17 = vld [vmem:[%s9567_s2 + $0x38] sm:$0xff]  ;;  %v144_v28 = vld [vmem:[%s9569_s1 + $0x8] sm:$0xff]  ;;  %s7739_s29 = smov 48  }
   0x6   :  { %7064 = vmatprep.subr.bf16.mxu0 %v7063_v5  ;;  %177 = vadd.xlane.f32.xlu0 %v176_v10  ;;  %v185_v35 = vsel %vm175_vm1, %v144_v28, 0.0  ;;  %v5854_v6 = vld [vmem:[%s9571_s4] ss:$0 sm:$0xff]  ;;  %v5855_v8 = vld [vmem:[%s9571_s4 + $0x1] ss:$0 sm:$0xff]  ;;  %vm8014_vm4 = vmpackc.low %vm401_vm3, %vm401_vm3  ;;  %s7740_s10 = smov 8  }
   0x7   :  { %s7741_s15 = smov 16   ;;  %s7742_s16 = smov 24  }
   0x9   :  { %7066 = vmatpush3.bf16.msra.mxu0 %v7063_v5 }
   0xa   :  { %7068 = vmatprep.subr.bf16.mxu0 %v7067_v11 }
   0xd   :  { %7070 = vmatpush3.bf16.msra.mxu0 %v7067_v11  ;;  %v147_v11 = vld [vmem:[%s9572_s3] sm:$0xff] }
  0x10   :  { %6408 = vmatmul.mubr.msk.f32.vlgmr.msra.gmra.mrb[0].mxu0 %vm43_vm0, %v36_v12  ;;  %v148_v12 = vld [vmem:[%s9572_s3 + $0x8] sm:$0xff] }
  0x11   :  { %6410 = vmatprep.mubr.msk.f32.mxu0 %vm43_vm0, %v37_v13  ;;  %v7071_v13 = vpack.c.bf16 %v148_v12, %v147_v11 }
  0x13   :  { %7072 = vmatprep.subr.bf16.mxu1 %v7071_v13 }
  0x14   :  { %6411 = vmatmul.mubr.msk.f32.gmra.mrb[2].mxu0 %vm43_vm0, %v38_v14  ;;  %v149_v14 = vld [vmem:[%s9572_s3 + $0x10] sm:$0xff]  ;;  %7074 = vmatpush3.bf16.msra.mxu1 %v7071_v13 }
  0x93   :  { %v178_v15 = vpop.xlane.xlu0 %177 }
  0x94   :  { %v195_v19 = vmul.f32 0.03125, %v178_v15  ;;  %v150_v15 = vld [vmem:[%s9572_s3 + $0x18] sm:$0xff] }
  0x96   :  { %v201_v27 = vsub.f32 %v141_v9, %v195_v19 }
  0x98   :  { %v207_v37 = vmul.f32 %v201_v27, %v201_v27 }
  0x9a   :  { %v213_v40 = vsel %vm175_vm1, %v207_v37, 0.0 }
  0xe3   :  { %v6409_v18 = vpop.f32.mrb[0].mxu0 }
  0xe4   :  { %v128_v20 = vadd.f32 %v6409_v18, %v5849_v16  ;;  %v122_v22 = vpop.f32.mrb[1].mxu0 }
  0xe5   :  { %v123_v23 = vadd.f32 %v5849_v16, %v122_v22 }
  0xe6   :  { %v7830_v24 = vadd.f32 %v128_v20, %v33_v17 }
  0xe7   :  { %v7832_v25 = vadd.f32 %v123_v23, %v32_v21  ;;  %v6412_v26 = vpop.f32.mrb[2].mxu0 }
  0xe8   :  { %v138_v29 = vadd.f32 %v6412_v26, %v5849_v16  ;;  %v132_v30 = vpop.f32.mrb[3].mxu0  ;;  %v182_v31 = vsel %vm175_vm1, %v7830_v24, 0.0 }
  0xe9   :  { %v133_v32 = vadd.f32 %v5849_v16, %v132_v30  ;;  %183 = vadd.xlane.f32.xlu1 %v182_v31  ;;  %v179_v33 = vsel %vm175_vm1, %v7832_v25, 0.0  ;;  %v7075_v16 = vpack.c.bf16 %v150_v15, %v149_v14 }
  0xea   :  { %v7841_v34 = vadd.f32 %v138_v29, %v33_v17  ;;  %180 = vadd.xlane.f32.xlu0 %v179_v33 }
  0xeb   :  { %v7844_v36 = vadd.f32 %v133_v32, %v32_v21  ;;  %7076 = vmatprep.subr.bf16.mxu1 %v7075_v16 }
  0xec   :  { %v191_v39 = vsel %vm175_vm1, %v7841_v34, 0.0  ;;  %7078 = vmatpush3.bf16.msra.mxu1 %v7075_v16 }
  0xed   :  { %186 = vadd.xlane.f32.xlu1 %v185_v35  ;;  %v188_v38 = vsel %vm175_vm1, %v7844_v36, 0.0 }
  0xee   :  { %189 = vadd.xlane.f32.xlu0 %v188_v38 }
  0xf1   :  { %192 = vadd.xlane.f32.xlu1 %v191_v39 }
  0xf2   :  { %214 = vadd.xlane.f32.xlu0 %v213_v40 }
 0x176   :  { %v184_v41 = vpop.xlane.xlu1 %183 }
 0x177   :  { %v197_v42 = vmul.f32 0.03125, %v184_v41  ;;  %v181_v43 = vpop.xlane.xlu0 %180 }
 0x178   :  { %v196_v44 = vmul.f32 0.03125, %v181_v43 }
 0x179   :  { %v7852_v45 = vsub.f32 %v7830_v24, %v197_v42 }
 0x17a   :  { %v7855_v46 = vsub.f32 %v7832_v25, %v196_v44  ;;  %v187_v47 = vpop.xlane.xlu1 %186 }
 0x17b   :  { %v198_v48 = vmul.f32 0.03125, %v187_v47  ;;  %v190_v49 = vpop.xlane.xlu0 %189  ;;  %v209_v50 = vmul.f32 %v7852_v45, %v7852_v45 }
 0x17c   :  { %v199_v51 = vmul.f32 0.03125, %v190_v49  ;;  %v208_v52 = vmul.f32 %v7855_v46, %v7855_v46 }
 0x17d   :  { %v7861_v53 = vsub.f32 %v144_v28, %v198_v48  ;;  %v219_v54 = vsel %vm175_vm1, %v209_v50, 0.0 }
 0x17e   :  { %v7865_v55 = vsub.f32 %v7844_v36, %v199_v51  ;;  %v193_v56 = vpop.xlane.xlu1 %192  ;;  %220 = vadd.xlane.f32.xlu0 %v219_v54  ;;  %v216_v57 = vsel %vm175_vm1, %v208_v52, 0.0 }
 0x17f   :  { %v200_v58 = vmul.f32 0.03125, %v193_v56  ;;  %217 = vadd.xlane.f32.xlu1 %v216_v57  ;;  %v215_v59 = vpop.xlane.xlu0 %214  ;;  %v210_v60 = vmul.f32 %v7861_v53, %v7861_v53  ;;  %v5856_v57 = vld [vmem:[%s9571_s4 + $0x2] ss:$0 sm:$0xff] }
 0x180   :  { %v231_v61 = vmul.f32 0.03125, %v215_v59  ;;  %v211_v62 = vmul.f32 %v7865_v55, %v7865_v55 }
 0x181   :  { %v7873_v63 = vsub.f32 %v7841_v34, %v200_v58  ;;  %v222_v0 = vsel %vm175_vm1, %v210_v60, 0.0 }
 0x182   :  { %v237_v1 = vadd.f32 1e-12, %v231_v61  ;;  %v225_v2 = vsel %vm175_vm1, %v211_v62, 0.0 }
 0x183   :  { %223 = vadd.xlane.f32.xlu1 %v222_v0  ;;  %226 = vadd.xlane.f32.xlu0 %v225_v2  ;;  %v212_v3 = vmul.f32 %v7873_v63, %v7873_v63 }
 0x184   :  { %7452 = vrsqrt.f32 %v237_v1  ;;  %v7731_v1 = vmov 0.0  }
 0x185   :  { %v228_v4 = vsel %vm175_vm1, %v212_v3, 0.0  ;;  %6451 = vmatprep.mubr.msk.f32.mxu0 %vm7730_vm2, %v7731_v1 }
 0x187   :  { %229 = vadd.xlane.f32.xlu1 %v228_v4 }
 0x18e   :  { %v7453_v5 = vpop.eup %7452 }
 0x18f   :  { %v249_v7 = vmul.f32 %v7453_v5, %v201_v27 }
 0x191   :  { %v259_v9 = vmul.f32 %v5854_v6, %v249_v7 }
 0x193   :  { %v269_v10 = vadd.f32 %v5855_v8, %v259_v9 }
 0x195   :  { %6421 = vmatprep.mubr.msk.f32.mxu1 %vm175_vm1, %v269_v10 }
 0x20b   :  { %v221_v17 = vpop.xlane.xlu0 %220 }
 0x20c   :  { %v233_v18 = vmul.f32 0.03125, %v221_v17  ;;  %v218_v19 = vpop.xlane.xlu1 %217 }
 0x20d   :  { %v232_v20 = vmul.f32 0.03125, %v218_v19 }
 0x20e   :  { %v239_v21 = vadd.f32 1e-12, %v233_v18 }
 0x20f   :  { %v238_v22 = vadd.f32 1e-12, %v232_v20 }
 0x210   :  { %7454 = vrsqrt.f32 %v239_v21  ;;  %v224_v23 = vpop.xlane.xlu1 %223  ;;  %v227_v26 = vpop.xlane.xlu0 %226 }
 0x211   :  { %7456 = vrsqrt.f32 %v238_v22  ;;  %v234_v27 = vmul.f32 0.03125, %v224_v23  ;;  %v235_v28 = vmul.f32 0.03125, %v227_v26 }
 0x213   :  { %v240_v29 = vadd.f32 1e-12, %v234_v27  ;;  %v241_v30 = vadd.f32 1e-12, %v235_v28 }
 0x214   :  { %v230_v31 = vpop.xlane.xlu1 %229 }
 0x215   :  { %7458 = vrsqrt.f32 %v240_v29  ;;  %v236_v32 = vmul.f32 0.03125, %v230_v31 }
 0x216   :  { %7460 = vrsqrt.f32 %v241_v30 }
 0x217   :  { %v242_v33 = vadd.f32 1e-12, %v236_v32 }
 0x219   :  { %7462 = vrsqrt.f32 %v242_v33 }
 0x21a   :  { %v7455_v35 = vpop.eup %7454 }
 0x21b   :  { %v7457_v37 = vpop.eup %7456  ;;  %v251_v38 = vmul.f32 %v7455_v35, %v7852_v45 }
 0x21c   :  { %v250_v39 = vmul.f32 %v7457_v37, %v7855_v46 }
 0x21d   :  { %v261_v40 = vmul.f32 %v5854_v6, %v251_v38 }
 0x21e   :  { %v260_v41 = vmul.f32 %v5854_v6, %v250_v39 }
 0x21f   :  { %v7459_v42 = vpop.eup %7458  ;;  %v271_v48 = vadd.f32 %v5855_v8, %v261_v40 }
 0x220   :  { %v7461_v43 = vpop.eup %7460  ;;  %v270_v44 = vadd.f32 %v5855_v8, %v260_v41  ;;  %v252_v47 = vmul.f32 %v7459_v42, %v7861_v53 }
 0x221   :  { %v253_v49 = vmul.f32 %v7461_v43, %v7865_v55  ;;  %v7726_v55 = vmov 0.0|0.0  }
 0x222   :  { %6422 = vmatmul.mubr.msk.f32.vlgmr.msra.gmra.mrb[0].mxu1 %vm175_vm1, %v270_v44  ;;  %v262_v50 = vmul.f32 %v5854_v6, %v252_v47  ;;  %7079 = vmatprep.subr.bf16.mxu1 %v7726_v55 }
 0x223   :  { %v7463_v51 = vpop.eup %7462  ;;  %6424 = vmatprep.mubr.msk.f32.mxu1 %vm175_vm1, %v271_v48  ;;  %v263_v52 = vmul.f32 %v5854_v6, %v253_v49  ;;  %7083 = vmatprep.subr.bf16.mxu0 %v7726_v55 }
 0x224   :  { %v272_v45 = vadd.f32 %v5855_v8, %v262_v50  ;;  %v254_v46 = vmul.f32 %v7463_v51, %v7873_v63 }
 0x225   :  { %v273_v54 = vadd.f32 %v5855_v8, %v263_v52 }
 0x226   :  { %6425 = vmatmul.mubr.msk.f32.gmra.mrb[2].mxu1 %vm175_vm1, %v272_v45  ;;  %v264_v56 = vmul.f32 %v5854_v6, %v254_v46 }
 0x227   :  { %6427 = vmatprep.mubr.msk.f32.mxu1 %vm175_vm1, %v273_v54 }
 0x228   :  { %v274_v53 = vadd.f32 %v5855_v8, %v264_v56 }
 0x22a   :  { %6428 = vmatmul.mubr.msk.f32.gmra.mrb[4].mxu1 %vm175_vm1, %v274_v53 }
 0x22b   :  { %6436 = vmatprep.mubr.msk.f32.mxu1 %vm7730_vm2, %v7731_v1 }
 0x2f5   :  { %v6423_v58 = vpop.f32.mrb[0].mxu1 }
 0x2f6   :  { %v7914_v59 = vadd.f32 %v6423_v58, %v5856_v57  ;;  %v363_v60 = vpop.f32.mrb[1].mxu1 }
 0x2f7   :  { %v7916_v61 = vadd.f32 %v5856_v57, %v363_v60 }
 0x2f8   :  { %496 = vrot.lane.b32.xlu1 %v7914_v59, %s7727_s20 }
 0x2f9   :  { %v6426_v62 = vpop.f32.mrb[2].mxu1  ;;  %v7292_v63 = vpack.i.bf16 %v7914_v59, %v7916_v61 }
 0x2fa   :  { %v373_v0 = vpop.f32.mrb[3].mxu1  ;;  %v7948_v6 = vadd.f32 %v6426_v62, %v5856_v57 }
 0x2fb   :  { %7293 = vrot.lane.b32.xlu0 %v7292_v63, %s7728_s21  ;;  %v7934_v4 = vadd.f32 %v5856_v57, %v373_v0 }
 0x2fc   :  { %600 = vrot.lane.b32.xlu1 %v7914_v59, %s7729_s22 }
 0x2fd   :  { %v6429_v2 = vpop.f32.mrb[4].mxu1 }
 0x2fe   :  { %v383_v3 = vpop.f32.mrb[5].mxu1  ;;  %v7968_v8 = vadd.f32 %v6429_v2, %v5856_v57 }
 0x2ff   :  { %7303 = vrot.lane.b32.xlu0 %v7292_v63, %s7732_s23  ;;  %v7944_v5 = vadd.f32 %v5856_v57, %v383_v3 }
 0x300   :  { %7298 = vrot.lane.b32.xlu1 %v7292_v63, %s7733_s24 }
 0x301   :  { %v7954_v7 = vpack.i.bf16 %v7944_v5, %v7948_v6 }
 0x303   :  { %494 = vrot.lane.b32.xlu0 %v7916_v61, %s7727_s20 }
 0x304   :  { %7308 = vrot.lane.b32.xlu1 %v7292_v63, %s7734_s25 }
 0x307   :  { %598 = vrot.lane.b32.xlu0 %v7916_v61, %s7729_s22 }
 0x308   :  { %399 = vrot.lane.b32.xlu1 %v7934_v4, %s7728_s21 }
 0x30b   :  { %702 = vrot.lane.b32.xlu0 %v7916_v61, %s7735_s26 }
 0x30c   :  { %504 = vrot.lane.b32.xlu1 %v7934_v4, %s7733_s24 }
 0x30f   :  { %498 = vrot.lane.b32.xlu0 %v7934_v4, %s7727_s20 }
 0x310   :  { %608 = vrot.lane.b32.xlu1 %v7934_v4, %s7732_s23 }
 0x313   :  { %712 = vrot.lane.b32.xlu0 %v7934_v4, %s7734_s25 }
 0x314   :  { %7313 = vrot.lane.b32.xlu1 %v7954_v7, %s7728_s21 }
 0x317   :  { %704 = vrot.lane.b32.xlu0 %v7914_v59, %s7735_s26 }
 0x318   :  { %7318 = vrot.lane.b32.xlu1 %v7954_v7, %s7733_s24 }
 0x31b   :  { %706 = vrot.lane.b32.xlu0 %v7934_v4, %s7735_s26 }
 0x31c   :  { %602 = vrot.lane.b32.xlu1 %v7934_v4, %s7729_s22 }
 0x31f   :  { %917 = vrot.lane.b32.xlu0 %v7968_v8, %s7733_s24 }
 0x320   :  { %813 = vrot.lane.b32.xlu1 %v7968_v8, %s7728_s21 }
 0x323   :  { %7328 = vrot.lane.b32.xlu0 %v7954_v7, %s7734_s25 }
 0x324   :  { %7323 = vrot.lane.b32.xlu1 %v7954_v7, %s7732_s23 }
 0x327   :  { %909 = vrot.lane.b32.xlu0 %v7944_v5, %s7727_s20 }
 0x328   :  { %907 = vrot.lane.b32.xlu1 %v7948_v6, %s7727_s20 }
 0x32b   :  { %1021 = vrot.lane.b32.xlu0 %v7968_v8, %s7732_s23 }
 0x32c   :  { %911 = vrot.lane.b32.xlu1 %v7968_v8, %s7727_s20 }
 0x32f   :  { %1011 = vrot.lane.b32.xlu0 %v7948_v6, %s7729_s22 }
 0x330   :  { %1125 = vrot.lane.b32.xlu1 %v7968_v8, %s7734_s25 }
 0x333   :  { %1013 = vrot.lane.b32.xlu0 %v7944_v5, %s7729_s22 }
 0x334   :  { %1115 = vrot.lane.b32.xlu1 %v7948_v6, %s7735_s26 }
 0x337   :  { %1117 = vrot.lane.b32.xlu0 %v7944_v5, %s7735_s26 }
 0x338   :  { %1015 = vrot.lane.b32.xlu1 %v7968_v8, %s7729_s22 }
 0x33b   :  { %7338 = vrot.lane.b32.xlu0 %v7292_v63, %s7736_s27 }
 0x33c   :  { %1119 = vrot.lane.b32.xlu1 %v7968_v8, %s7735_s26 }
 0x33f   :  { %1610 = vrot.lane.b32.xlu0 %v7934_v4, %s7736_s27 }
 0x340   :  { %7333 = vrot.lane.b32.xlu1 %v7292_v63, %s7737_s28 }
 0x343   :  { %7348 = vrot.lane.b32.xlu0 %v7292_v63, %s7738_s0 }
 0x344   :  { %1512 = vrot.lane.b32.xlu1 %v7934_v4, %s7737_s28 }
 0x348   :  { %7343 = vrot.lane.b32.xlu1 %v7292_v63, %s7739_s29 }
 0x34c   :  { %1708 = vrot.lane.b32.xlu1 %v7934_v4, %s7739_s29 }
 0x36a   :  { %v497_v9 = vpop.permute.xlu1 %496 }
 0x36d   :  { %v7294_v10 = vpop.permute.xlu0 %7293 }
 0x36e   :  { %v7296_v11 = vunpack.i.h.bf16 %v7294_v10  ;;  %v7295_v12 = vunpack.i.l.bf16 %v7294_v10  ;;  %v8010_v13 = vpop.permute.xlu1 %600 }
 0x370   :  { %v7080_v15 = vpack.c.bf16 %v7296_v11, %v7295_v12 }
 0x371   :  { %v7304_v16 = vpop.permute.xlu0 %7303 }
 0x372   :  { %v7299_v17 = vpop.permute.xlu1 %7298  ;;  %7082 = vmatpush3.bf16.xpose.msk.msra.mxu1 %vm8014_vm4, %v7080_v15  ;;  %v7306_v23 = vunpack.i.h.bf16 %v7304_v16  ;;  %v7305_v26 = vunpack.i.l.bf16 %v7304_v16 }
 0x373   :  { %v7301_v18 = vunpack.i.h.bf16 %v7299_v17  ;;  %v7300_v19 = vunpack.i.l.bf16 %v7299_v17  ;;  %6434 = vmatprep.subr.mxu1 %v7731_v1 }
 0x374   :  { %v7088_v29 = vpack.c.bf16 %v7306_v23, %v7305_v26 }
 0x375   :  { %v7084_v20 = vpack.c.bf16 %v7301_v18, %v7300_v19  ;;  %v495_v21 = vpop.permute.xlu0 %494 }
 0x376   :  { %v7309_v22 = vpop.permute.xlu1 %7308 }
 0x377   :  { %7086 = vmatpush3.bf16.xpose.msk.msra.mxu0 %vm8014_vm4, %v7084_v20  ;;  %v7311_v30 = vunpack.i.h.bf16 %v7309_v22  ;;  %v7310_v31 = vunpack.i.l.bf16 %v7309_v22 }
 0x378   :  { %6449 = vmatprep.subr.mxu0 %v7731_v1 }
 0x379   :  { %v599_v27 = vpop.permute.xlu0 %598  ;;  %v7092_v35 = vpack.c.bf16 %v7311_v30, %v7310_v31 }
 0x37a   :  { %v400_v28 = vpop.permute.xlu1 %399 }
 0x37b   :  { %6435 = vmatpush3.xpose.msk.msra.mxu1 %vm401_vm3, %v400_v28 }
 0x37c   :  { %7087 = vmatprep.subr.bf16.mxu1 %v7726_v55 }
 0x37d   :  { %v703_v32 = vpop.permute.xlu0 %702 }
 0x37e   :  { %v505_v33 = vpop.permute.xlu1 %504  ;;  %6437 = vmatmul.mubr.msk.f32.vlgmr.msra.gmra.mrb[6].mxu1 %vm401_vm3, %v7916_v61 }
 0x37f   :  { %6450 = vmatpush3.xpose.msk.msra.mxu0 %vm401_vm3, %v505_v33  ;;  %7090 = vmatpush3.bf16.xpose.msk.msra.mxu1 %vm8014_vm4, %v7088_v29 }
 0x380   :  { %6439 = vmatprep.mubr.msk.f32.mxu1 %vm7730_vm2, %v7731_v1  ;;  %7091 = vmatprep.subr.bf16.mxu0 %v7726_v55 }
 0x381   :  { %v499_v37 = vpop.permute.xlu0 %498  ;;  %6464 = vmatprep.subr.mxu1 %v7731_v1 }
 0x382   :  { %v609_v38 = vpop.permute.xlu1 %608  ;;  %6440 = vmatmul.mubr.msk.f32.gmra.mrb[8].mxu1 %vm401_vm3, %v7914_v59  ;;  %6452 = vmatmul.mubr.msk.f32.vlgmr.msra.gmra.mrb[4].mxu0 %vm401_vm3, %v495_v21 }
 0x383   :  { %7094 = vmatpush3.bf16.xpose.msk.msra.mxu0 %vm8014_vm4, %v7092_v35  ;;  %6454 = vmatprep.mubr.msk.f32.mxu0 %vm7730_vm2, %v7731_v1 }
 0x384   :  { %6442 = vmatprep.mubr.msk.f32.mxu1 %vm7730_vm2, %v7731_v1  ;;  %6479 = vmatprep.subr.mxu0 %v7731_v1 }
 0x385   :  { %v713_v39 = vpop.permute.xlu0 %712 }
 0x386   :  { %v7314_v40 = vpop.permute.xlu1 %7313  ;;  %6443 = vmatmul.mubr.msk.f32.gmra.mrb[10].mxu1 %vm401_vm3, %v7934_v4  ;;  %6455 = vmatmul.mubr.msk.f32.gmra.mrb[6].mxu0 %vm401_vm3, %v497_v9 }
 0x387   :  { %v7316_v41 = vunpack.i.h.bf16 %v7314_v40  ;;  %v7315_v42 = vunpack.i.l.bf16 %v7314_v40  ;;  %6465 = vmatpush3.xpose.msk.msra.mxu1 %vm401_vm3, %v609_v38  ;;  %6457 = vmatprep.mubr.msk.f32.mxu0 %vm7730_vm2, %v7731_v1 }
 0x388   :  { %6466 = vmatprep.mubr.msk.f32.mxu1 %vm7730_vm2, %v7731_v1  ;;  %7095 = vmatprep.subr.bf16.mxu1 %v7726_v55 }
 0x389   :  { %v7096_v43 = vpack.c.bf16 %v7316_v41, %v7315_v42  ;;  %v705_v44 = vpop.permute.xlu0 %704 }
 0x38a   :  { %v7319_v47 = vpop.permute.xlu1 %7318  ;;  %6458 = vmatmul.mubr.msk.f32.gmra.mrb[8].mxu0 %vm401_vm3, %v499_v37  ;;  %6467 = vmatmul.mubr.msk.f32.vlgmr.msra.gmra.mrb[12].mxu1 %vm401_vm3, %v599_v27 }
 0x38b   :  { %v7321_v48 = vunpack.i.h.bf16 %v7319_v47  ;;  %v7320_v49 = vunpack.i.l.bf16 %v7319_v47  ;;  %6480 = vmatpush3.xpose.msk.msra.mxu0 %vm401_vm3, %v713_v39  ;;  %7098 = vmatpush3.bf16.xpose.msk.msra.mxu1 %vm8014_vm4, %v7096_v43 }
 0x38c   :  { %6481 = vmatprep.mubr.msk.f32.mxu0 %vm7730_vm2, %v7731_v1  ;;  %6469 = vmatprep.mubr.msk.f32.mxu1 %vm7730_vm2, %v7731_v1 }
 0x38d   :  { %v7100_v50 = vpack.c.bf16 %v7321_v48, %v7320_v49  ;;  %v707_v51 = vpop.permute.xlu0 %706  ;;  %7099 = vmatprep.subr.bf16.mxu0 %v7726_v55  ;;  %6494 = vmatprep.subr.mxu1 %v7731_v1 }
 0x38e   :  { %v603_v52 = vpop.permute.xlu1 %602  ;;  %6470 = vmatmul.mubr.msk.f32.gmra.mrb[14].mxu1 %vm401_vm3, %v8010_v13  ;;  %6482 = vmatmul.mubr.msk.f32.vlgmr.msra.gmra.mrb[10].mxu0 %vm401_vm3, %v703_v32 }
 0x38f   :  { %7102 = vmatpush3.bf16.xpose.msk.msra.mxu0 %vm8014_vm4, %v7100_v50  ;;  %6484 = vmatprep.mubr.msk.f32.mxu0 %vm7730_vm2, %v7731_v1 }
 0x390   :  { %6472 = vmatprep.mubr.msk.f32.mxu1 %vm7730_vm2, %v7731_v1  ;;  %6509 = vmatprep.subr.mxu0 %v7731_v1 }
 0x391   :  { %v918_v45 = vpop.permute.xlu0 %917 }
 0x392   :  { %v814_v46 = vpop.permute.xlu1 %813  ;;  %6473 = vmatmul.mubr.msk.f32.gmra.mrb[16].mxu1 %vm401_vm3, %v603_v52  ;;  %6485 = vmatmul.mubr.msk.f32.gmra.mrb[12].mxu0 %vm401_vm3, %v705_v44 }
 0x393   :  { %6495 = vmatpush3.xpose.msk.msra.mxu1 %vm401_vm3, %v814_v46  ;;  %6487 = vmatprep.mubr.msk.f32.mxu0 %vm7730_vm2, %v7731_v1 }
 0x394   :  { %6496 = vmatprep.mubr.msk.f32.mxu1 %vm7730_vm2, %v7731_v1  ;;  %7103 = vmatprep.subr.bf16.mxu1 %v7726_v55 }
 0x395   :  { %v7329_v54 = vpop.permute.xlu0 %7328 }
 0x396   :  { %v7331_v56 = vunpack.i.h.bf16 %v7329_v54  ;;  %v7330_v53 = vunpack.i.l.bf16 %v7329_v54  ;;  %v7324_v57 = vpop.permute.xlu1 %7323  ;;  %6488 = vmatmul.mubr.msk.f32.gmra.mrb[14].mxu0 %vm401_vm3, %v707_v51  ;;  %6497 = vmatmul.mubr.msk.f32.vlgmr.msra.gmra.mrb[18].mxu1 %vm401_vm3, %v7948_v6 }
 0x397   :  { %v7326_v58 = vunpack.i.h.bf16 %v7324_v57  ;;  %v7325_v59 = vunpack.i.l.bf16 %v7324_v57  ;;  %6510 = vmatpush3.xpose.msk.msra.mxu0 %vm401_vm3, %v918_v45  ;;  %6499 = vmatprep.mubr.msk.f32.mxu1 %vm7730_vm2, %v7731_v1 }
 0x398   :  { %v7108_v60 = vpack.c.bf16 %v7331_v56, %v7330_v53  ;;  %6511 = vmatprep.mubr.msk.f32.mxu0 %vm7730_vm2, %v7731_v1  ;;  %7107 = vmatprep.subr.bf16.mxu0 %v7726_v55 }
 0x399   :  { %v7104_v61 = vpack.c.bf16 %v7326_v58, %v7325_v59  ;;  %v910_v62 = vpop.permute.xlu0 %909 }
 0x39a   :  { %v908_v63 = vpop.permute.xlu1 %907  ;;  %6500 = vmatmul.mubr.msk.f32.gmra.mrb[20].mxu1 %vm401_vm3, %v7944_v5 }
 0x39b   :  { %6512 = vmatmul.mubr.msk.f32.vlgmr.msra.gmra.mrb[16].mxu0 %vm401_vm3, %v908_v63  ;;  %7106 = vmatpush3.bf16.xpose.msk.msra.mxu1 %vm8014_vm4, %v7104_v61 }
 0x39c   :  { %7110 = vmatpush3.bf16.xpose.msk.msra.mxu0 %vm8014_vm4, %v7108_v60  ;;  %6502 = vmatprep.mubr.msk.f32.mxu1 %vm7730_vm2, %v7731_v1 }
 0x39d   :  { %v1022_v0 = vpop.permute.xlu0 %1021  ;;  %6514 = vmatprep.mubr.msk.f32.mxu0 %vm7730_vm2, %v7731_v1  ;;  %6524 = vmatprep.subr.mxu1 %v7731_v1 }
 0x39e   :  { %v912_v2 = vpop.permute.xlu1 %911  ;;  %6503 = vmatmul.mubr.msk.f32.gmra.mrb[22].mxu1 %vm401_vm3, %v7968_v8  ;;  %6539 = vmatprep.subr.mxu0 %v7731_v1 }
 0x39f   :  { %6515 = vmatmul.mubr.msk.f32.gmra.mrb[18].mxu0 %vm401_vm3, %v910_v62  ;;  %6526 = vmatprep.mubr.msk.f32.mxu1 %vm7730_vm2, %v7731_v1 }
 0x3a0   :  { %6517 = vmatprep.mubr.msk.f32.mxu0 %vm7730_vm2, %v7731_v1 }
 0x3a1   :  { %v1012_v3 = vpop.permute.xlu0 %1011 }
 0x3a2   :  { %v1126_v5 = vpop.permute.xlu1 %1125 }
 0x3a3   :  { %6518 = vmatmul.mubr.msk.f32.gmra.mrb[20].mxu0 %vm401_vm3, %v912_v2  ;;  %6525 = vmatpush3.xpose.msk.msra.mxu1 %vm401_vm3, %v1022_v0 }
 0x3a4   :  { %6540 = vmatpush3.xpose.msk.msra.mxu0 %vm401_vm3, %v1126_v5  ;;  %7271 = vmatprep.subr.bf16.mxu1 %v7726_v55 }
 0x3a5   :  { %v1014_v6 = vpop.permute.xlu0 %1013  ;;  %6541 = vmatprep.mubr.msk.f32.mxu0 %vm7730_vm2, %v7731_v1  ;;  %7114 = vmatprep.subr.bf16.mxu0 %v7726_v55 }
 0x3a6   :  { %v1116_v9 = vpop.permute.xlu1 %1115  ;;  %6527 = vmatmul.mubr.msk.f32.vlgmr.msra.gmra.mrb[24].mxu1 %vm401_vm3, %v1012_v3 }
 0x3a7   :  { %7273 = vmatpush3.bf16.xpose.msk.msra.mxu1 %vm8014_vm4, %v7108_v60  ;;  %6542 = vmatmul.mubr.msk.f32.vlgmr.msra.gmra.mrb[22].mxu0 %vm401_vm3, %v1116_v9 }
 0x3a8   :  { %6529 = vmatprep.mubr.msk.f32.mxu1 %vm7730_vm2, %v7731_v1  ;;  %6544 = vmatprep.mubr.msk.f32.mxu0 %vm7730_vm2, %v7731_v1 }
 0x3a9   :  { %v1118_v10 = vpop.permute.xlu0 %1117  ;;  %7272 = vmatprep.subr.mxu1 %v7731_v1 }
 0x3aa   :  { %v1016_v11 = vpop.permute.xlu1 %1015  ;;  %6530 = vmatmul.mubr.msk.f32.gmra.mrb[26].mxu1 %vm401_vm3, %v1014_v6 }
 0x3ab   :  { %6545 = vmatmul.mubr.msk.f32.gmra.mrb[24].mxu0 %vm401_vm3, %v1118_v10  ;;  %6532 = vmatprep.mubr.msk.f32.mxu1 %vm7730_vm2, %v7731_v1 }
 0x3ac   :  { %6571 = vmatprep.mubr.msk.f32.mxu0 %vm7730_vm2, %v7731_v1 }
 0x3ad   :  { %v7339_v12 = vpop.permute.xlu0 %7338 }
 0x3ae   :  { %v7341_v13 = vunpack.i.h.bf16 %v7339_v12  ;;  %v7340_v15 = vunpack.i.l.bf16 %v7339_v12  ;;  %v1120_v16 = vpop.permute.xlu1 %1119  ;;  %6533 = vmatmul.mubr.msk.f32.gmra.mrb[28].mxu1 %vm401_vm3, %v1016_v11 }
 0x3af   :  { %7274 = vmatpush3.xpose.msk.msra.mxu1 %vm401_vm3, %v1126_v5  ;;  %6547 = vmatprep.mubr.msk.f32.mxu1 %vm7730_vm2, %v7731_v1 }
 0x3b0   :  { %v7115_v17 = vpack.c.bf16 %v7341_v13, %v7340_v15  ;;  %7111 = vmatprep.subr.bf16.mxu1 %v7726_v55 }
 0x3b1   :  { %v1611_v21 = vpop.permute.xlu0 %1610 }
 0x3b2   :  { %v7334_v18 = vpop.permute.xlu1 %7333  ;;  %6548 = vmatmul.mubr.msk.f32.vlgmr.msra.gmra.mrb[30].mxu1 %vm401_vm3, %v1120_v16  ;;  %7116 = vmatpush3.bf16.msra.mxu0 %v7115_v17 }
 0x3b3   :  { %v7336_v19 = vunpack.i.h.bf16 %v7334_v18  ;;  %v7335_v20 = vunpack.i.l.bf16 %v7334_v18  ;;  %6569 = vmatprep.subr.mxu0 %v7731_v1  ;;  %6556 = vmatprep.mubr.msk.f32.mxu1 %vm7730_vm2, %v7731_v1 }
 0x3b5   :  { %v7112_v22 = vpack.c.bf16 %v7336_v19, %v7335_v20 }
 0x3b6   :  { %6570 = vmatpush3.msra.mxu0 %v1611_v21  ;;  %v1513_v23 = vpop.permute.xlu1 %1512 }
 0x3b7   :  { %7113 = vmatpush3.bf16.msra.mxu1 %v7112_v22  ;;  %7120 = vmatprep.subr.bf16.mxu0 %v7726_v55 }
 0x3b8   :  { %6554 = vmatprep.subr.mxu1 %v7731_v1 }
 0x3bb   :  { %6555 = vmatpush3.msra.mxu1 %v1513_v23 }
 0x3bc   :  { %7117 = vmatprep.subr.bf16.mxu1 %v7726_v55 }
 0x451   :  { %v480_v26 = vpop.f32.mrb[6].mxu1 }
 0x452   :  { %v8146_v27 = vmul.f32 0.35355338, %v480_v26  ;;  %v6438_v28 = vpop.f32.mrb[7].mxu1 }
 0x454   :  { %v1244_v29 = vsel %vm1243_vm5, %v8146_v27, -inf }
 0x455   :  { %v584_v30 = vpop.f32.mrb[4].mxu0  ;;  %1245 = vmax.xlane.f32.xlu0 %v1244_v29  ;;  %v485_v31 = vpop.f32.mrb[8].mxu1 }
 0x456   :  { %v8150_v32 = vmul.f32 0.35355338, %v584_v30  ;;  %v8152_v33 = vmul.f32 0.35355338, %v485_v31  ;;  %v6441_v35 = vpop.f32.mrb[9].mxu1  ;;  %v6453_v37 = vpop.f32.mrb[5].mxu0 }
 0x458   :  { %v1253_v38 = vsel %vm1243_vm5, %v8150_v32, -inf  ;;  %v1247_v39 = vsel %vm1243_vm5, %v8152_v33, -inf }
 0x459   :  { %1254 = vmax.xlane.f32.xlu1 %v1253_v38  ;;  %v589_v40 = vpop.f32.mrb[6].mxu0  ;;  %1248 = vmax.xlane.f32.xlu0 %v1247_v39  ;;  %v490_v41 = vpop.f32.mrb[10].mxu1 }
 0x45a   :  { %v8158_v42 = vmul.f32 0.35355338, %v589_v40  ;;  %v6444_v43 = vpop.f32.mrb[11].mxu1  ;;  %v6456_v44 = vpop.f32.mrb[7].mxu0  ;;  %v8160_v47 = vmul.f32 0.35355338, %v490_v41 }
 0x45c   :  { %v1256_v48 = vsel %vm1243_vm5, %v8158_v42, -inf  ;;  %v1250_v56 = vsel %vm1243_vm5, %v8160_v47, -inf }
 0x45d   :  { %v594_v49 = vpop.f32.mrb[8].mxu0  ;;  %1257 = vmax.xlane.f32.xlu0 %v1256_v48  ;;  %v688_v50 = vpop.f32.mrb[12].mxu1 }
 0x45e   :  { %v8164_v51 = vmul.f32 0.35355338, %v594_v49  ;;  %v6459_v52 = vpop.f32.mrb[9].mxu0  ;;  %v6468_v45 = vpop.f32.mrb[13].mxu1  ;;  %v8166_v46 = vmul.f32 0.35355338, %v688_v50 }
 0x460   :  { %v1259_v54 = vsel %vm1243_vm5, %v8164_v51, -inf  ;;  %v1262_v63 = vsel %vm1243_vm5, %v8166_v46, -inf }
 0x461   :  { %1260 = vmax.xlane.f32.xlu1 %v1259_v54  ;;  %v792_v53 = vpop.f32.mrb[10].mxu0  ;;  %1251 = vmax.xlane.f32.xlu0 %v1250_v56  ;;  %v693_v57 = vpop.f32.mrb[14].mxu1 }
 0x462   :  { %v8172_v58 = vmul.f32 0.35355338, %v792_v53  ;;  %v6471_v59 = vpop.f32.mrb[15].mxu1  ;;  %v6483_v60 = vpop.f32.mrb[11].mxu0  ;;  %v8174_v61 = vmul.f32 0.35355338, %v693_v57 }
 0x464   :  { %v1271_v62 = vsel %vm1243_vm5, %v8172_v58, -inf  ;;  %v1265_v11 = vsel %vm1243_vm5, %v8174_v61, -inf }
 0x465   :  { %1272 = vmax.xlane.f32.xlu1 %v1271_v62  ;;  %v797_v0 = vpop.f32.mrb[12].mxu0  ;;  %1263 = vmax.xlane.f32.xlu0 %v1262_v63  ;;  %v698_v2 = vpop.f32.mrb[16].mxu1 }
 0x466   :  { %v8180_v3 = vmul.f32 0.35355338, %v797_v0  ;;  %v6474_v5 = vpop.f32.mrb[17].mxu1  ;;  %v6486_v6 = vpop.f32.mrb[13].mxu0  ;;  %v8182_v9 = vmul.f32 0.35355338, %v698_v2 }
 0x468   :  { %v1274_v10 = vsel %vm1243_vm5, %v8180_v3, -inf  ;;  %v1268_v20 = vsel %vm1243_vm5, %v8182_v9, -inf }
 0x469   :  { %1275 = vmax.xlane.f32.xlu1 %v1274_v10  ;;  %v802_v12 = vpop.f32.mrb[14].mxu0  ;;  %1266 = vmax.xlane.f32.xlu0 %v1265_v11  ;;  %v893_v13 = vpop.f32.mrb[18].mxu1 }
 0x46a   :  { %v8188_v15 = vmul.f32 0.35355338, %v802_v12  ;;  %v6489_v16 = vpop.f32.mrb[15].mxu0  ;;  %v6498_v17 = vpop.f32.mrb[19].mxu1  ;;  %v8190_v18 = vmul.f32 0.35355338, %v893_v13 }
 0x46c   :  { %v1277_v19 = vsel %vm1243_vm5, %v8188_v15, -inf  ;;  %v1280_v30 = vsel %vm1243_vm5, %v8190_v18, -inf }
 0x46d   :  { %1278 = vmax.xlane.f32.xlu1 %v1277_v19  ;;  %1269 = vmax.xlane.f32.xlu0 %v1268_v20  ;;  %v898_v21 = vpop.f32.mrb[20].mxu1 }
 0x46e   :  { %v6501_v22 = vpop.f32.mrb[21].mxu1  ;;  %v997_v23 = vpop.f32.mrb[16].mxu0  ;;  %v8198_v29 = vmul.f32 0.35355338, %v898_v21 }
 0x46f   :  { %v8196_v26 = vmul.f32 0.35355338, %v997_v23  ;;  %v6513_v28 = vpop.f32.mrb[17].mxu0 }
 0x470   :  { %v1283_v43 = vsel %vm1243_vm5, %v8198_v29, -inf }
 0x471   :  { %1281 = vmax.xlane.f32.xlu0 %v1280_v30  ;;  %v903_v31 = vpop.f32.mrb[22].mxu1  ;;  %v1289_v35 = vsel %vm1243_vm5, %v8196_v26, -inf  ;;  %v8250_v30 = vpop.permute.xlu1 %7343 }
 0x472   :  { %1290 = vmax.xlane.f32.xlu1 %v1289_v35  ;;  %v6504_v37 = vpop.f32.mrb[23].mxu1  ;;  %v1002_v38 = vpop.f32.mrb[18].mxu0  ;;  %v8206_v41 = vmul.f32 0.35355338, %v903_v31 }
 0x473   :  { %v8204_v39 = vmul.f32 0.35355338, %v1002_v38  ;;  %v6516_v40 = vpop.f32.mrb[19].mxu0  ;;  %v8252_v31 = vpop.permute.xlu0 %7348 }
 0x474   :  { %v1286_v52 = vsel %vm1243_vm5, %v8206_v41, -inf }
 0x475   :  { %1284 = vmax.xlane.f32.xlu0 %v1283_v43  ;;  %v1292_v44 = vsel %vm1243_vm5, %v8204_v39, -inf  ;;  %v8254_v35 = vpop.permute.xlu1 %1708 }
 0x476   :  { %1293 = vmax.xlane.f32.xlu1 %v1292_v44  ;;  %v1007_v48 = vpop.f32.mrb[20].mxu0 }
 0x477   :  { %v8212_v49 = vmul.f32 0.35355338, %v1007_v48  ;;  %v6519_v50 = vpop.f32.mrb[21].mxu0 }
 0x479   :  { %1287 = vmax.xlane.f32.xlu0 %v1286_v52  ;;  %v1101_v45 = vpop.f32.mrb[24].mxu1  ;;  %v1295_v54 = vsel %vm1243_vm5, %v8212_v49, -inf }
 0x47a   :  { %v8218_v56 = vmul.f32 0.35355338, %v1101_v45  ;;  %1296 = vmax.xlane.f32.xlu1 %v1295_v54  ;;  %v6528_v53 = vpop.f32.mrb[25].mxu1  ;;  %v1205_v57 = vpop.f32.mrb[22].mxu0 }
 0x47b   :  { %v8220_v59 = vmul.f32 0.35355338, %v1205_v57  ;;  %v6543_v60 = vpop.f32.mrb[23].mxu0 }
 0x47c   :  { %v1298_v62 = vsel %vm1243_vm5, %v8218_v56, -inf }
 0x47d   :  { %1299 = vmax.xlane.f32.xlu0 %v1298_v62  ;;  %v1106_v63 = vpop.f32.mrb[26].mxu1  ;;  %v1307_v0 = vsel %vm1243_vm5, %v8220_v59, -inf }
 0x47e   :  { %v8226_v2 = vmul.f32 0.35355338, %v1106_v63  ;;  %1308 = vmax.xlane.f32.xlu1 %v1307_v0  ;;  %v6531_v5 = vpop.f32.mrb[27].mxu1  ;;  %v1210_v6 = vpop.f32.mrb[24].mxu0 }
 0x47f   :  { %v8228_v10 = vmul.f32 0.35355338, %v1210_v6  ;;  %v6546_v11 = vpop.f32.mrb[25].mxu0 }
 0x480   :  { %v1301_v12 = vsel %vm1243_vm5, %v8226_v2, -inf }
 0x481   :  { %1302 = vmax.xlane.f32.xlu0 %v1301_v12  ;;  %v1111_v13 = vpop.f32.mrb[28].mxu1  ;;  %v1310_v16 = vsel %vm1243_vm5, %v8228_v10, -inf }
 0x482   :  { %v8234_v17 = vmul.f32 0.35355338, %v1111_v13  ;;  %1311 = vmax.xlane.f32.xlu1 %v1310_v16  ;;  %v6534_v19 = vpop.f32.mrb[29].mxu1 }
 0x484   :  { %v1304_v20 = vsel %vm1243_vm5, %v8234_v17, -inf }
 0x485   :  { %1305 = vmax.xlane.f32.xlu0 %v1304_v20  ;;  %v1215_v21 = vpop.f32.mrb[30].mxu1 }
 0x486   :  { %v6549_v22 = vpop.f32.mrb[31].mxu1  ;;  %v8244_v23 = vmul.f32 0.35355338, %v1215_v21 }
 0x488   :  { %v1313_v28 = vsel %vm1243_vm5, %v8244_v23, -inf }
 0x493   :  { %7353 = vrot.lane.b32.xlu1 %v7954_v7, %s7737_s28 }
 0x497   :  { %7358 = vrot.lane.b32.xlu1 %v7954_v7, %s7736_s27 }
 0x49b   :  { %1806 = vrot.lane.b32.xlu0 %v7934_v4, %s7738_s0 }
 0x4bb   :  { %1314 = vmax.xlane.f32.xlu1 %v1313_v28 }
 0x4cc   :  { %1950 = vrot.lane.b32.xlu1 %v7968_v8, %s7737_s28 }
 0x4e2   :  { %v1246_v37 = vpop.xlane.xlu0 %1245 }
 0x4e3   :  { %v1316_v38 = vsub.f32 %v8146_v27, %v1246_v37 }
 0x4e5   :  { %v1340_v40 = vmul.f32 1.442695, %v1316_v38 }
 0x4e6   :  { %v1255_v4 = vpop.xlane.xlu1 %1254  ;;  %v1249_v43 = vpop.xlane.xlu0 %1248 }
 0x4e7   :  { %7464 = vpow2.f32 %v1340_v40  ;;  %v1319_v44 = vsub.f32 %v8150_v32, %v1255_v4  ;;  %v1317_v48 = vsub.f32 %v8152_v33, %v1249_v43 }
 0x4e9   :  { %v1346_v50 = vmul.f32 1.442695, %v1319_v44  ;;  %v1342_v52 = vmul.f32 1.442695, %v1317_v48 }
 0x4ea   :  { %v1258_v45 = vpop.xlane.xlu0 %1257 }
 0x4eb   :  { %7466 = vpow2.f32 %v1346_v50  ;;  %v1320_v54 = vsub.f32 %v8158_v42, %v1258_v45 }
 0x4ec   :  { %7468 = vpow2.f32 %v1342_v52 }
 0x4ed   :  { %v1348_v53 = vmul.f32 1.442695, %v1320_v54 }
 0x4ee   :  { %v1261_v57 = vpop.xlane.xlu1 %1260  ;;  %v1252_v60 = vpop.xlane.xlu0 %1251 }
 0x4ef   :  { %7470 = vpow2.f32 %v1348_v53  ;;  %v1321_v27 = vsub.f32 %v8164_v51, %v1261_v57  ;;  %v1318_v62 = vsub.f32 %v8160_v47, %v1252_v60 }
 0x4f1   :  { %v8262_v63 = vpop.eup %7464  ;;  %v1350_v32 = vmul.f32 1.442695, %v1321_v27  ;;  %v1344_v0 = vmul.f32 1.442695, %v1318_v62 }
 0x4f2   :  { %v1273_v33 = vpop.xlane.xlu1 %1272  ;;  %v1264_v5 = vpop.xlane.xlu0 %1263  ;;  %v1388_v6 = vsel %vm1243_vm5, %v8262_v63, 0.0 }
 0x4f3   :  { %7472 = vpow2.f32 %v1350_v32  ;;  %v1325_v42 = vsub.f32 %v8172_v58, %v1273_v33  ;;  %v1322_v11 = vsub.f32 %v8166_v46, %v1264_v5  ;;  %1389 = vadd.xlane.f32.xlu0 %v1388_v6 }
 0x4f4   :  { %7474 = vpow2.f32 %v1344_v0 }
 0x4f5   :  { %v8268_v12 = vpop.eup %7466  ;;  %v1358_v51 = vmul.f32 1.442695, %v1325_v42  ;;  %v1352_v47 = vmul.f32 1.442695, %v1322_v11 }
 0x4f6   :  { %v8270_v13 = vpop.eup %7468  ;;  %v1276_v16 = vpop.xlane.xlu1 %1275  ;;  %v1397_v20 = vsel %vm1243_vm5, %v8268_v12, 0.0 }
 0x4f7   :  { %v1267_v19 = vpop.xlane.xlu0 %1266  ;;  %7476 = vpow2.f32 %v1358_v51  ;;  %v1326_v21 = vsub.f32 %v8180_v3, %v1276_v16  ;;  %v1391_v46 = vsel %vm1243_vm5, %v8270_v13, 0.0  ;;  %1398 = vadd.xlane.f32.xlu1 %v1397_v20 }
 0x4f8   :  { %v1323_v58 = vsub.f32 %v8174_v61, %v1267_v19  ;;  %7478 = vpow2.f32 %v1352_v47  ;;  %1392 = vadd.xlane.f32.xlu0 %v1391_v46 }
 0x4f9   :  { %v8278_v22 = vpop.eup %7470  ;;  %v1360_v28 = vmul.f32 1.442695, %v1326_v21 }
 0x4fa   :  { %v1354_v37 = vmul.f32 1.442695, %v1323_v58  ;;  %v1279_v38 = vpop.xlane.xlu1 %1278  ;;  %v1400_v4 = vsel %vm1243_vm5, %v8278_v22, 0.0 }
 0x4fb   :  { %v1270_v40 = vpop.xlane.xlu0 %1269  ;;  %7480 = vpow2.f32 %v1360_v28  ;;  %v1327_v3 = vsub.f32 %v8188_v15, %v1279_v38  ;;  %1401 = vadd.xlane.f32.xlu1 %v1400_v4 }
 0x4fc   :  { %v1324_v61 = vsub.f32 %v8182_v9, %v1270_v40  ;;  %7482 = vpow2.f32 %v1354_v37 }
 0x4fd   :  { %v8284_v43 = vpop.eup %7472  ;;  %v1362_v50 = vmul.f32 1.442695, %v1327_v3 }
 0x4fe   :  { %v1356_v44 = vmul.f32 1.442695, %v1324_v61  ;;  %v8286_v48 = vpop.eup %7474  ;;  %v1403_v45 = vsel %vm1243_vm5, %v8284_v43, 0.0 }
 0x4ff   :  { %v1282_v52 = vpop.xlane.xlu0 %1281  ;;  %v1291_v53 = vpop.xlane.xlu1 %1290  ;;  %v1394_v15 = vsel %vm1243_vm5, %v8286_v48, 0.0  ;;  %1404 = vadd.xlane.f32.xlu1 %v1403_v45 }
 0x500   :  { %v1328_v54 = vsub.f32 %v8190_v18, %v1282_v52  ;;  %7484 = vpow2.f32 %v1356_v44  ;;  %v1331_v9 = vsub.f32 %v8196_v26, %v1291_v53  ;;  %1395 = vadd.xlane.f32.xlu0 %v1394_v15 }
 0x501   :  { %v8294_v57 = vpop.eup %7476  ;;  %7486 = vpow2.f32 %v1362_v50 }
 0x502   :  { %v1364_v60 = vmul.f32 1.442695, %v1328_v54  ;;  %v8296_v27 = vpop.eup %7478  ;;  %v1370_v62 = vmul.f32 1.442695, %v1331_v9  ;;  %v1415_v18 = vsel %vm1243_vm5, %v8294_v57, 0.0 }
 0x503   :  { %v1285_v32 = vpop.xlane.xlu0 %1284  ;;  %v1294_v33 = vpop.xlane.xlu1 %1293  ;;  %v1406_v5 = vsel %vm1243_vm5, %v8296_v27, 0.0  ;;  %1416 = vadd.xlane.f32.xlu1 %v1415_v18 }
 0x504   :  { %7488 = vpow2.f32 %v1364_v60  ;;  %v1329_v0 = vsub.f32 %v8198_v29, %v1285_v32  ;;  %v1332_v26 = vsub.f32 %v8204_v39, %v1294_v33  ;;  %1407 = vadd.xlane.f32.xlu0 %v1406_v5 }
 0x505   :  { %v8304_v6 = vpop.eup %7480  ;;  %7490 = vpow2.f32 %v1370_v62 }
 0x506   :  { %v1366_v42 = vmul.f32 1.442695, %v1329_v0  ;;  %v8306_v11 = vpop.eup %7482  ;;  %v1372_v51 = vmul.f32 1.442695, %v1332_v26  ;;  %v1418_v16 = vsel %vm1243_vm5, %v8304_v6, 0.0 }
 0x507   :  { %v1288_v47 = vpop.xlane.xlu0 %1287  ;;  %v1297_v19 = vpop.xlane.xlu1 %1296  ;;  %v1409_v20 = vsel %vm1243_vm5, %v8306_v11, 0.0  ;;  %1419 = vadd.xlane.f32.xlu1 %v1418_v16 }
 0x508   :  { %7492 = vpow2.f32 %v1366_v42  ;;  %v1330_v29 = vsub.f32 %v8206_v41, %v1288_v47  ;;  %v1333_v39 = vsub.f32 %v8212_v49, %v1297_v19  ;;  %1410 = vadd.xlane.f32.xlu0 %v1409_v20 }
 0x509   :  { %7494 = vpow2.f32 %v1372_v51 }
 0x50a   :  { %v1368_v21 = vmul.f32 1.442695, %v1330_v29  ;;  %v8314_v58 = vpop.eup %7484  ;;  %v1374_v46 = vmul.f32 1.442695, %v1333_v39 }
 0x50b   :  { %v1300_v28 = vpop.xlane.xlu0 %1299  ;;  %v1309_v38 = vpop.xlane.xlu1 %1308  ;;  %v1412_v41 = vsel %vm1243_vm5, %v8314_v58, 0.0 }
 0x50c   :  { %7496 = vpow2.f32 %v1368_v21  ;;  %v1334_v37 = vsub.f32 %v8218_v56, %v1300_v28  ;;  %v8319_v40 = vpop.eup %7486  ;;  %v1337_v4 = vsub.f32 %v8220_v59, %v1309_v38  ;;  %1413 = vadd.xlane.f32.xlu0 %v1412_v41 }
 0x50d   :  { %7498 = vpow2.f32 %v1374_v46  ;;  %v1421_v45 = vsel %vm1243_vm5, %v8319_v40, 0.0 }
 0x50e   :  { %v8322_v49 = vpop.eup %7488  ;;  %v1376_v3 = vmul.f32 1.442695, %v1334_v37  ;;  %v1382_v61 = vmul.f32 1.442695, %v1337_v4 }
 0x50f   :  { %v1303_v44 = vpop.xlane.xlu0 %1302  ;;  %v1424_v50 = vsel %vm1243_vm5, %v8322_v49, 0.0  ;;  %v1312_v52 = vpop.xlane.xlu1 %1311 }
 0x510   :  { %7500 = vpow2.f32 %v1376_v3  ;;  %v1335_v56 = vsub.f32 %v8226_v2, %v1303_v44  ;;  %1425 = vadd.xlane.f32.xlu1 %v1424_v50  ;;  %v8329_v54 = vpop.eup %7490  ;;  %v1338_v59 = vsub.f32 %v8228_v10, %v1312_v52  ;;  %1422 = vadd.xlane.f32.xlu0 %v1421_v45  ;;  %v7346_v45 = vunpack.i.h.bf16 %v8250_v30 }
 0x511   :  { %7502 = vpow2.f32 %v1382_v61  ;;  %v1433_v32 = vsel %vm1243_vm5, %v8329_v54, 0.0 }
 0x512   :  { %v8332_v53 = vpop.eup %7492  ;;  %v1378_v15 = vmul.f32 1.442695, %v1335_v56  ;;  %v1384_v9 = vmul.f32 1.442695, %v1338_v59  ;;  %v7345_v59 = vunpack.i.l.bf16 %v8250_v30 }
 0x513   :  { %v1306_v60 = vpop.xlane.xlu0 %1305  ;;  %v1427_v62 = vsel %vm1243_vm5, %v8332_v53, 0.0  ;;  %v8339_v18 = vpop.eup %7494 }
 0x514   :  { %7504 = vpow2.f32 %v1378_v15  ;;  %v1336_v2 = vsub.f32 %v8234_v17, %v1306_v60  ;;  %1428 = vadd.xlane.f32.xlu1 %v1427_v62  ;;  %1434 = vadd.xlane.f32.xlu0 %v1433_v32  ;;  %v1436_v5 = vsel %vm1243_vm5, %v8339_v18, 0.0  ;;  %v8379_v28 = vpop.permute.xlu1 %7353  ;;  %v7350_v62 = vunpack.i.l.bf16 %v8252_v31 }
 0x515   :  { %7506 = vpow2.f32 %v1384_v9 }
 0x516   :  { %v8341_v10 = vpop.eup %7496  ;;  %v1380_v0 = vmul.f32 1.442695, %v1336_v2  ;;  %v7118_v2 = vpack.c.bf16 %v7346_v45, %v7345_v59 }
 0x517   :  { %v1430_v33 = vsel %vm1243_vm5, %v8341_v10, 0.0  ;;  %v8347_v26 = vpop.eup %7498  ;;  %v1807_v61 = vpop.permute.xlu0 %1806 }
 0x518   :  { %1431 = vadd.xlane.f32.xlu1 %v1430_v33  ;;  %1437 = vadd.xlane.f32.xlu0 %v1436_v5  ;;  %7508 = vpow2.f32 %v1380_v0  ;;  %v1439_v51 = vsel %vm1243_vm5, %v8347_v26, 0.0  ;;  %v8381_v37 = vpop.permute.xlu1 %7358 }
 0x51a   :  { %v8349_v17 = vpop.eup %7500 }
 0x51b   :  { %v1442_v42 = vsel %vm1243_vm5, %v8349_v17, 0.0  ;;  %v8355_v47 = vpop.eup %7502 }
 0x51c   :  { %1443 = vadd.xlane.f32.xlu1 %v1442_v42  ;;  %1440 = vadd.xlane.f32.xlu0 %v1439_v51  ;;  %v1451_v19 = vsel %vm1243_vm5, %v8355_v47, 0.0 }
 0x51e   :  { %v8357_v16 = vpop.eup %7504 }
 0x51f   :  { %v1445_v29 = vsel %vm1243_vm5, %v8357_v16, 0.0  ;;  %v8363_v20 = vpop.eup %7506 }
 0x520   :  { %1446 = vadd.xlane.f32.xlu1 %v1445_v29  ;;  %1452 = vadd.xlane.f32.xlu0 %v1451_v19  ;;  %v1454_v39 = vsel %vm1243_vm5, %v8363_v20, 0.0 }
 0x522   :  { %v8367_v21 = vpop.eup %7508 }
 0x523   :  { %v1448_v46 = vsel %vm1243_vm5, %v8367_v21, 0.0 }
 0x524   :  { %1455 = vadd.xlane.f32.xlu0 %v1454_v39  ;;  %v7361_v39 = vunpack.i.h.bf16 %v8381_v37 }
 0x528   :  { %1449 = vadd.xlane.f32.xlu0 %v1448_v46  ;;  %v7360_v46 = vunpack.i.l.bf16 %v8381_v37 }
 0x531   :  { %7363 = vrot.lane.b32.xlu1 %v7954_v7, %s7739_s29 }
 0x535   :  { %7368 = vrot.lane.b32.xlu1 %v7954_v7, %s7738_s0 }
 0x539   :  { %2146 = vrot.lane.b32.xlu1 %v7968_v8, %s7739_s29 }
 0x53d   :  { %2244 = vrot.lane.b32.xlu1 %v7968_v8, %s7738_s0 }
 0x548   :  { %v1315_v38 = vpop.xlane.xlu1 %1314 }
 0x549   :  { %v1339_v41 = vsub.f32 %v8244_v23, %v1315_v38 }
 0x54b   :  { %v1386_v4 = vmul.f32 1.442695, %v1339_v41 }
 0x54c   :  { %v8390_v44 = vpop.permute.xlu1 %1950 }
 0x54d   :  { %7510 = vpow2.f32 %v1386_v4  ;;  %v7356_v4 = vunpack.i.h.bf16 %v8379_v28 }
 0x557   :  { %v8384_v3 = vpop.eup %7510 }
 0x558   :  { %v1457_v7 = vsel %vm1243_vm5, %v8384_v3, 0.0 }
 0x559   :  { %1458 = vadd.xlane.f32.xlu0 %v1457_v7  ;;  %v7355_v7 = vunpack.i.l.bf16 %v8379_v28 }
 0x56f   :  { %2048 = vrot.lane.b32.xlu0 %v7968_v8, %s7736_s27  ;;  %v7351_v8 = vunpack.i.h.bf16 %v8252_v31 }
 0x580   :  { %v1390_v50 = vpop.xlane.xlu0 %1389 }
 0x581   :  { %7512 = vrcp.f32 %v1390_v50 }
 0x584   :  { %v1399_v56 = vpop.xlane.xlu1 %1398 }
 0x585   :  { %v1393_v52 = vpop.xlane.xlu0 %1392  ;;  %7514 = vrcp.f32 %v1399_v56 }
 0x586   :  { %7516 = vrcp.f32 %v1393_v52  ;;  %v7124_v52 = vpack.c.bf16 %v7356_v4, %v7355_v7 }
 0x588   :  { %v1402_v23 = vpop.xlane.xlu1 %1401 }
 0x589   :  { %7518 = vrcp.f32 %v1402_v23 }
 0x58b   :  { %v7513_v15 = vpop.eup %7512 }
 0x58c   :  { %v1405_v9 = vpop.xlane.xlu1 %1404  ;;  %v1484_v60 = vmul.f32 %v7513_v15, %v8262_v63  ;;  %v7121_v63 = vpack.c.bf16 %v7351_v8, %v7350_v62 }
 0x58d   :  { %v1396_v32 = vpop.xlane.xlu0 %1395  ;;  %7520 = vrcp.f32 %v1405_v9 }
 0x58e   :  { %7522 = vrcp.f32 %v1396_v32  ;;  %6557 = vmatmul.mubr.msk.f32.vlgmr.msra.gmra.mrb[32].mxu1 %vm1243_vm5, %v1484_v60 }
 0x58f   :  { %v7515_v0 = vpop.eup %7514  ;;  %7119 = vmatpush3.bf16.msra.mxu1 %v7118_v2  ;;  %6559 = vmatprep.mubr.msk.f32.mxu1 %vm7730_vm2, %v7731_v1 }
 0x590   :  { %v7517_v30 = vpop.eup %7516  ;;  %v1487_v33 = vmul.f32 %v7515_v0, %v8268_v12  ;;  %v1417_v5 = vpop.xlane.xlu1 %1416  ;;  %6584 = vmatprep.subr.mxu1 %v7731_v1 }
 0x591   :  { %v1408_v42 = vpop.xlane.xlu0 %1407  ;;  %7524 = vrcp.f32 %v1417_v5  ;;  %v1485_v31 = vmul.f32 %v7517_v30, %v8270_v13 }
 0x592   :  { %7526 = vrcp.f32 %v1408_v42  ;;  %6572 = vmatmul.mubr.msk.f32.vlgmr.msra.gmra.mrb[26].mxu0 %vm1243_vm5, %v1487_v33 }
 0x593   :  { %v7519_v51 = vpop.eup %7518  ;;  %6560 = vmatmul.mubr.msk.f32.gmra.mrb[34].mxu1 %vm1243_vm5, %v1485_v31  ;;  %7122 = vmatpush3.bf16.msra.mxu0 %v7121_v63 }
 0x594   :  { %6585 = vmatpush3.msra.mxu1 %v8254_v35  ;;  %v1420_v29 = vpop.xlane.xlu1 %1419  ;;  %6574 = vmatprep.mubr.msk.f32.mxu0 %vm7730_vm2, %v7731_v1  ;;  %v1488_v12 = vmul.f32 %v7519_v51, %v8278_v22 }
 0x595   :  { %v1411_v19 = vpop.xlane.xlu0 %1410  ;;  %7528 = vrcp.f32 %v1420_v29  ;;  %6599 = vmatprep.subr.mxu0 %v7731_v1  ;;  %6562 = vmatprep.mubr.msk.f32.mxu1 %vm7730_vm2, %v7731_v1 }
 0x596   :  { %7530 = vrcp.f32 %v1411_v19  ;;  %6575 = vmatmul.mubr.msk.f32.gmra.mrb[28].mxu0 %vm1243_vm5, %v1488_v12  ;;  %7123 = vmatprep.subr.bf16.mxu1 %v7726_v55 }
 0x597   :  { %v7521_v13 = vpop.eup %7520  ;;  %6600 = vmatpush3.msra.mxu0 %v1807_v61  ;;  %6577 = vmatprep.mubr.msk.f32.mxu0 %vm7730_vm2, %v7731_v1 }
 0x598   :  { %v7523_v35 = vpop.eup %7522  ;;  %v1489_v22 = vmul.f32 %v7521_v13, %v8284_v43  ;;  %7126 = vmatprep.subr.bf16.mxu0 %v7726_v55 }
 0x599   :  { %v1414_v38 = vpop.xlane.xlu0 %1413  ;;  %v1486_v41 = vmul.f32 %v7523_v35, %v8286_v48  ;;  %v7127_v48 = vpack.c.bf16 %v7361_v39, %v7360_v46 }
 0x59a   :  { %7532 = vrcp.f32 %v1414_v38  ;;  %6578 = vmatmul.mubr.msk.f32.gmra.mrb[30].mxu0 %vm1243_vm5, %v1489_v22 }
 0x59b   :  { %v7525_v61 = vpop.eup %7524  ;;  %6563 = vmatmul.mubr.msk.f32.gmra.mrb[36].mxu1 %vm1243_vm5, %v1486_v41  ;;  %6601 = vmatprep.mubr.msk.f32.mxu0 %vm7730_vm2, %v7731_v1 }
 0x59c   :  { %v7527_v43 = vpop.eup %7526  ;;  %v1493_v50 = vmul.f32 %v7525_v61, %v8294_v57  ;;  %6586 = vmatprep.mubr.msk.f32.mxu1 %vm7730_vm2, %v7731_v1 }
 0x59d   :  { %v1426_v37 = vpop.xlane.xlu1 %1425  ;;  %v1490_v56 = vmul.f32 %v7527_v43, %v8296_v27  ;;  %v1423_v28 = vpop.xlane.xlu0 %1422 }
 0x59e   :  { %7534 = vrcp.f32 %v1426_v37  ;;  %6602 = vmatmul.mubr.msk.f32.vlgmr.msra.gmra.mrb[32].mxu0 %vm1243_vm5, %v1493_v50 }
 0x59f   :  { %7536 = vrcp.f32 %v1423_v28  ;;  %v7529_v23 = vpop.eup %7528  ;;  %6587 = vmatmul.mubr.msk.f32.vlgmr.msra.gmra.mrb[38].mxu1 %vm1243_vm5, %v1490_v56  ;;  %7128 = vmatpush3.bf16.msra.mxu0 %v7127_v48 }
 0x5a0   :  { %v7531_v45 = vpop.eup %7530  ;;  %7125 = vmatpush3.bf16.msra.mxu1 %v7124_v52  ;;  %6589 = vmatprep.mubr.msk.f32.mxu1 %vm7730_vm2, %v7731_v1  ;;  %v1494_v59 = vmul.f32 %v7529_v23, %v8304_v6 }
 0x5a1   :  { %v1429_v57 = vpop.xlane.xlu1 %1428  ;;  %v8436_v15 = vpop.xlane.xlu0 %1434  ;;  %6604 = vmatprep.mubr.msk.f32.mxu0 %vm7730_vm2, %v7731_v1  ;;  %6614 = vmatprep.subr.mxu1 %v7731_v1  ;;  %v1491_v27 = vmul.f32 %v7531_v45, %v8306_v11 }
 0x5a2   :  { %7538 = vrcp.f32 %v1429_v57  ;;  %6605 = vmatmul.mubr.msk.f32.gmra.mrb[34].mxu0 %vm1243_vm5, %v1494_v59  ;;  %6629 = vmatprep.subr.mxu0 %v7731_v1  ;;  %v151_v57 = vld [vmem:[%s9572_s3 + $0x20] sm:$0xff] }
 0x5a3   :  { %6590 = vmatmul.mubr.msk.f32.gmra.mrb[40].mxu1 %vm1243_vm5, %v1491_v27  ;;  %6607 = vmatprep.mubr.msk.f32.mxu0 %vm7730_vm2, %v7731_v1 }
 0x5a4   :  { %v7533_v6 = vpop.eup %7532  ;;  %6615 = vmatpush3.msra.mxu1 %v8390_v44  ;;  %6592 = vmatprep.mubr.msk.f32.mxu1 %vm7730_vm2, %v7731_v1 }
 0x5a5   :  { %v1432_v9 = vpop.xlane.xlu1 %1431  ;;  %v1438_v60 = vpop.xlane.xlu0 %1437  ;;  %v1492_v11 = vmul.f32 %v7533_v6, %v8314_v58  ;;  %7129 = vmatprep.subr.bf16.mxu1 %v7726_v55 }
 0x5a6   :  { %7540 = vrcp.f32 %v1432_v9  ;;  %v153_v9 = vld [vmem:[%s9572_s3 + $0x30] sm:$0xff] }
 0x5a7   :  { %6593 = vmatmul.mubr.msk.f32.gmra.mrb[42].mxu1 %vm1243_vm5, %v1492_v11 }
 0x5a8   :  { %v7535_v8 = vpop.eup %7534  ;;  %6616 = vmatprep.mubr.msk.f32.mxu1 %vm7730_vm2, %v7731_v1 }
 0x5a9   :  { %v7537_v62 = vpop.eup %7536  ;;  %v1496_v2 = vmul.f32 %v7535_v8, %v8322_v49  ;;  %v1444_v32 = vpop.xlane.xlu1 %1443 }
 0x5aa   :  { %v1441_v44 = vpop.xlane.xlu0 %1440  ;;  %v1495_v0 = vmul.f32 %v7537_v62, %v8319_v40  ;;  %7542 = vrcp.f32 %v1444_v32 }
 0x5ab   :  { %6617 = vmatmul.mubr.msk.f32.vlgmr.msra.gmra.mrb[44].mxu1 %vm1243_vm5, %v1496_v2 }
 0x5ac   :  { %v7539_v30 = vpop.eup %7538  ;;  %6608 = vmatmul.mubr.msk.f32.gmra.mrb[36].mxu0 %vm1243_vm5, %v1495_v0  ;;  %6619 = vmatprep.mubr.msk.f32.mxu1 %vm7730_vm2, %v7731_v1 }
 0x5ad   :  { %v1447_v58 = vpop.xlane.xlu1 %1446  ;;  %v1497_v33 = vmul.f32 %v7539_v30, %v8332_v53  ;;  %6631 = vmatprep.mubr.msk.f32.mxu0 %vm7730_vm2, %v7731_v1 }
 0x5ae   :  { %v1453_v49 = vpop.xlane.xlu0 %1452  ;;  %7544 = vrcp.f32 %v1447_v58 }
 0x5af   :  { %6620 = vmatmul.mubr.msk.f32.gmra.mrb[46].mxu1 %vm1243_vm5, %v1497_v33 }
 0x5b0   :  { %v7541_v5 = vpop.eup %7540  ;;  %6622 = vmatprep.mubr.msk.f32.mxu1 %vm7730_vm2, %v7731_v1 }
 0x5b1   :  { %v7364_v40 = vpop.permute.xlu1 %7363  ;;  %v1498_v63 = vmul.f32 %v7541_v5, %v8341_v10 }
 0x5b2   :  { %v1456_v42 = vpop.xlane.xlu0 %1455  ;;  %v7366_v31 = vunpack.i.h.bf16 %v7364_v40  ;;  %v7365_v51 = vunpack.i.l.bf16 %v7364_v40 }
 0x5b3   :  { %6623 = vmatmul.mubr.msk.f32.gmra.mrb[48].mxu1 %vm1243_vm5, %v1498_v63 }
 0x5b4   :  { %v7130_v29 = vpack.c.bf16 %v7366_v31, %v7365_v51  ;;  %6646 = vmatprep.mubr.msk.f32.mxu1 %vm7730_vm2, %v7731_v1  ;;  %v7543_v12 = vpop.eup %7542 }
 0x5b5   :  { %v7369_v53 = vpop.permute.xlu1 %7368  ;;  %v1502_v13 = vmul.f32 %v7543_v12, %v8349_v17 }
 0x5b6   :  { %v1450_v19 = vpop.xlane.xlu0 %1449  ;;  %7131 = vmatpush3.bf16.msra.mxu1 %v7130_v29  ;;  %v7371_v41 = vunpack.i.h.bf16 %v7369_v53  ;;  %v7370_v4 = vunpack.i.l.bf16 %v7369_v53 }
 0x5b7   :  { %7546 = vrcp.f32 %v1450_v19  ;;  %6644 = vmatprep.subr.mxu1 %v7731_v1 }
 0x5b8   :  { %v7545_v10 = vpop.eup %7544  ;;  %7548 = vrcp.f32 %v8436_v15  ;;  %v7133_v43 = vpack.c.bf16 %v7371_v41, %v7370_v4 }
 0x5b9   :  { %v2147_v35 = vpop.permute.xlu1 %2146  ;;  %v1503_v22 = vmul.f32 %v7545_v10, %v8357_v16  ;;  %7550 = vrcp.f32 %v1438_v60  ;;  %v154_v60 = vld [vmem:[%s9572_s3 + $0x38] sm:$0xff] }
 0x5ba   :  { %6645 = vmatpush3.msra.mxu1 %v2147_v35  ;;  %7552 = vrcp.f32 %v1441_v44  ;;  %v7139_v8 = vpack.c.bf16 %v154_v60, %v153_v9 }
 0x5bb   :  { %6647 = vmatmul.mubr.msk.f32.vlgmr.msra.gmra.mrb[50].mxu1 %vm1243_vm5, %v1502_v13  ;;  %7554 = vrcp.f32 %v1453_v49 }
 0x5bc   :  { %6649 = vmatprep.mubr.msk.f32.mxu1 %vm7730_vm2, %v7731_v1  ;;  %7556 = vrcp.f32 %v1456_v42 }
 0x5bd   :  { %v2245_v37 = vpop.permute.xlu1 %2244 }
 0x5bf   :  { %6650 = vmatmul.mubr.msk.f32.gmra.mrb[52].mxu1 %vm1243_vm5, %v1503_v22 }
 0x5c0   :  { %6652 = vmatprep.mubr.msk.f32.mxu1 %vm7730_vm2, %v7731_v1 }
 0x5c1   :  { %v7547_v39 = vpop.eup %7546 }
 0x5c2   :  { %v1504_v46 = vmul.f32 %v7547_v39, %v8367_v21  ;;  %v7549_v38 = vpop.eup %7548 }
 0x5c3   :  { %v1499_v16 = vmul.f32 %v7549_v38, %v8329_v54  ;;  %v7551_v61 = vpop.eup %7550 }
 0x5c4   :  { %6653 = vmatmul.mubr.msk.f32.gmra.mrb[54].mxu1 %vm1243_vm5, %v1504_v46  ;;  %v1500_v21 = vmul.f32 %v7551_v61, %v8339_v18  ;;  %v7553_v50 = vpop.eup %7552 }
 0x5c5   :  { %v1501_v54 = vmul.f32 %v7553_v50, %v8347_v26  ;;  %v7555_v48 = vpop.eup %7554 }
 0x5c6   :  { %v1505_v18 = vmul.f32 %v7555_v48, %v8355_v47  ;;  %v7557_v56 = vpop.eup %7556 }
 0x5c7   :  { %v1506_v28 = vmul.f32 %v7557_v56, %v8363_v20  ;;  %v152_v20 = vld [vmem:[%s9572_s3 + $0x28] sm:$0xff] }
 0x5c8   :  { %v7135_v15 = vpack.c.bf16 %v152_v20, %v151_v57 }
 0x5ca   :  { %7136 = vmatprep.subr.bf16.mxu1 %v7135_v15 }
 0x5cb   :  { %7138 = vmatpush3.bf16.msra.mxu1 %v7135_v15 }
 0x5cc   :  { %7140 = vmatprep.subr.bf16.mxu1 %v7139_v8 }
 0x5cf   :  { %7142 = vmatpush3.bf16.msra.mxu1 %v7139_v8 }
 0x5e6   :  { %v1459_v17 = vpop.xlane.xlu0 %1458 }
 0x5e7   :  { %7558 = vrcp.f32 %v1459_v17 }
 0x5ea   :  { %v2049_v7 = vpop.permute.xlu0 %2048 }
 0x5eb   :  { %6630 = vmatpush3.msra.mxu0 %v2049_v7 }
 0x5ec   :  { %6632 = vmatmul.mubr.msk.f32.vlgmr.msra.gmra.mrb[38].mxu0 %vm1243_vm5, %v1499_v16  ;;  %7132 = vmatprep.subr.bf16.mxu0 %v7726_v55 }
 0x5ed   :  { %7134 = vmatpush3.bf16.msra.mxu0 %v7133_v43  ;;  %6634 = vmatprep.mubr.msk.f32.mxu0 %vm7730_vm2, %v7731_v1 }
 0x5ee   :  { %6659 = vmatprep.subr.mxu0 %v7731_v1 }
 0x5f0   :  { %6635 = vmatmul.mubr.msk.f32.gmra.mrb[40].mxu0 %vm1243_vm5, %v1500_v21 }
 0x5f1   :  { %6660 = vmatpush3.msra.mxu0 %v2245_v37  ;;  %6637 = vmatprep.mubr.msk.f32.mxu0 %vm7730_vm2, %v7731_v1  ;;  %v7559_v52 = vpop.eup %7558 }
 0x5f2   :  { %v1507_v26 = vmul.f32 %v7559_v52, %v8384_v3 }
 0x5f4   :  { %6638 = vmatmul.mubr.msk.f32.gmra.mrb[42].mxu0 %vm1243_vm5, %v1501_v54 }
 0x5f5   :  { %6661 = vmatprep.mubr.msk.f32.mxu0 %vm7730_vm2, %v7731_v1 }
 0x5f8   :  { %6662 = vmatmul.mubr.msk.f32.vlgmr.msra.gmra.mrb[44].mxu0 %vm1243_vm5, %v1505_v18 }
 0x5f9   :  { %6664 = vmatprep.mubr.msk.f32.mxu0 %vm7730_vm2, %v7731_v1 }
 0x5fc   :  { %6665 = vmatmul.mubr.msk.f32.gmra.mrb[46].mxu0 %vm1243_vm5, %v1506_v28 }
 0x5fd   :  { %6667 = vmatprep.mubr.msk.f32.mxu0 %vm7730_vm2, %v7731_v1 }
 0x600   :  { %6668 = vmatmul.mubr.msk.f32.gmra.mrb[48].mxu0 %vm1243_vm5, %v1507_v26 }
 0x661   :  { %v8507_v23 = vpop.f32.mrb[32].mxu1 }
 0x662   :  { %v6558_v47 = vpop.f32.mrb[33].mxu1 }
 0x665   :  { %v1690_v45 = vpop.f32.mrb[26].mxu0 }
 0x666   :  { %v8515_v59 = vpop.f32.mrb[34].mxu1  ;;  %1903 = vrot.lane.b32.xlu0 %v1690_v45, %s7740_s10  ;;  %v6573_v3 = vpop.f32.mrb[27].mxu0 }
 0x667   :  { %v6561_v27 = vpop.f32.mrb[35].mxu1 }
 0x669   :  { %v1695_v6 = vpop.f32.mrb[28].mxu0 }
 0x66a   :  { %1905 = vrot.lane.b32.xlu1 %v1695_v6, %s7740_s10  ;;  %v6576_v11 = vpop.f32.mrb[29].mxu0 }
 0x66d   :  { %v1700_v62 = vpop.f32.mrb[30].mxu0 }
 0x66e   :  { %v8525_v2 = vpop.f32.mrb[36].mxu1  ;;  %v6579_v32 = vpop.f32.mrb[31].mxu0 }
 0x66f   :  { %v6564_v44 = vpop.f32.mrb[37].mxu1 }
 0x671   :  { %v1886_v0 = vpop.f32.mrb[32].mxu0 }
 0x672   :  { %v1788_v30 = vpop.f32.mrb[38].mxu1  ;;  %v6603_v58 = vpop.f32.mrb[33].mxu0 }
 0x673   :  { %1915 = vrot.lane.b32.xlu0 %v1788_v30, %s7741_s15  ;;  %v6588_v33 = vpop.f32.mrb[39].mxu1 }
 0x675   :  { %v1891_v49 = vpop.f32.mrb[34].mxu0 }
 0x676   :  { %v1793_v5 = vpop.f32.mrb[40].mxu1  ;;  %v6606_v40 = vpop.f32.mrb[35].mxu0 }
 0x677   :  { %1927 = vrot.lane.b32.xlu0 %v1886_v0, %s7742_s16  ;;  %1917 = vrot.lane.b32.xlu1 %v1793_v5, %s7741_s15  ;;  %v6591_v63 = vpop.f32.mrb[41].mxu1 }
 0x67a   :  { %v1798_v42 = vpop.f32.mrb[42].mxu1 }
 0x67b   :  { %1907 = vrot.lane.b32.xlu0 %v1700_v62, %s7740_s10  ;;  %1929 = vrot.lane.b32.xlu1 %v1891_v49, %s7742_s16  ;;  %v6594_v31 = vpop.f32.mrb[43].mxu1 }
 0x67e   :  { %v2030_v29 = vpop.f32.mrb[44].mxu1 }
 0x67f   :  { %v1896_v51 = vpop.f32.mrb[36].mxu0  ;;  %1919 = vrot.lane.b32.xlu1 %v1798_v42, %s7741_s15  ;;  %v6618_v12 = vpop.f32.mrb[45].mxu1 }
 0x680   :  { %v6609_v53 = vpop.f32.mrb[37].mxu0 }
 0x682   :  { %v8533_v19 = vpop.f32.mrb[46].mxu1 }
 0x683   :  { %1931 = vrot.lane.b32.xlu1 %v1896_v51, %s7742_s16  ;;  %v6621_v13 = vpop.f32.mrb[47].mxu1 }
 0x686   :  { %v8536_v35 = vpop.f32.mrb[48].mxu1 }
 0x687   :  { %v6624_v10 = vpop.f32.mrb[49].mxu1 }
 0x68e   :  { %v2226_v22 = vpop.f32.mrb[50].mxu1 }
 0x68f   :  { %v6648_v39 = vpop.f32.mrb[51].mxu1 }
 0x692   :  { %v2231_v46 = vpop.f32.mrb[52].mxu1 }
 0x693   :  { %v6651_v17 = vpop.f32.mrb[53].mxu1 }
 0x697   :  { %v2236_v38 = vpop.f32.mrb[54].mxu1 }
 0x698   :  { %v6654_v41 = vpop.f32.mrb[55].mxu1 }
 0x6bf   :  { %v2128_v4 = vpop.f32.mrb[38].mxu0 }
 0x6c0   :  { %v6633_v16 = vpop.f32.mrb[39].mxu0  ;;  %2341 = vrot.lane.b32.xlu0 %v2128_v4, %s7740_s10 }
 0x6c3   :  { %v2133_v7 = vpop.f32.mrb[40].mxu0 }
 0x6c4   :  { %v6636_v61 = vpop.f32.mrb[41].mxu0  ;;  %2353 = vrot.lane.b32.xlu0 %v2226_v22, %s7741_s15 }
 0x6c7   :  { %v2138_v43 = vpop.f32.mrb[42].mxu0 }
 0x6c8   :  { %v6639_v21 = vpop.f32.mrb[43].mxu0  ;;  %2343 = vrot.lane.b32.xlu0 %v2133_v7, %s7740_s10  ;;  %v7725_v7 = vld [vmem:[%s9569_s1 + $0x8] sm:$0xff] }
 0x6cb   :  { %v2324_v50 = vpop.f32.mrb[44].mxu0 }
 0x6cc   :  { %v6663_v37 = vpop.f32.mrb[45].mxu0  ;;  %2365 = vrot.lane.b32.xlu1 %v2324_v50, %s7742_s16  ;;  %2355 = vrot.lane.b32.xlu0 %v2231_v46, %s7741_s15  ;;  %v7724_v46 = vld [vmem:[%s9569_s1] sm:$0xff] }
 0x6cf   :  { %v2329_v54 = vpop.f32.mrb[46].mxu0 }
 0x6d0   :  { %v6666_v48 = vpop.f32.mrb[47].mxu0  ;;  %2345 = vrot.lane.b32.xlu1 %v2138_v43, %s7740_s10  ;;  %2367 = vrot.lane.b32.xlu0 %v2329_v54, %s7742_s16 }
 0x6d3   :  { %v2334_v18 = vpop.f32.mrb[48].mxu0 }
 0x6d4   :  { %v6669_v56 = vpop.f32.mrb[49].mxu0  ;;  %2357 = vrot.lane.b32.xlu1 %v2236_v38, %s7741_s15 }
 0x6d8   :  { %2369 = vrot.lane.b32.xlu1 %v2334_v18, %s7742_s16  ;;  %v1904_v28 = vpop.permute.xlu0 %1903 }
 0x6d9   :  { %v1936_v47 = vsel %vm401_vm3, %v8507_v23, %v1904_v28 }
 0x6dc   :  { %v1906_v52 = vpop.permute.xlu1 %1905 }
 0x6dd   :  { %v1937_v15 = vsel %vm401_vm3, %v8515_v59, %v1906_v52 }
 0x6e5   :  { %v1916_v26 = vpop.permute.xlu0 %1915 }
 0x6e6   :  { %v1940_v45 = vsel %vm1939_vm6, %v1936_v47, %v1916_v26 }
 0x6e9   :  { %v1928_v57 = vpop.permute.xlu0 %1927  ;;  %v1918_v20 = vpop.permute.xlu1 %1917 }
 0x6ea   :  { %v1943_v3 = vsel %vm1243_vm5, %v1940_v45, %v1928_v57  ;;  %v1941_v27 = vsel %vm1939_vm6, %v1937_v15, %v1918_v20 }
 0x6eb   :  { %6678 = vmatprep.mubr.msk.f32.mxu1 %vm175_vm1, %v1943_v3 }
 0x6ed   :  { %v1930_v6 = vpop.permute.xlu1 %1929  ;;  %v1908_v60 = vpop.permute.xlu0 %1907 }
 0x6ee   :  { %v1944_v9 = vsel %vm1243_vm5, %v1941_v27, %v1930_v6  ;;  %v1938_v11 = vsel %vm401_vm3, %v8525_v2, %v1908_v60  ;;  %v155_v60 = vld [vmem:[%s9572_s3 + $0x40] sm:$0xff] }
 0x6ef   :  { %6679 = vmatmul.mubr.msk.f32.vlgmr.msra.gmra.mrb[56].mxu1 %vm175_vm1, %v1944_v9 }
 0x6f1   :  { %v1920_v23 = vpop.permute.xlu1 %1919 }
 0x6f2   :  { %v1942_v8 = vsel %vm1939_vm6, %v1938_v11, %v1920_v23  ;;  %v156_v23 = vld [vmem:[%s9572_s3 + $0x48] sm:$0xff] }
 0x6f3   :  { %v7143_v11 = vpack.c.bf16 %v156_v23, %v155_v60 }
 0x6f5   :  { %v1932_v62 = vpop.permute.xlu1 %1931  ;;  %7144 = vmatprep.subr.bf16.mxu0 %v7143_v11 }
 0x6f6   :  { %v1945_v32 = vsel %vm1243_vm5, %v1942_v8, %v1932_v62  ;;  %7146 = vmatpush3.bf16.msra.mxu0 %v7143_v11  ;;  %v157_v8 = vld [vmem:[%s9572_s3 + $0x50] sm:$0xff]  ;;  %v158_v62 = vld [vmem:[%s9572_s3 + $0x58] sm:$0xff] }
 0x6f7   :  { %6681 = vmatprep.mubr.msk.f32.mxu1 %vm175_vm1, %v1945_v32  ;;  %v7147_v32 = vpack.c.bf16 %v158_v62, %v157_v8 }
 0x6f9   :  { %7148 = vmatprep.subr.bf16.mxu0 %v7147_v32 }
 0x6fa   :  { %7150 = vmatpush3.bf16.msra.mxu0 %v7147_v32 }
 0x732   :  { %v2342_v59 = vpop.permute.xlu0 %2341 }
 0x733   :  { %v2374_v30 = vsel %vm401_vm3, %v2030_v29, %v2342_v59 }
 0x736   :  { %v2354_v44 = vpop.permute.xlu0 %2353 }
 0x737   :  { %v2377_v58 = vsel %vm1939_vm6, %v2374_v30, %v2354_v44 }
 0x73a   :  { %v2344_v0 = vpop.permute.xlu0 %2343 }
 0x73b   :  { %v2375_v2 = vsel %vm401_vm3, %v8533_v19, %v2344_v0  ;;  %v5941_v19 = vld [vmem:[%s9571_s4 + $0x3] ss:$0 sm:$0xff] }
 0x73e   :  { %v2366_v33 = vpop.permute.xlu1 %2365  ;;  %v2356_v49 = vpop.permute.xlu0 %2355 }
 0x73f   :  { %v2380_v5 = vsel %vm1243_vm5, %v2377_v58, %v2366_v33  ;;  %v2378_v40 = vsel %vm1939_vm6, %v2375_v2, %v2356_v49 }
 0x740   :  { %6682 = vmatmul.mubr.msk.f32.gmra.mrb[58].mxu1 %vm175_vm1, %v2380_v5 }
 0x742   :  { %v2346_v63 = vpop.permute.xlu1 %2345  ;;  %v2368_v42 = vpop.permute.xlu0 %2367 }
 0x743   :  { %v2381_v31 = vsel %vm1243_vm5, %v2378_v40, %v2368_v42  ;;  %v2376_v29 = vsel %vm401_vm3, %v8536_v35, %v2346_v63 }
 0x744   :  { %6684 = vmatprep.mubr.msk.f32.mxu1 %vm175_vm1, %v2381_v31 }
 0x746   :  { %v2358_v51 = vpop.permute.xlu1 %2357 }
 0x747   :  { %v2379_v53 = vsel %vm1939_vm6, %v2376_v29, %v2358_v51 }
 0x74a   :  { %v2370_v12 = vpop.permute.xlu1 %2369 }
 0x74b   :  { %v2382_v13 = vsel %vm1243_vm5, %v2379_v53, %v2370_v12 }
 0x74c   :  { %6685 = vmatmul.mubr.msk.f32.gmra.mrb[60].mxu1 %vm175_vm1, %v2382_v13 }
 0x7c2   :  { %v6680_v10 = vpop.f32.mrb[56].mxu1 }
 0x7c3   :  { %v2497_v22 = vadd.f32 %v6680_v10, %v7832_v25  ;;  %v2467_v39 = vpop.f32.mrb[57].mxu1 }
 0x7c4   :  { %v2496_v35 = vadd.f32 %v7724_v46, %v2467_v39 }
 0x7c5   :  { %v8583_v17 = vadd.f32 %v5941_v19, %v2497_v22 }
 0x7c6   :  { %v8585_v38 = vadd.f32 %v5941_v19, %v2496_v35 }
 0x7c7   :  { %v2515_v41 = vsel %vm175_vm1, %v8583_v17, 0.0 }
 0x7c8   :  { %2516 = vadd.xlane.f32.xlu1 %v2515_v41  ;;  %v2512_v4 = vsel %vm175_vm1, %v8585_v38, 0.0 }
 0x7c9   :  { %2513 = vadd.xlane.f32.xlu0 %v2512_v4 }
 0x813   :  { %v6683_v16 = vpop.f32.mrb[58].mxu1 }
 0x814   :  { %v2477_v25 = vpop.f32.mrb[59].mxu1  ;;  %v2499_v61 = vadd.f32 %v7725_v7, %v6683_v16 }
 0x815   :  { %v2498_v43 = vadd.f32 %v2477_v25, %v7830_v24  ;;  %v5942_v25 = vld [vmem:[%s9571_s4 + $0x4] ss:$0 sm:$0xff] }
 0x816   :  { %v8597_v50 = vadd.f32 %v5941_v19, %v2499_v61 }
 0x817   :  { %v8595_v21 = vadd.f32 %v5941_v19, %v2498_v43 }
 0x818   :  { %v2521_v54 = vsel %vm175_vm1, %v8597_v50, 0.0 }
 0x819   :  { %v2518_v37 = vsel %vm175_vm1, %v8595_v21, 0.0 }
 0x81a   :  { %2519 = vadd.xlane.f32.xlu0 %v2518_v37 }
 0x81e   :  { %2522 = vadd.xlane.f32.xlu0 %v2521_v54  ;;  %v5943_v54 = vld [vmem:[%s9571_s4 + $0x5] ss:$0 sm:$0xff] }
 0x81f   :  { %v6686_v48 = vpop.f32.mrb[60].mxu1 }
 0x820   :  { %v2501_v18 = vadd.f32 %v6686_v48, %v7841_v34  ;;  %v2487_v56 = vpop.f32.mrb[61].mxu1 }
 0x821   :  { %v2500_v28 = vadd.f32 %v2487_v56, %v7844_v36 }
 0x822   :  { %v8605_v52 = vadd.f32 %v5941_v19, %v2501_v18 }
 0x823   :  { %v8607_v24 = vadd.f32 %v5941_v19, %v2500_v28 }
 0x824   :  { %v2527_v26 = vsel %vm175_vm1, %v8605_v52, 0.0 }
 0x825   :  { %2528 = vadd.xlane.f32.xlu1 %v2527_v26  ;;  %v2524_v47 = vsel %vm175_vm1, %v8607_v24, 0.0 }
 0x826   :  { %2525 = vadd.xlane.f32.xlu0 %v2524_v47 }
 0x855   :  { %v2517_v45 = vpop.xlane.xlu1 %2516 }
 0x856   :  { %v2531_v57 = vmul.f32 0.03125, %v2517_v45  ;;  %v2514_v20 = vpop.xlane.xlu0 %2513 }
 0x857   :  { %v2530_v3 = vmul.f32 0.03125, %v2514_v20 }
 0x858   :  { %v2537_v34 = vsub.f32 %v8583_v17, %v2531_v57 }
 0x859   :  { %v2536_v36 = vsub.f32 %v8585_v38, %v2530_v3 }
 0x85a   :  { %v2543_v15 = vmul.f32 %v2537_v34, %v2537_v34 }
 0x85b   :  { %v2542_v27 = vmul.f32 %v2536_v36, %v2536_v36 }
 0x85c   :  { %v2551_v6 = vsel %vm175_vm1, %v2543_v15, 0.0 }
 0x85d   :  { %2552 = vadd.xlane.f32.xlu1 %v2551_v6  ;;  %v2548_v9 = vsel %vm175_vm1, %v2542_v27, 0.0 }
 0x85e   :  { %2549 = vadd.xlane.f32.xlu0 %v2548_v9 }
 0x8a7   :  { %v2520_v59 = vpop.xlane.xlu0 %2519 }
 0x8a8   :  { %v2532_v44 = vmul.f32 0.03125, %v2520_v59 }
 0x8aa   :  { %v2538_v0 = vsub.f32 %v8595_v21, %v2532_v44 }
 0x8ab   :  { %v2523_v30 = vpop.xlane.xlu0 %2522 }
 0x8ac   :  { %v2533_v58 = vmul.f32 0.03125, %v2523_v30  ;;  %v2544_v33 = vmul.f32 %v2538_v0, %v2538_v0 }
 0x8ae   :  { %v2539_v49 = vsub.f32 %v8597_v50, %v2533_v58  ;;  %v2554_v5 = vsel %vm175_vm1, %v2544_v33, 0.0 }
 0x8af   :  { %2555 = vadd.xlane.f32.xlu0 %v2554_v5 }
 0x8b0   :  { %v2545_v2 = vmul.f32 %v2539_v49, %v2539_v49 }
 0x8b2   :  { %v2529_v40 = vpop.xlane.xlu1 %2528  ;;  %v2557_v63 = vsel %vm175_vm1, %v2545_v2, 0.0 }
 0x8b3   :  { %v2535_v42 = vmul.f32 0.03125, %v2529_v40  ;;  %2558 = vadd.xlane.f32.xlu1 %v2557_v63  ;;  %v2526_v31 = vpop.xlane.xlu0 %2525 }
 0x8b4   :  { %v2534_v51 = vmul.f32 0.03125, %v2526_v31  ;;  %v161_v31 = vld [vmem:[%s9572_s3 + $0x70] sm:$0xff] }
 0x8b5   :  { %v2541_v29 = vsub.f32 %v8605_v52, %v2535_v42 }
 0x8b6   :  { %v2540_v53 = vsub.f32 %v8607_v24, %v2534_v51  ;;  %v162_v51 = vld [vmem:[%s9572_s3 + $0x78] sm:$0xff] }
 0x8b7   :  { %v2547_v12 = vmul.f32 %v2541_v29, %v2541_v29 }
 0x8b8   :  { %v2546_v13 = vmul.f32 %v2540_v53, %v2540_v53 }
 0x8b9   :  { %v2563_v19 = vsel %vm175_vm1, %v2547_v12, 0.0  ;;  %v164_v12 = vld [vmem:[%s9572_s3 + $0x88] sm:$0xff] }
 0x8ba   :  { %2564 = vadd.xlane.f32.xlu1 %v2563_v19  ;;  %v2560_v10 = vsel %vm175_vm1, %v2546_v13, 0.0  ;;  %v165_v19 = vld [vmem:[%s9572_s3 + $0x90] sm:$0xff] }
 0x8bb   :  { %2561 = vadd.xlane.f32.xlu0 %v2560_v10  ;;  %v166_v10 = vld [vmem:[%s9572_s3 + $0x98] sm:$0xff] }
 0x8ea   :  { %v2553_v22 = vpop.xlane.xlu1 %2552 }
 0x8eb   :  { %v2567_v39 = vmul.f32 0.03125, %v2553_v22  ;;  %v2550_v46 = vpop.xlane.xlu0 %2549  ;;  %v7163_v22 = vpack.c.bf16 %v166_v10, %v165_v19 }
 0x8ec   :  { %v2566_v35 = vmul.f32 0.03125, %v2550_v46 }
 0x8ed   :  { %v2573_v41 = vadd.f32 1e-12, %v2567_v39  ;;  %v5944_v39 = vld [vmem:[%s9571_s4 + $0x6] ss:$0 sm:$0xff] }
 0x8ee   :  { %v2572_v4 = vadd.f32 1e-12, %v2566_v35 }
 0x8ef   :  { %7560 = vrsqrt.f32 %v2573_v41 }
 0x8f0   :  { %7562 = vrsqrt.f32 %v2572_v4 }
 0x8f9   :  { %v7561_v16 = vpop.eup %7560 }
 0x8fa   :  { %v7563_v7 = vpop.eup %7562  ;;  %v2585_v61 = vmul.f32 %v7561_v16, %v2537_v34 }
 0x8fb   :  { %v2584_v43 = vmul.f32 %v7563_v7, %v2536_v36 }
 0x8fc   :  { %v2595_v37 = vmul.f32 %v5942_v25, %v2585_v61 }
 0x8fd   :  { %v2594_v48 = vmul.f32 %v5942_v25, %v2584_v43 }
 0x8fe   :  { %v2605_v56 = vadd.f32 %v5943_v54, %v2595_v37 }
 0x8ff   :  { %v2604_v18 = vadd.f32 %v5943_v54, %v2594_v48 }
 0x901   :  { %6695 = vmatprep.mubr.msk.f32.mxu0 %vm175_vm1, %v2604_v18 }
 0x902   :  { %6696 = vmatmul.mubr.msk.f32.vlgmr.msra.gmra.mrb[50].mxu0 %vm175_vm1, %v2605_v56 }
 0x93c   :  { %v2556_v28 = vpop.xlane.xlu0 %2555 }
 0x93d   :  { %v2568_v26 = vmul.f32 0.03125, %v2556_v28 }
 0x93f   :  { %v2574_v47 = vadd.f32 1e-12, %v2568_v26 }
 0x940   :  { %v2559_v45 = vpop.xlane.xlu1 %2558 }
 0x941   :  { %7564 = vrsqrt.f32 %v2574_v47  ;;  %v2569_v57 = vmul.f32 0.03125, %v2559_v45 }
 0x943   :  { %v2575_v20 = vadd.f32 1e-12, %v2569_v57 }
 0x945   :  { %7566 = vrsqrt.f32 %v2575_v20 }
 0x947   :  { %v2565_v3 = vpop.xlane.xlu1 %2564 }
 0x948   :  { %v2571_v34 = vmul.f32 0.03125, %v2565_v3  ;;  %v2562_v36 = vpop.xlane.xlu0 %2561 }
 0x949   :  { %v2570_v15 = vmul.f32 0.03125, %v2562_v36 }
 0x94a   :  { %v2577_v27 = vadd.f32 1e-12, %v2571_v34 }
 0x94b   :  { %v7565_v6 = vpop.eup %7564  ;;  %v2576_v9 = vadd.f32 1e-12, %v2570_v15 }
 0x94c   :  { %7568 = vrsqrt.f32 %v2577_v27  ;;  %v2586_v60 = vmul.f32 %v7565_v6, %v2538_v0  ;;  %v159_v0 = vld [vmem:[%s9572_s3 + $0x60] sm:$0xff] }
 0x94d   :  { %7570 = vrsqrt.f32 %v2576_v9 }
 0x94e   :  { %v2596_v23 = vmul.f32 %v5942_v25, %v2586_v60 }
 0x94f   :  { %v7567_v11 = vpop.eup %7566 }
 0x950   :  { %v2606_v8 = vadd.f32 %v5943_v54, %v2596_v23  ;;  %v2587_v62 = vmul.f32 %v7567_v11, %v2539_v49  ;;  %v160_v49 = vld [vmem:[%s9572_s3 + $0x68] sm:$0xff] }
 0x951   :  { %v7151_v42 = vpack.c.bf16 %v160_v49, %v159_v0 }
 0x952   :  { %6698 = vmatprep.mubr.msk.f32.mxu0 %vm175_vm1, %v2606_v8  ;;  %v2597_v32 = vmul.f32 %v5942_v25, %v2587_v62 }
 0x953   :  { %7152 = vmatprep.subr.bf16.mxu1 %v7151_v42 }
 0x954   :  { %v2607_v59 = vadd.f32 %v5943_v54, %v2597_v32  ;;  %7154 = vmatpush3.bf16.msra.mxu1 %v7151_v42 }
 0x956   :  { %v7569_v44 = vpop.eup %7568  ;;  %6699 = vmatmul.mubr.msk.f32.gmra.mrb[52].mxu0 %vm175_vm1, %v2607_v59 }
 0x957   :  { %v7571_v30 = vpop.eup %7570  ;;  %v2589_v58 = vmul.f32 %v7569_v44, %v2541_v29  ;;  %v7155_v29 = vpack.c.bf16 %v162_v51, %v161_v31 }
 0x958   :  { %v2588_v33 = vmul.f32 %v7571_v30, %v2540_v53  ;;  %v163_v53 = vld [vmem:[%s9572_s3 + $0x80] sm:$0xff] }
 0x959   :  { %v2599_v5 = vmul.f32 %v5942_v25, %v2589_v58  ;;  %7156 = vmatprep.subr.bf16.mxu1 %v7155_v29  ;;  %v7159_v13 = vpack.c.bf16 %v164_v12, %v163_v53 }
 0x95a   :  { %v2598_v2 = vmul.f32 %v5942_v25, %v2588_v33  ;;  %7158 = vmatpush3.bf16.msra.mxu1 %v7155_v29 }
 0x95b   :  { %v2609_v63 = vadd.f32 %v5943_v54, %v2599_v5  ;;  %7160 = vmatprep.subr.bf16.mxu1 %v7159_v13 }
 0x95c   :  { %v2608_v40 = vadd.f32 %v5943_v54, %v2598_v2 }
 0x95e   :  { %6701 = vmatprep.mubr.msk.f32.mxu0 %vm175_vm1, %v2608_v40  ;;  %7162 = vmatpush3.bf16.msra.mxu1 %v7159_v13 }
 0x95f   :  { %6702 = vmatmul.mubr.msk.f32.gmra.mrb[54].mxu0 %vm175_vm1, %v2609_v63  ;;  %7164 = vmatprep.subr.bf16.mxu1 %v7163_v22 }
 0x962   :  { %7166 = vmatpush3.bf16.msra.mxu1 %v7163_v22 }
 0x963   :  { %7179 = vmatprep.subr.bf16.mxu1 %v7726_v55 }
 0x9d5   :  { %v6697_v46 = vpop.f32.mrb[50].mxu0 }
 0x9d6   :  { %v2704_v35 = vadd.f32 %v6697_v46, %v5944_v39  ;;  %v2698_v41 = vpop.f32.mrb[51].mxu0 }
 0x9d7   :  { %v2699_v4 = vadd.f32 %v5944_v39, %v2698_v41 }
 0x9d8   :  { %v2734_v16 = vmul.f32 0.044715, %v2704_v35  ;;  %v2728_v20 = vmul.f32 0.5, %v2704_v35 }
 0x9d9   :  { %v2733_v25 = vmul.f32 0.044715, %v2699_v4  ;;  %v2727_v45 = vmul.f32 0.5, %v2699_v4 }
 0x9da   :  { %v2740_v7 = vmul.f32 %v2734_v16, %v2704_v35 }
 0x9db   :  { %v2739_v61 = vmul.f32 %v2733_v25, %v2699_v4 }
 0x9dc   :  { %v2746_v43 = vmul.f32 %v2740_v7, %v2704_v35 }
 0x9dd   :  { %v2745_v37 = vmul.f32 %v2739_v61, %v2699_v4 }
 0x9de   :  { %v2752_v54 = vadd.f32 %v2746_v43, %v2704_v35 }
 0x9df   :  { %v2751_v48 = vadd.f32 %v2745_v37, %v2699_v4 }
 0x9e0   :  { %v2758_v18 = vmul.f32 0.7978846, %v2752_v54 }
 0x9e1   :  { %v2757_v56 = vmul.f32 0.7978846, %v2751_v48  ;;  %v5957_v48 = vld [vmem:[%s9571_s4 + $0x7] ss:$0 sm:$0xff] }
 0x9e2   :  { %7572 = vtanh.f32 %v2758_v18 }
 0x9e3   :  { %7574 = vtanh.f32 %v2757_v56 }
 0x9ec   :  { %v7573_v28 = vpop.eup %7572 }
 0x9ed   :  { %v7575_v26 = vpop.eup %7574  ;;  %v2770_v47 = vadd.f32 1.0, %v7573_v28 }
 0x9ee   :  { %v2769_v57 = vadd.f32 1.0, %v7575_v26 }
 0x9ef   :  { %v2776_v34 = vmul.f32 %v2770_v47, %v2728_v20 }
 0x9f0   :  { %v2775_v3 = vmul.f32 %v2769_v57, %v2727_v45 }
 0x9f2   :  { %6720 = vmatprep.mubr.msk.f32.mxu1 %vm2781_vm7, %v2775_v3 }
 0x9f3   :  { %6721 = vmatmul.mubr.msk.f32.vlgmr.msra.gmra.mrb[62].mxu1 %vm2781_vm7, %v2776_v34 }
 0xa29   :  { %v6700_v36 = vpop.f32.mrb[52].mxu0 }
 0xa2a   :  { %v2714_v15 = vadd.f32 %v6700_v36, %v5944_v39  ;;  %v2708_v27 = vpop.f32.mrb[53].mxu0 }
 0xa2b   :  { %v2709_v6 = vadd.f32 %v5944_v39, %v2708_v27 }
 0xa2c   :  { %v2736_v9 = vmul.f32 0.044715, %v2714_v15  ;;  %v2730_v46 = vmul.f32 0.5, %v2714_v15 }
 0xa2d   :  { %v2735_v60 = vmul.f32 0.044715, %v2709_v6  ;;  %v2729_v22 = vmul.f32 0.5, %v2709_v6 }
 0xa2e   :  { %v2742_v23 = vmul.f32 %v2736_v9, %v2714_v15 }
 0xa2f   :  { %v2741_v11 = vmul.f32 %v2735_v60, %v2709_v6 }
 0xa30   :  { %v2748_v8 = vmul.f32 %v2742_v23, %v2714_v15 }
 0xa31   :  { %v2747_v62 = vmul.f32 %v2741_v11, %v2709_v6 }
 0xa32   :  { %v2754_v32 = vadd.f32 %v2748_v8, %v2714_v15  ;;  %v6703_v59 = vpop.f32.mrb[54].mxu0 }
 0xa33   :  { %v2753_v44 = vadd.f32 %v2747_v62, %v2709_v6  ;;  %v2724_v30 = vadd.f32 %v6703_v59, %v5944_v39  ;;  %v2718_v58 = vpop.f32.mrb[55].mxu0 }
 0xa34   :  { %v2719_v33 = vadd.f32 %v5944_v39, %v2718_v58  ;;  %v2760_v5 = vmul.f32 0.7978846, %v2754_v32 }
 0xa35   :  { %v2738_v2 = vmul.f32 0.044715, %v2724_v30  ;;  %v2759_v40 = vmul.f32 0.7978846, %v2753_v44  ;;  %v2732_v43 = vmul.f32 0.5, %v2724_v30 }
 0xa36   :  { %v2737_v63 = vmul.f32 0.044715, %v2719_v33  ;;  %7576 = vtanh.f32 %v2760_v5  ;;  %v2731_v7 = vmul.f32 0.5, %v2719_v33 }
 0xa37   :  { %v2744_v0 = vmul.f32 %v2738_v2, %v2724_v30  ;;  %7578 = vtanh.f32 %v2759_v40  ;;  %v5958_v40 = vld [vmem:[%s9572_s3 + $0xa0] sm:$0xff] }
 0xa38   :  { %v2743_v49 = vmul.f32 %v2737_v63, %v2719_v33  ;;  %v5959_v63 = vld [vmem:[%s9572_s3 + $0xa8] sm:$0xff] }
 0xa39   :  { %v2750_v42 = vmul.f32 %v2744_v0, %v2724_v30  ;;  %v7167_v0 = vpack.c.bf16 %v5959_v63, %v5958_v40 }
 0xa3a   :  { %v2749_v31 = vmul.f32 %v2743_v49, %v2719_v33  ;;  %v5960_v49 = vld [vmem:[%s9572_s3 + $0xb0] sm:$0xff] }
 0xa3b   :  { %v2756_v51 = vadd.f32 %v2750_v42, %v2724_v30  ;;  %7168 = vmatprep.subr.bf16.mxu0 %v7167_v0  ;;  %v5961_v42 = vld [vmem:[%s9572_s3 + $0xb8] sm:$0xff] }
 0xa3c   :  { %v2755_v29 = vadd.f32 %v2749_v31, %v2719_v33  ;;  %7170 = vmatpush3.bf16.msra.mxu0 %v7167_v0  ;;  %v7171_v31 = vpack.c.bf16 %v5961_v42, %v5960_v49 }
 0xa3d   :  { %v2762_v53 = vmul.f32 0.7978846, %v2756_v51 }
 0xa3e   :  { %v2761_v12 = vmul.f32 0.7978846, %v2755_v29  ;;  %7172 = vmatprep.subr.bf16.mxu0 %v7171_v31 }
 0xa3f   :  { %7580 = vtanh.f32 %v2762_v53 }
 0xa40   :  { %v7577_v13 = vpop.eup %7576  ;;  %7582 = vtanh.f32 %v2761_v12  ;;  %7174 = vmatpush3.bf16.msra.mxu0 %v7171_v31 }
 0xa41   :  { %v7579_v19 = vpop.eup %7578  ;;  %v2772_v10 = vadd.f32 1.0, %v7577_v13  ;;  %7175 = vmatprep.subr.bf16.mxu0 %v7726_v55 }
 0xa42   :  { %v2771_v39 = vadd.f32 1.0, %v7579_v19 }
 0xa43   :  { %v2778_v41 = vmul.f32 %v2772_v10, %v2730_v46 }
 0xa44   :  { %v2777_v35 = vmul.f32 %v2771_v39, %v2729_v22 }
 0xa46   :  { %6723 = vmatprep.mubr.msk.f32.mxu1 %vm2781_vm7, %v2777_v35 }
 0xa47   :  { %6724 = vmatmul.mubr.msk.f32.gmra.mrb[64].mxu1 %vm2781_vm7, %v2778_v41 }
 0xa49   :  { %v7581_v4 = vpop.eup %7580 }
 0xa4a   :  { %v7583_v16 = vpop.eup %7582  ;;  %v2774_v25 = vadd.f32 1.0, %v7581_v4 }
 0xa4b   :  { %v2773_v61 = vadd.f32 1.0, %v7583_v16 }
 0xa4c   :  { %v2780_v54 = vmul.f32 %v2774_v25, %v2732_v43 }
 0xa4d   :  { %v2779_v37 = vmul.f32 %v2773_v61, %v2731_v7 }
 0xa4f   :  { %6726 = vmatprep.mubr.msk.f32.mxu1 %vm2781_vm7, %v2779_v37 }
 0xa50   :  { %6727 = vmatmul.mubr.msk.f32.gmra.mrb[66].mxu1 %vm2781_vm7, %v2780_v54 }
 0xa51   :  { %6767 = vmatprep.mubr.msk.f32.mxu1 %vm7730_vm2, %v7731_v1 }
 0xac6   :  { %v6722_v18 = vpop.f32.mrb[62].mxu1 }
 0xac7   :  { %v2896_v56 = vadd.f32 %v6722_v18, %v8583_v17  ;;  %v2866_v28 = vpop.f32.mrb[63].mxu1 }
 0xac8   :  { %v2895_v26 = vadd.f32 %v2866_v28, %v8585_v38 }
 0xac9   :  { %v8690_v47 = vadd.f32 %v5957_v48, %v2896_v56 }
 0xaca   :  { %v8692_v45 = vadd.f32 %v5957_v48, %v2895_v26 }
 0xacb   :  { %v2944_v57 = vsel %vm175_vm1, %v8690_v47, 0.0 }
 0xacc   :  { %2945 = vadd.xlane.f32.xlu1 %v2944_v57  ;;  %v2941_v20 = vsel %vm175_vm1, %v8692_v45, 0.0 }
 0xacd   :  { %2942 = vadd.xlane.f32.xlu0 %v2941_v20 }
 0xb1a   :  { %v6725_v3 = vpop.f32.mrb[64].mxu1 }
 0xb1b   :  { %v2898_v34 = vadd.f32 %v6725_v3, %v8597_v50  ;;  %v2876_v36 = vpop.f32.mrb[65].mxu1  ;;  %v5986_v3 = vld [vmem:[%s9571_s4 + $0x8] ss:$0 sm:$0xff] }
 0xb1c   :  { %v2897_v17 = vadd.f32 %v2876_v36, %v8595_v21 }
 0xb1d   :  { %v8700_v15 = vadd.f32 %v5957_v48, %v2898_v34 }
 0xb1e   :  { %v8702_v38 = vadd.f32 %v5957_v48, %v2897_v17 }
 0xb1f   :  { %v2950_v27 = vsel %vm175_vm1, %v8700_v15, 0.0 }
 0xb20   :  { %2951 = vadd.xlane.f32.xlu1 %v2950_v27  ;;  %v2947_v6 = vsel %vm175_vm1, %v8702_v38, 0.0 }
 0xb21   :  { %2948 = vadd.xlane.f32.xlu0 %v2947_v6  ;;  %v5987_v6 = vld [vmem:[%s9571_s4 + $0x9] ss:$0 sm:$0xff] }
 0xb23   :  { %v6728_v9 = vpop.f32.mrb[66].mxu1 }
 0xb24   :  { %v2900_v60 = vadd.f32 %v6728_v9, %v8605_v52  ;;  %v2886_v23 = vpop.f32.mrb[67].mxu1 }
 0xb25   :  { %v2899_v50 = vadd.f32 %v2886_v23, %v8607_v24 }
 0xb26   :  { %v8710_v11 = vadd.f32 %v5957_v48, %v2900_v60 }
 0xb27   :  { %v8712_v21 = vadd.f32 %v5957_v48, %v2899_v50 }
 0xb28   :  { %v2956_v8 = vsel %vm175_vm1, %v8710_v11, 0.0 }
 0xb29   :  { %2957 = vadd.xlane.f32.xlu1 %v2956_v8  ;;  %v2953_v62 = vsel %vm175_vm1, %v8712_v21, 0.0 }
 0xb2a   :  { %2954 = vadd.xlane.f32.xlu0 %v2953_v62 }
 0xb59   :  { %v2946_v32 = vpop.xlane.xlu1 %2945 }
 0xb5a   :  { %v2960_v59 = vmul.f32 0.03125, %v2946_v32  ;;  %v2943_v44 = vpop.xlane.xlu0 %2942 }
 0xb5b   :  { %v2959_v30 = vmul.f32 0.03125, %v2943_v44 }
 0xb5c   :  { %v2966_v52 = vsub.f32 %v8690_v47, %v2960_v59 }
 0xb5d   :  { %v2965_v24 = vsub.f32 %v8692_v45, %v2959_v30 }
 0xb5e   :  { %v2972_v58 = vmul.f32 %v2966_v52, %v2966_v52 }
 0xb5f   :  { %v2971_v33 = vmul.f32 %v2965_v24, %v2965_v24 }
 0xb60   :  { %v2980_v5 = vsel %vm175_vm1, %v2972_v58, 0.0 }
 0xb61   :  { %2981 = vadd.xlane.f32.xlu1 %v2980_v5  ;;  %v2977_v2 = vsel %vm175_vm1, %v2971_v33, 0.0 }
 0xb62   :  { %2978 = vadd.xlane.f32.xlu0 %v2977_v2 }
 0xbad   :  { %v2952_v51 = vpop.xlane.xlu1 %2951 }
 0xbae   :  { %v2962_v29 = vmul.f32 0.03125, %v2952_v51  ;;  %v2949_v53 = vpop.xlane.xlu0 %2948 }
 0xbaf   :  { %v2961_v12 = vmul.f32 0.03125, %v2949_v53 }
 0xbb0   :  { %v2968_v13 = vsub.f32 %v8700_v15, %v2962_v29 }
 0xbb1   :  { %v2967_v19 = vsub.f32 %v8702_v38, %v2961_v12 }
 0xbb2   :  { %v2974_v10 = vmul.f32 %v2968_v13, %v2968_v13 }
 0xbb3   :  { %v2973_v22 = vmul.f32 %v2967_v19, %v2967_v19 }
 0xbb4   :  { %v2986_v39 = vsel %vm175_vm1, %v2974_v10, 0.0 }
 0xbb5   :  { %2987 = vadd.xlane.f32.xlu1 %v2986_v39  ;;  %v2983_v46 = vsel %vm175_vm1, %v2973_v22, 0.0 }
 0xbb6   :  { %v2958_v35 = vpop.xlane.xlu1 %2957  ;;  %2984 = vadd.xlane.f32.xlu0 %v2983_v46 }
 0xbb7   :  { %v2964_v41 = vmul.f32 0.03125, %v2958_v35  ;;  %v2955_v4 = vpop.xlane.xlu0 %2954 }
 0xbb8   :  { %v2963_v16 = vmul.f32 0.03125, %v2955_v4 }
 0xbb9   :  { %v2970_v25 = vsub.f32 %v8710_v11, %v2964_v41 }
 0xbba   :  { %v2969_v7 = vsub.f32 %v8712_v21, %v2963_v16 }
 0xbbb   :  { %v2976_v61 = vmul.f32 %v2970_v25, %v2970_v25 }
 0xbbc   :  { %v2975_v43 = vmul.f32 %v2969_v7, %v2969_v7 }
 0xbbd   :  { %v2992_v37 = vsel %vm175_vm1, %v2976_v61, 0.0 }
 0xbbe   :  { %2993 = vadd.xlane.f32.xlu1 %v2992_v37  ;;  %v2989_v54 = vsel %vm175_vm1, %v2975_v43, 0.0 }
 0xbbf   :  { %2990 = vadd.xlane.f32.xlu0 %v2989_v54 }
 0xbee   :  { %v2982_v48 = vpop.xlane.xlu1 %2981 }
 0xbef   :  { %v2996_v18 = vmul.f32 0.03125, %v2982_v48  ;;  %v2979_v56 = vpop.xlane.xlu0 %2978 }
 0xbf0   :  { %v2995_v28 = vmul.f32 0.03125, %v2979_v56 }
 0xbf1   :  { %v3002_v26 = vadd.f32 1e-12, %v2996_v18 }
 0xbf2   :  { %v3001_v57 = vadd.f32 1e-12, %v2995_v28 }
 0xbf3   :  { %7584 = vrsqrt.f32 %v3002_v26 }
 0xbf4   :  { %7586 = vrsqrt.f32 %v3001_v57 }
 0xbfd   :  { %v7585_v20 = vpop.eup %7584 }
 0xbfe   :  { %v7587_v34 = vpop.eup %7586  ;;  %v3014_v36 = vmul.f32 %v7585_v20, %v2966_v52 }
 0xbff   :  { %v3013_v17 = vmul.f32 %v7587_v34, %v2965_v24 }
 0xc00   :  { %v3024_v27 = vmul.f32 %v5986_v3, %v3014_v36 }
 0xc01   :  { %v3023_v9 = vmul.f32 %v5986_v3, %v3013_v17 }
 0xc02   :  { %v3034_v23 = vadd.f32 %v5987_v6, %v3024_v27 }
 0xc03   :  { %v3033_v60 = vadd.f32 %v5987_v6, %v3023_v9 }
 0xc05   :  { %6737 = vmatprep.mubr.msk.f32.mxu0 %vm175_vm1, %v3033_v60 }
 0xc06   :  { %6738 = vmatmul.mubr.msk.f32.vlgmr.msra.gmra.mrb[56].mxu0 %vm175_vm1, %v3034_v23 }
 0xc42   :  { %v2988_v50 = vpop.xlane.xlu1 %2987 }
 0xc43   :  { %v2998_v8 = vmul.f32 0.03125, %v2988_v50  ;;  %v2985_v62 = vpop.xlane.xlu0 %2984 }
 0xc44   :  { %v2997_v32 = vmul.f32 0.03125, %v2985_v62 }
 0xc45   :  { %v3004_v59 = vadd.f32 1e-12, %v2998_v8 }
 0xc46   :  { %v3003_v44 = vadd.f32 1e-12, %v2997_v32 }
 0xc47   :  { %7588 = vrsqrt.f32 %v3004_v59 }
 0xc48   :  { %7590 = vrsqrt.f32 %v3003_v44 }
 0xc4b   :  { %v2994_v30 = vpop.xlane.xlu1 %2993 }
 0xc4c   :  { %v3000_v52 = vmul.f32 0.03125, %v2994_v30  ;;  %v2991_v24 = vpop.xlane.xlu0 %2990 }
 0xc4d   :  { %v2999_v58 = vmul.f32 0.03125, %v2991_v24 }
 0xc4e   :  { %v3006_v33 = vadd.f32 1e-12, %v3000_v52 }
 0xc4f   :  { %v3005_v5 = vadd.f32 1e-12, %v2999_v58 }
 0xc50   :  { %7592 = vrsqrt.f32 %v3006_v33 }
 0xc51   :  { %v7589_v2 = vpop.eup %7588  ;;  %7594 = vrsqrt.f32 %v3005_v5 }
 0xc52   :  { %v7591_v40 = vpop.eup %7590  ;;  %v3016_v63 = vmul.f32 %v7589_v2, %v2968_v13  ;;  %v5988_v13 = vld [vmem:[%s9571_s4 + $0xa] ss:$0 sm:$0xff] }
 0xc53   :  { %v3015_v0 = vmul.f32 %v7591_v40, %v2967_v19 }
 0xc54   :  { %v3026_v49 = vmul.f32 %v5986_v3, %v3016_v63 }
 0xc55   :  { %v3025_v42 = vmul.f32 %v5986_v3, %v3015_v0 }
 0xc56   :  { %v3036_v51 = vadd.f32 %v5987_v6, %v3026_v49 }
 0xc57   :  { %v3035_v31 = vadd.f32 %v5987_v6, %v3025_v42 }
 0xc59   :  { %6740 = vmatprep.mubr.msk.f32.mxu0 %vm175_vm1, %v3035_v31 }
 0xc5a   :  { %v7593_v29 = vpop.eup %7592  ;;  %6741 = vmatmul.mubr.msk.f32.gmra.mrb[58].mxu0 %vm175_vm1, %v3036_v51 }
 0xc5b   :  { %v7595_v53 = vpop.eup %7594  ;;  %v3018_v12 = vmul.f32 %v7593_v29, %v2970_v25 }
 0xc5c   :  { %v3017_v10 = vmul.f32 %v7595_v53, %v2969_v7 }
 0xc5d   :  { %v3028_v22 = vmul.f32 %v5986_v3, %v3018_v12 }
 0xc5e   :  { %v3027_v39 = vmul.f32 %v5986_v3, %v3017_v10 }
 0xc5f   :  { %v3038_v35 = vadd.f32 %v5987_v6, %v3028_v22 }
 0xc60   :  { %v3037_v46 = vadd.f32 %v5987_v6, %v3027_v39 }
 0xc62   :  { %6743 = vmatprep.mubr.msk.f32.mxu0 %vm175_vm1, %v3037_v46 }
 0xc63   :  { %6744 = vmatmul.mubr.msk.f32.gmra.mrb[60].mxu0 %vm175_vm1, %v3038_v35 }
 0xc64   :  { %6752 = vmatprep.mubr.msk.f32.mxu0 %vm7730_vm2, %v7731_v1 }
 0xcd9   :  { %v6739_v19 = vpop.f32.mrb[56].mxu0 }
 0xcda   :  { %v8760_v41 = vadd.f32 %v6739_v19, %v5988_v13  ;;  %v3127_v4 = vpop.f32.mrb[57].mxu0 }
 0xcdb   :  { %v8762_v16 = vadd.f32 %v5988_v13, %v3127_v4 }
 0xcdc   :  { %3259 = vrot.lane.b32.xlu1 %v8760_v41, %s7727_s20 }
 0xcdd   :  { %v7372_v25 = vpack.i.bf16 %v8760_v41, %v8762_v16 }
 0xcdf   :  { %7373 = vrot.lane.b32.xlu0 %v7372_v25, %s7728_s21 }
 0xce0   :  { %3363 = vrot.lane.b32.xlu1 %v8760_v41, %s7729_s22 }
 0xce3   :  { %7383 = vrot.lane.b32.xlu0 %v7372_v25, %s7732_s23 }
 0xce4   :  { %7378 = vrot.lane.b32.xlu1 %v7372_v25, %s7733_s24 }
 0xce7   :  { %3257 = vrot.lane.b32.xlu0 %v8762_v16, %s7727_s20 }
 0xce8   :  { %7388 = vrot.lane.b32.xlu1 %v7372_v25, %s7734_s25 }
 0xceb   :  { %3361 = vrot.lane.b32.xlu0 %v8762_v16, %s7729_s22 }
 0xcef   :  { %3465 = vrot.lane.b32.xlu0 %v8762_v16, %s7735_s26 }
 0xd2d   :  { %v6742_v7 = vpop.f32.mrb[58].mxu0 }
 0xd2e   :  { %v3137_v61 = vpop.f32.mrb[59].mxu0  ;;  %v8790_v48 = vadd.f32 %v6742_v7, %v5988_v13 }
 0xd2f   :  { %v8780_v43 = vadd.f32 %v5988_v13, %v3137_v61 }
 0xd31   :  { %3261 = vrot.lane.b32.xlu0 %v8780_v43, %s7727_s20  ;;  %3163 = vrot.lane.b32.xlu1 %v8780_v43, %s7728_s21 }
 0xd35   :  { %3475 = vrot.lane.b32.xlu0 %v8780_v43, %s7734_s25  ;;  %3267 = vrot.lane.b32.xlu1 %v8780_v43, %s7733_s24 }
 0xd36   :  { %v6745_v37 = vpop.f32.mrb[60].mxu0 }
 0xd37   :  { %v3147_v54 = vpop.f32.mrb[61].mxu0  ;;  %v8806_v28 = vadd.f32 %v6745_v37, %v5988_v13 }
 0xd38   :  { %v8792_v18 = vadd.f32 %v5988_v13, %v3147_v54 }
 0xd39   :  { %3467 = vrot.lane.b32.xlu0 %v8760_v41, %s7735_s26  ;;  %3371 = vrot.lane.b32.xlu1 %v8780_v43, %s7732_s23 }
 0xd3a   :  { %v8800_v56 = vpack.i.bf16 %v8792_v18, %v8790_v48 }
 0xd3d   :  { %3469 = vrot.lane.b32.xlu0 %v8780_v43, %s7735_s26  ;;  %7393 = vrot.lane.b32.xlu1 %v8800_v56, %s7728_s21 }
 0xd41   :  { %3680 = vrot.lane.b32.xlu0 %v8806_v28, %s7733_s24  ;;  %7398 = vrot.lane.b32.xlu1 %v8800_v56, %s7733_s24 }
 0xd45   :  { %7408 = vrot.lane.b32.xlu0 %v8800_v56, %s7734_s25  ;;  %3365 = vrot.lane.b32.xlu1 %v8780_v43, %s7729_s22 }
 0xd49   :  { %3672 = vrot.lane.b32.xlu0 %v8792_v18, %s7727_s20  ;;  %3576 = vrot.lane.b32.xlu1 %v8806_v28, %s7728_s21 }
 0xd4d   :  { %3784 = vrot.lane.b32.xlu0 %v8806_v28, %s7732_s23  ;;  %7403 = vrot.lane.b32.xlu1 %v8800_v56, %s7732_s23 }
 0xd4e   :  { %v8824_v26 = vpop.permute.xlu1 %3259 }
 0xd51   :  { %v7374_v57 = vpop.permute.xlu0 %7373  ;;  %3774 = vrot.lane.b32.xlu0 %v8790_v48, %s7729_s22  ;;  %3670 = vrot.lane.b32.xlu1 %v8790_v48, %s7727_s20 }
 0xd52   :  { %v7376_v20 = vunpack.i.h.bf16 %v7374_v57  ;;  %v7375_v3 = vunpack.i.l.bf16 %v7374_v57  ;;  %v8830_v34 = vpop.permute.xlu1 %3363 }
 0xd54   :  { %v7176_v36 = vpack.c.bf16 %v7376_v20, %v7375_v3 }
 0xd55   :  { %3776 = vrot.lane.b32.xlu0 %v8792_v18, %s7729_s22  ;;  %3674 = vrot.lane.b32.xlu1 %v8806_v28, %s7727_s20  ;;  %v7384_v60 = vpop.permute.xlu0 %7383 }
 0xd56   :  { %v7379_v17 = vpop.permute.xlu1 %7378  ;;  %7178 = vmatpush3.bf16.xpose.msk.msra.mxu0 %vm8014_vm4, %v7176_v36  ;;  %v7386_v32 = vunpack.i.h.bf16 %v7384_v60  ;;  %v7385_v59 = vunpack.i.l.bf16 %v7384_v60 }
 0xd57   :  { %v7381_v27 = vunpack.i.h.bf16 %v7379_v17  ;;  %v7380_v6 = vunpack.i.l.bf16 %v7379_v17  ;;  %6750 = vmatprep.subr.mxu0 %v7731_v1 }
 0xd58   :  { %v7184_v52 = vpack.c.bf16 %v7386_v32, %v7385_v59 }
 0xd59   :  { %v7180_v9 = vpack.c.bf16 %v7381_v27, %v7380_v6  ;;  %3778 = vrot.lane.b32.xlu0 %v8806_v28, %s7729_s22  ;;  %3888 = vrot.lane.b32.xlu1 %v8806_v28, %s7734_s25  ;;  %v3258_v23 = vpop.permute.xlu0 %3257 }
 0xd5a   :  { %v7389_v8 = vpop.permute.xlu1 %7388 }
 0xd5b   :  { %7182 = vmatpush3.bf16.xpose.msk.msra.mxu1 %vm8014_vm4, %v7180_v9  ;;  %v7391_v24 = vunpack.i.h.bf16 %v7389_v8  ;;  %v7390_v58 = vunpack.i.l.bf16 %v7389_v8 }
 0xd5c   :  { %6765 = vmatprep.subr.mxu1 %v7731_v1 }
 0xd5d   :  { %7418 = vrot.lane.b32.xlu0 %v7372_v25, %s7736_s27  ;;  %3878 = vrot.lane.b32.xlu1 %v8790_v48, %s7735_s26  ;;  %v3362_v50 = vpop.permute.xlu0 %3361  ;;  %v7188_v2 = vpack.c.bf16 %v7391_v24, %v7390_v58 }
 0xd61   :  { %4372 = vrot.lane.b32.xlu0 %v8780_v43, %s7736_s27  ;;  %3880 = vrot.lane.b32.xlu1 %v8792_v18, %s7735_s26  ;;  %v3466_v62 = vpop.permute.xlu0 %3465 }
 0xd65   :  { %7428 = vrot.lane.b32.xlu0 %v7372_v25, %s7738_s0  ;;  %3882 = vrot.lane.b32.xlu1 %v8806_v28, %s7735_s26 }
 0xd69   :  { %4568 = vrot.lane.b32.xlu0 %v8780_v43, %s7738_s0  ;;  %7413 = vrot.lane.b32.xlu1 %v7372_v25, %s7737_s28 }
 0xd6d   :  { %4274 = vrot.lane.b32.xlu1 %v8780_v43, %s7737_s28 }
 0xd71   :  { %7423 = vrot.lane.b32.xlu1 %v7372_v25, %s7739_s29 }
 0xd75   :  { %4470 = vrot.lane.b32.xlu1 %v8780_v43, %s7739_s29 }
 0xd79   :  { %7433 = vrot.lane.b32.xlu1 %v8800_v56, %s7737_s28 }
 0xda3   :  { %v3164_v44 = vpop.permute.xlu1 %3163  ;;  %v3262_v30 = vpop.permute.xlu0 %3261 }
 0xda4   :  { %6751 = vmatpush3.xpose.msk.msra.mxu0 %vm401_vm3, %v3164_v44 }
 0xda5   :  { %7183 = vmatprep.subr.bf16.mxu0 %v7726_v55 }
 0xda7   :  { %v3268_v33 = vpop.permute.xlu1 %3267  ;;  %v3476_v5 = vpop.permute.xlu0 %3475  ;;  %6753 = vmatmul.mubr.msk.f32.vlgmr.msra.gmra.mrb[62].mxu0 %vm401_vm3, %v8762_v16 }
 0xda8   :  { %6766 = vmatpush3.xpose.msk.msra.mxu1 %vm401_vm3, %v3268_v33  ;;  %7186 = vmatpush3.bf16.xpose.msk.msra.mxu0 %vm8014_vm4, %v7184_v52 }
 0xda9   :  { %6755 = vmatprep.mubr.msk.f32.mxu0 %vm7730_vm2, %v7731_v1  ;;  %7187 = vmatprep.subr.bf16.mxu1 %v7726_v55 }
 0xdaa   :  { %6780 = vmatprep.subr.mxu0 %v7731_v1 }
 0xdab   :  { %v3372_v40 = vpop.permute.xlu1 %3371  ;;  %6768 = vmatmul.mubr.msk.f32.vlgmr.msra.gmra.mrb[68].mxu1 %vm401_vm3, %v3258_v23  ;;  %v3468_v63 = vpop.permute.xlu0 %3467  ;;  %6756 = vmatmul.mubr.msk.f32.gmra.mrb[64].mxu0 %vm401_vm3, %v8760_v41 }
 0xdac   :  { %7190 = vmatpush3.bf16.xpose.msk.msra.mxu1 %vm8014_vm4, %v7188_v2  ;;  %6758 = vmatprep.mubr.msk.f32.mxu0 %vm7730_vm2, %v7731_v1 }
 0xdad   :  { %6770 = vmatprep.mubr.msk.f32.mxu1 %vm7730_vm2, %v7731_v1  ;;  %6795 = vmatprep.subr.mxu1 %v7731_v1 }
 0xdaf   :  { %v7394_v0 = vpop.permute.xlu1 %7393  ;;  %6771 = vmatmul.mubr.msk.f32.gmra.mrb[70].mxu1 %vm401_vm3, %v8824_v26  ;;  %v3470_v49 = vpop.permute.xlu0 %3469  ;;  %6759 = vmatmul.mubr.msk.f32.gmra.mrb[66].mxu0 %vm401_vm3, %v8780_v43 }
 0xdb0   :  { %v7396_v42 = vunpack.i.h.bf16 %v7394_v0  ;;  %v7395_v31 = vunpack.i.l.bf16 %v7394_v0  ;;  %6781 = vmatpush3.xpose.msk.msra.mxu0 %vm401_vm3, %v3372_v40  ;;  %6773 = vmatprep.mubr.msk.f32.mxu1 %vm7730_vm2, %v7731_v1 }
 0xdb1   :  { %6782 = vmatprep.mubr.msk.f32.mxu0 %vm7730_vm2, %v7731_v1  ;;  %7191 = vmatprep.subr.bf16.mxu0 %v7726_v55 }
 0xdb2   :  { %v7192_v51 = vpack.c.bf16 %v7396_v42, %v7395_v31 }
 0xdb3   :  { %v7399_v29 = vpop.permute.xlu1 %7398  ;;  %6774 = vmatmul.mubr.msk.f32.gmra.mrb[72].mxu1 %vm401_vm3, %v3262_v30  ;;  %v3681_v53 = vpop.permute.xlu0 %3680  ;;  %6783 = vmatmul.mubr.msk.f32.vlgmr.msra.gmra.mrb[68].mxu0 %vm401_vm3, %v3362_v50 }
 0xdb4   :  { %v7401_v12 = vunpack.i.h.bf16 %v7399_v29  ;;  %v7400_v10 = vunpack.i.l.bf16 %v7399_v29  ;;  %6796 = vmatpush3.xpose.msk.msra.mxu1 %vm401_vm3, %v3476_v5  ;;  %7194 = vmatpush3.bf16.xpose.msk.msra.mxu0 %vm8014_vm4, %v7192_v51 }
 0xdb5   :  { %6785 = vmatprep.mubr.msk.f32.mxu0 %vm7730_vm2, %v7731_v1  ;;  %6797 = vmatprep.mubr.msk.f32.mxu1 %vm7730_vm2, %v7731_v1 }
 0xdb6   :  { %v7196_v22 = vpack.c.bf16 %v7401_v12, %v7400_v10  ;;  %7195 = vmatprep.subr.bf16.mxu1 %v7726_v55  ;;  %6810 = vmatprep.subr.mxu0 %v7731_v1 }
 0xdb7   :  { %v3366_v39 = vpop.permute.xlu1 %3365  ;;  %6798 = vmatmul.mubr.msk.f32.vlgmr.msra.gmra.mrb[74].mxu1 %vm401_vm3, %v3466_v62  ;;  %v7409_v46 = vpop.permute.xlu0 %7408  ;;  %6786 = vmatmul.mubr.msk.f32.gmra.mrb[70].mxu0 %vm401_vm3, %v8830_v34 }
 0xdb8   :  { %7198 = vmatpush3.bf16.xpose.msk.msra.mxu1 %vm8014_vm4, %v7196_v22  ;;  %6788 = vmatprep.mubr.msk.f32.mxu0 %vm7730_vm2, %v7731_v1  ;;  %v7411_v19 = vunpack.i.h.bf16 %v7409_v46  ;;  %v7410_v41 = vunpack.i.l.bf16 %v7409_v46 }
 0xdb9   :  { %6800 = vmatprep.mubr.msk.f32.mxu1 %vm7730_vm2, %v7731_v1  ;;  %6825 = vmatprep.subr.mxu1 %v7731_v1 }
 0xdba   :  { %v7204_v43 = vpack.c.bf16 %v7411_v19, %v7410_v41 }
 0xdbb   :  { %v3577_v35 = vpop.permute.xlu1 %3576  ;;  %6801 = vmatmul.mubr.msk.f32.gmra.mrb[76].mxu1 %vm401_vm3, %v3468_v63  ;;  %v3673_v13 = vpop.permute.xlu0 %3672  ;;  %6789 = vmatmul.mubr.msk.f32.gmra.mrb[72].mxu0 %vm401_vm3, %v3366_v39 }
 0xdbc   :  { %6811 = vmatpush3.xpose.msk.msra.mxu0 %vm401_vm3, %v3577_v35  ;;  %6803 = vmatprep.mubr.msk.f32.mxu1 %vm7730_vm2, %v7731_v1 }
 0xdbd   :  { %6812 = vmatprep.mubr.msk.f32.mxu0 %vm7730_vm2, %v7731_v1  ;;  %7199 = vmatprep.subr.bf16.mxu0 %v7726_v55 }
 0xdbf   :  { %v7404_v4 = vpop.permute.xlu1 %7403  ;;  %6804 = vmatmul.mubr.msk.f32.gmra.mrb[78].mxu1 %vm401_vm3, %v3470_v49  ;;  %v3785_v16 = vpop.permute.xlu0 %3784  ;;  %6813 = vmatmul.mubr.msk.f32.vlgmr.msra.gmra.mrb[74].mxu0 %vm401_vm3, %v8790_v48 }
 0xdc0   :  { %v7406_v25 = vunpack.i.h.bf16 %v7404_v4  ;;  %v7405_v7 = vunpack.i.l.bf16 %v7404_v4  ;;  %6826 = vmatpush3.xpose.msk.msra.mxu1 %vm401_vm3, %v3681_v53  ;;  %6815 = vmatprep.mubr.msk.f32.mxu0 %vm7730_vm2, %v7731_v1 }
 0xdc1   :  { %6827 = vmatprep.mubr.msk.f32.mxu1 %vm7730_vm2, %v7731_v1  ;;  %7203 = vmatprep.subr.bf16.mxu1 %v7726_v55 }
 0xdc2   :  { %v7200_v61 = vpack.c.bf16 %v7406_v25, %v7405_v7 }
 0xdc3   :  { %v3671_v37 = vpop.permute.xlu1 %3670  ;;  %v3775_v54 = vpop.permute.xlu0 %3774  ;;  %6816 = vmatmul.mubr.msk.f32.gmra.mrb[76].mxu0 %vm401_vm3, %v8792_v18 }
 0xdc4   :  { %6828 = vmatmul.mubr.msk.f32.vlgmr.msra.gmra.mrb[80].mxu1 %vm401_vm3, %v3671_v37  ;;  %7202 = vmatpush3.bf16.xpose.msk.msra.mxu0 %vm8014_vm4, %v7200_v61 }
 0xdc5   :  { %7206 = vmatpush3.bf16.xpose.msk.msra.mxu1 %vm8014_vm4, %v7204_v43  ;;  %6818 = vmatprep.mubr.msk.f32.mxu0 %vm7730_vm2, %v7731_v1 }
 0xdc6   :  { %6830 = vmatprep.mubr.msk.f32.mxu1 %vm7730_vm2, %v7731_v1  ;;  %6840 = vmatprep.subr.mxu0 %v7731_v1 }
 0xdc7   :  { %v3675_v48 = vpop.permute.xlu1 %3674  ;;  %v3777_v26 = vpop.permute.xlu0 %3776  ;;  %6819 = vmatmul.mubr.msk.f32.gmra.mrb[78].mxu0 %vm401_vm3, %v8806_v28  ;;  %6855 = vmatprep.subr.mxu1 %v7731_v1 }
 0xdc8   :  { %6831 = vmatmul.mubr.msk.f32.gmra.mrb[82].mxu1 %vm401_vm3, %v3673_v13  ;;  %6842 = vmatprep.mubr.msk.f32.mxu0 %vm7730_vm2, %v7731_v1 }
 0xdc9   :  { %6833 = vmatprep.mubr.msk.f32.mxu1 %vm7730_vm2, %v7731_v1 }
 0xdcb   :  { %v3889_v14 = vpop.permute.xlu1 %3888  ;;  %v3779_v18 = vpop.permute.xlu0 %3778 }
 0xdcc   :  { %6834 = vmatmul.mubr.msk.f32.gmra.mrb[84].mxu1 %vm401_vm3, %v3675_v48  ;;  %6841 = vmatpush3.xpose.msk.msra.mxu0 %vm401_vm3, %v3785_v16 }
 0xdcd   :  { %6856 = vmatpush3.xpose.msk.msra.mxu1 %vm401_vm3, %v3889_v14  ;;  %6857 = vmatprep.mubr.msk.f32.mxu1 %vm7730_vm2, %v7731_v1 }
 0xdce   :  { %7210 = vmatprep.subr.bf16.mxu1 %v7726_v55  ;;  %7207 = vmatprep.subr.bf16.mxu0 %v7726_v55 }
 0xdcf   :  { %v3879_v57 = vpop.permute.xlu1 %3878  ;;  %v7419_v20 = vpop.permute.xlu0 %7418  ;;  %6843 = vmatmul.mubr.msk.f32.vlgmr.msra.gmra.mrb[80].mxu0 %vm401_vm3, %v3775_v54 }
 0xdd0   :  { %v7421_v3 = vunpack.i.h.bf16 %v7419_v20  ;;  %v7420_v34 = vunpack.i.l.bf16 %v7419_v20  ;;  %6858 = vmatmul.mubr.msk.f32.vlgmr.msra.gmra.mrb[86].mxu1 %vm401_vm3, %v3879_v57  ;;  %6845 = vmatprep.mubr.msk.f32.mxu0 %vm7730_vm2, %v7731_v1 }
 0xdd1   :  { %6860 = vmatprep.mubr.msk.f32.mxu1 %vm7730_vm2, %v7731_v1 }
 0xdd2   :  { %v7211_v36 = vpack.c.bf16 %v7421_v3, %v7420_v34 }
 0xdd3   :  { %v3881_v17 = vpop.permute.xlu1 %3880  ;;  %6846 = vmatmul.mubr.msk.f32.gmra.mrb[82].mxu0 %vm401_vm3, %v3777_v26  ;;  %v4373_v6 = vpop.permute.xlu0 %4372 }
 0xdd4   :  { %6861 = vmatmul.mubr.msk.f32.gmra.mrb[88].mxu1 %vm401_vm3, %v3881_v17  ;;  %6848 = vmatprep.mubr.msk.f32.mxu0 %vm7730_vm2, %v7731_v1 }
 0xdd5   :  { %7212 = vmatpush3.bf16.msra.mxu1 %v7211_v36  ;;  %6863 = vmatprep.mubr.msk.f32.mxu1 %vm7730_vm2, %v7731_v1 }
 0xdd6   :  { %6885 = vmatprep.subr.mxu1 %v7731_v1 }
 0xdd7   :  { %v3883_v27 = vpop.permute.xlu1 %3882  ;;  %6849 = vmatmul.mubr.msk.f32.gmra.mrb[84].mxu0 %vm401_vm3, %v3779_v18 }
 0xdd8   :  { %6864 = vmatmul.mubr.msk.f32.gmra.mrb[90].mxu1 %vm401_vm3, %v3883_v27  ;;  %6872 = vmatprep.mubr.msk.f32.mxu0 %vm7730_vm2, %v7731_v1 }
 0xdd9   :  { %6886 = vmatpush3.msra.mxu1 %v4373_v6  ;;  %6887 = vmatprep.mubr.msk.f32.mxu1 %vm7730_vm2, %v7731_v1 }
 0xdda   :  { %7216 = vmatprep.subr.bf16.mxu1 %v7726_v55 }
 0xddb   :  { %v7414_v9 = vpop.permute.xlu1 %7413 }
 0xddc   :  { %v7416_v60 = vunpack.i.h.bf16 %v7414_v9  ;;  %v7415_v23 = vunpack.i.l.bf16 %v7414_v9 }
 0xdde   :  { %v7208_v50 = vpack.c.bf16 %v7416_v60, %v7415_v23 }
 0xddf   :  { %v4275_v8 = vpop.permute.xlu1 %4274 }
 0xde0   :  { %7209 = vmatpush3.bf16.msra.mxu0 %v7208_v50 }
 0xde1   :  { %6870 = vmatprep.subr.mxu0 %v7731_v1 }
 0xde4   :  { %6871 = vmatpush3.msra.mxu0 %v4275_v8 }
 0xde5   :  { %7213 = vmatprep.subr.bf16.mxu0 %v7726_v55 }
 0xe7a   :  { %v3243_v62 = vpop.f32.mrb[62].mxu0 }
 0xe7b   :  { %v8984_v32 = vmul.f32 0.35355338, %v3243_v62  ;;  %v6754_v59 = vpop.f32.mrb[63].mxu0 }
 0xe7d   :  { %v4006_v44 = vsel %vm1243_vm5, %v8984_v32, -inf }
 0xe7e   :  { %v3347_v30 = vpop.f32.mrb[68].mxu1  ;;  %4007 = vmax.xlane.f32.xlu0 %v4006_v44  ;;  %v3248_v52 = vpop.f32.mrb[64].mxu0 }
 0xe7f   :  { %v8988_v24 = vmul.f32 0.35355338, %v3347_v30  ;;  %v8990_v58 = vmul.f32 0.35355338, %v3248_v52  ;;  %v6757_v33 = vpop.f32.mrb[65].mxu0  ;;  %v6769_v5 = vpop.f32.mrb[69].mxu1 }
 0xe81   :  { %v4015_v2 = vsel %vm1243_vm5, %v8988_v24, -inf  ;;  %v4009_v40 = vsel %vm1243_vm5, %v8990_v58, -inf }
 0xe82   :  { %4016 = vmax.xlane.f32.xlu1 %v4015_v2  ;;  %v3352_v63 = vpop.f32.mrb[70].mxu1  ;;  %4010 = vmax.xlane.f32.xlu0 %v4009_v40  ;;  %v3253_v0 = vpop.f32.mrb[66].mxu0 }
 0xe83   :  { %v8996_v49 = vmul.f32 0.35355338, %v3352_v63  ;;  %v6760_v42 = vpop.f32.mrb[67].mxu0  ;;  %v6772_v31 = vpop.f32.mrb[71].mxu1  ;;  %v8998_v51 = vmul.f32 0.35355338, %v3253_v0 }
 0xe85   :  { %v4018_v29 = vsel %vm1243_vm5, %v8996_v49, -inf  ;;  %v4012_v13 = vsel %vm1243_vm5, %v8998_v51, -inf }
 0xe86   :  { %v3357_v53 = vpop.f32.mrb[72].mxu1  ;;  %4019 = vmax.xlane.f32.xlu0 %v4018_v29  ;;  %v3451_v12 = vpop.f32.mrb[68].mxu0 }
 0xe87   :  { %v9002_v10 = vmul.f32 0.35355338, %v3357_v53  ;;  %v6775_v22 = vpop.f32.mrb[73].mxu1  ;;  %v6784_v39 = vpop.f32.mrb[69].mxu0  ;;  %v9004_v46 = vmul.f32 0.35355338, %v3451_v12 }
 0xe89   :  { %v4021_v35 = vsel %vm1243_vm5, %v9002_v10, -inf  ;;  %v4024_v43 = vsel %vm1243_vm5, %v9004_v46, -inf }
 0xe8a   :  { %4022 = vmax.xlane.f32.xlu1 %v4021_v35  ;;  %v3555_v19 = vpop.f32.mrb[74].mxu1  ;;  %4013 = vmax.xlane.f32.xlu0 %v4012_v13  ;;  %v3456_v41 = vpop.f32.mrb[70].mxu0 }
 0xe8b   :  { %v9010_v4 = vmul.f32 0.35355338, %v3555_v19  ;;  %v6787_v16 = vpop.f32.mrb[71].mxu0  ;;  %v6799_v25 = vpop.f32.mrb[75].mxu1  ;;  %v9012_v7 = vmul.f32 0.35355338, %v3456_v41 }
 0xe8d   :  { %v4033_v61 = vsel %vm1243_vm5, %v9010_v4, -inf  ;;  %v4027_v20 = vsel %vm1243_vm5, %v9012_v7, -inf }
 0xe8e   :  { %4034 = vmax.xlane.f32.xlu1 %v4033_v61  ;;  %v3560_v37 = vpop.f32.mrb[76].mxu1  ;;  %4025 = vmax.xlane.f32.xlu0 %v4024_v43  ;;  %v3461_v54 = vpop.f32.mrb[72].mxu0 }
 0xe8f   :  { %v9018_v48 = vmul.f32 0.35355338, %v3560_v37  ;;  %v6790_v26 = vpop.f32.mrb[73].mxu0  ;;  %v6802_v14 = vpop.f32.mrb[77].mxu1  ;;  %v9020_v18 = vmul.f32 0.35355338, %v3461_v54 }
 0xe91   :  { %v4036_v57 = vsel %vm1243_vm5, %v9018_v48, -inf  ;;  %v4030_v60 = vsel %vm1243_vm5, %v9020_v18, -inf }
 0xe92   :  { %4037 = vmax.xlane.f32.xlu1 %v4036_v57  ;;  %v3565_v3 = vpop.f32.mrb[78].mxu1  ;;  %4028 = vmax.xlane.f32.xlu0 %v4027_v20  ;;  %v3656_v34 = vpop.f32.mrb[74].mxu0 }
 0xe93   :  { %v9026_v36 = vmul.f32 0.35355338, %v3565_v3  ;;  %v6805_v17 = vpop.f32.mrb[79].mxu1  ;;  %v6814_v27 = vpop.f32.mrb[75].mxu0  ;;  %v9028_v6 = vmul.f32 0.35355338, %v3656_v34 }
 0xe95   :  { %v4039_v9 = vsel %vm1243_vm5, %v9026_v36, -inf  ;;  %v4042_v30 = vsel %vm1243_vm5, %v9028_v6, -inf }
 0xe96   :  { %4040 = vmax.xlane.f32.xlu1 %v4039_v9  ;;  %4031 = vmax.xlane.f32.xlu0 %v4030_v60  ;;  %v3661_v23 = vpop.f32.mrb[76].mxu0 }
 0xe97   :  { %v6817_v50 = vpop.f32.mrb[77].mxu0  ;;  %v3760_v8 = vpop.f32.mrb[80].mxu1  ;;  %v9036_v44 = vmul.f32 0.35355338, %v3661_v23 }
 0xe98   :  { %v9034_v62 = vmul.f32 0.35355338, %v3760_v8  ;;  %v6829_v59 = vpop.f32.mrb[81].mxu1 }
 0xe99   :  { %v4045_v42 = vsel %vm1243_vm5, %v9036_v44, -inf }
 0xe9a   :  { %4043 = vmax.xlane.f32.xlu0 %v4042_v30  ;;  %v3666_v52 = vpop.f32.mrb[78].mxu0  ;;  %v4051_v33 = vsel %vm1243_vm5, %v9034_v62, -inf  ;;  %v9090_v30 = vpop.permute.xlu1 %7423 }
 0xe9b   :  { %4052 = vmax.xlane.f32.xlu1 %v4051_v33  ;;  %v6820_v5 = vpop.f32.mrb[79].mxu0  ;;  %v3765_v2 = vpop.f32.mrb[82].mxu1  ;;  %v9044_v0 = vmul.f32 0.35355338, %v3666_v52 }
 0xe9c   :  { %v9042_v40 = vmul.f32 0.35355338, %v3765_v2  ;;  %v6832_v63 = vpop.f32.mrb[83].mxu1  ;;  %v9092_v52 = vpop.permute.xlu0 %7428 }
 0xe9d   :  { %v4048_v22 = vsel %vm1243_vm5, %v9044_v0, -inf }
 0xe9e   :  { %4046 = vmax.xlane.f32.xlu0 %v4045_v42  ;;  %v4054_v31 = vsel %vm1243_vm5, %v9042_v40, -inf  ;;  %v9094_v33 = vpop.permute.xlu1 %4470 }
 0xe9f   :  { %4055 = vmax.xlane.f32.xlu1 %v4054_v31  ;;  %v3770_v29 = vpop.f32.mrb[84].mxu1 }
 0xea0   :  { %v9050_v53 = vmul.f32 0.35355338, %v3770_v29  ;;  %v6835_v12 = vpop.f32.mrb[85].mxu1  ;;  %v9096_v5 = vpop.permute.xlu0 %4568 }
 0xea2   :  { %4049 = vmax.xlane.f32.xlu0 %v4048_v22  ;;  %v3864_v39 = vpop.f32.mrb[80].mxu0  ;;  %v4057_v35 = vsel %vm1243_vm5, %v9050_v53, -inf  ;;  %v9098_v2 = vpop.permute.xlu1 %7433 }
 0xea3   :  { %v9056_v13 = vmul.f32 0.35355338, %v3864_v39  ;;  %4058 = vmax.xlane.f32.xlu1 %v4057_v35  ;;  %v6844_v19 = vpop.f32.mrb[81].mxu0  ;;  %v3968_v41 = vpop.f32.mrb[86].mxu1 }
 0xea4   :  { %v9058_v16 = vmul.f32 0.35355338, %v3968_v41  ;;  %v6859_v25 = vpop.f32.mrb[87].mxu1 }
 0xea5   :  { %v4060_v61 = vsel %vm1243_vm5, %v9056_v13, -inf }
 0xea6   :  { %4061 = vmax.xlane.f32.xlu0 %v4060_v61  ;;  %v3869_v43 = vpop.f32.mrb[82].mxu0  ;;  %v4069_v37 = vsel %vm1243_vm5, %v9058_v16, -inf }
 0xea7   :  { %v9064_v54 = vmul.f32 0.35355338, %v3869_v43  ;;  %4070 = vmax.xlane.f32.xlu1 %v4069_v37  ;;  %v6847_v26 = vpop.f32.mrb[83].mxu0  ;;  %v3973_v14 = vpop.f32.mrb[88].mxu1 }
 0xea8   :  { %v9066_v57 = vmul.f32 0.35355338, %v3973_v14  ;;  %v6862_v20 = vpop.f32.mrb[89].mxu1 }
 0xea9   :  { %v4063_v3 = vsel %vm1243_vm5, %v9064_v54, -inf }
 0xeaa   :  { %4064 = vmax.xlane.f32.xlu0 %v4063_v3  ;;  %v3874_v34 = vpop.f32.mrb[84].mxu0  ;;  %v4072_v17 = vsel %vm1243_vm5, %v9066_v57, -inf }
 0xeab   :  { %v9072_v27 = vmul.f32 0.35355338, %v3874_v34  ;;  %4073 = vmax.xlane.f32.xlu1 %v4072_v17  ;;  %v6850_v9 = vpop.f32.mrb[85].mxu0  ;;  %v3978_v60 = vpop.f32.mrb[90].mxu1 }
 0xeac   :  { %v6865_v23 = vpop.f32.mrb[91].mxu1  ;;  %v9084_v8 = vmul.f32 0.35355338, %v3978_v60 }
 0xead   :  { %v4066_v50 = vsel %vm1243_vm5, %v9072_v27, -inf }
 0xeae   :  { %4067 = vmax.xlane.f32.xlu0 %v4066_v50  ;;  %v4075_v59 = vsel %vm1243_vm5, %v9084_v8, -inf }
 0xebc   :  { %4711 = vrot.lane.b32.xlu1 %v8806_v28, %s7737_s28 }
 0xec0   :  { %4809 = vrot.lane.b32.xlu1 %v8806_v28, %s7736_s27 }
 0xec4   :  { %7443 = vrot.lane.b32.xlu1 %v8800_v56, %s7739_s29  ;;  %7438 = vrot.lane.b32.xlu0 %v8800_v56, %s7736_s27 }
 0xee8   :  { %4076 = vmax.xlane.f32.xlu1 %v4075_v59 }
 0xef9   :  { %7448 = vrot.lane.b32.xlu1 %v8800_v56, %s7738_s0 }
 0xf0b   :  { %v4008_v63 = vpop.xlane.xlu0 %4007 }
 0xf0c   :  { %v4078_v42 = vsub.f32 %v8984_v32, %v4008_v63 }
 0xf0e   :  { %v4102_v31 = vmul.f32 1.442695, %v4078_v42 }
 0xf0f   :  { %v4017_v29 = vpop.xlane.xlu1 %4016  ;;  %v4011_v12 = vpop.xlane.xlu0 %4010 }
 0xf10   :  { %7596 = vpow2.f32 %v4102_v31  ;;  %v4081_v22 = vsub.f32 %v8988_v24, %v4017_v29  ;;  %v4079_v56 = vsub.f32 %v8990_v58, %v4011_v12 }
 0xf12   :  { %v4108_v39 = vmul.f32 1.442695, %v4081_v22  ;;  %v4104_v35 = vmul.f32 1.442695, %v4079_v56 }
 0xf13   :  { %v4020_v19 = vpop.xlane.xlu0 %4019 }
 0xf14   :  { %7598 = vpow2.f32 %v4108_v39  ;;  %v4082_v41 = vsub.f32 %v8996_v49, %v4020_v19 }
 0xf15   :  { %7600 = vpow2.f32 %v4104_v35 }
 0xf16   :  { %v4110_v25 = vmul.f32 1.442695, %v4082_v41 }
 0xf17   :  { %v4023_v61 = vpop.xlane.xlu1 %4022  ;;  %v4014_v43 = vpop.xlane.xlu0 %4013 }
 0xf18   :  { %7602 = vpow2.f32 %v4110_v25  ;;  %v4083_v32 = vsub.f32 %v9002_v10, %v4023_v61  ;;  %v4080_v37 = vsub.f32 %v8998_v51, %v4014_v43 }
 0xf1a   :  { %v9106_v26 = vpop.eup %7596  ;;  %v4112_v24 = vmul.f32 1.442695, %v4083_v32  ;;  %v4106_v14 = vmul.f32 1.442695, %v4080_v37 }
 0xf1b   :  { %v4035_v58 = vpop.xlane.xlu1 %4034  ;;  %v4026_v20 = vpop.xlane.xlu0 %4025  ;;  %v4150_v3 = vsel %vm1243_vm5, %v9106_v26, 0.0 }
 0xf1c   :  { %7604 = vpow2.f32 %v4112_v24  ;;  %v4087_v49 = vsub.f32 %v9010_v4, %v4035_v58  ;;  %v4084_v34 = vsub.f32 %v9004_v46, %v4026_v20  ;;  %4151 = vadd.xlane.f32.xlu0 %v4150_v3 }
 0xf1d   :  { %7606 = vpow2.f32 %v4106_v14 }
 0xf1e   :  { %v9112_v17 = vpop.eup %7598  ;;  %v4120_v10 = vmul.f32 1.442695, %v4087_v49  ;;  %v4114_v51 = vmul.f32 1.442695, %v4084_v34 }
 0xf1f   :  { %v9114_v9 = vpop.eup %7600  ;;  %v4038_v60 = vpop.xlane.xlu1 %4037  ;;  %v4159_v50 = vsel %vm1243_vm5, %v9112_v17, 0.0 }
 0xf20   :  { %v4029_v23 = vpop.xlane.xlu0 %4028  ;;  %7608 = vpow2.f32 %v4120_v10  ;;  %v4088_v59 = vsub.f32 %v9018_v48, %v4038_v60  ;;  %4160 = vadd.xlane.f32.xlu1 %v4159_v50  ;;  %v4153_v46 = vsel %vm1243_vm5, %v9114_v9, 0.0 }
 0xf21   :  { %v4085_v4 = vsub.f32 %v9012_v7, %v4029_v23  ;;  %7610 = vpow2.f32 %v4114_v51  ;;  %4154 = vadd.xlane.f32.xlu0 %v4153_v46 }
 0xf22   :  { %v9122_v63 = vpop.eup %7602  ;;  %v4122_v42 = vmul.f32 1.442695, %v4088_v59 }
 0xf23   :  { %v4116_v31 = vmul.f32 1.442695, %v4085_v4  ;;  %v4041_v29 = vpop.xlane.xlu1 %4040  ;;  %v4162_v22 = vsel %vm1243_vm5, %v9122_v63, 0.0 }
 0xf24   :  { %v4032_v12 = vpop.xlane.xlu0 %4031  ;;  %7612 = vpow2.f32 %v4122_v42  ;;  %v4089_v48 = vsub.f32 %v9026_v36, %v4041_v29  ;;  %4163 = vadd.xlane.f32.xlu1 %v4162_v22 }
 0xf25   :  { %v4086_v7 = vsub.f32 %v9020_v18, %v4032_v12  ;;  %7614 = vpow2.f32 %v4116_v31 }
 0xf26   :  { %v9128_v56 = vpop.eup %7604  ;;  %v4124_v19 = vmul.f32 1.442695, %v4089_v48 }
 0xf27   :  { %v4118_v39 = vmul.f32 1.442695, %v4086_v7  ;;  %v9130_v35 = vpop.eup %7606  ;;  %v4165_v25 = vsel %vm1243_vm5, %v9128_v56, 0.0 }
 0xf28   :  { %v4044_v41 = vpop.xlane.xlu0 %4043  ;;  %v4053_v43 = vpop.xlane.xlu1 %4052  ;;  %4166 = vadd.xlane.f32.xlu1 %v4165_v25  ;;  %v4156_v36 = vsel %vm1243_vm5, %v9130_v35, 0.0 }
 0xf29   :  { %v4090_v61 = vsub.f32 %v9028_v6, %v4044_v41  ;;  %7616 = vpow2.f32 %v4118_v39  ;;  %v4093_v18 = vsub.f32 %v9034_v62, %v4053_v43  ;;  %4157 = vadd.xlane.f32.xlu0 %v4156_v36 }
 0xf2a   :  { %v9138_v32 = vpop.eup %7608  ;;  %7618 = vpow2.f32 %v4124_v19 }
 0xf2b   :  { %v4126_v37 = vmul.f32 1.442695, %v4090_v61  ;;  %v9140_v24 = vpop.eup %7610  ;;  %v4132_v14 = vmul.f32 1.442695, %v4093_v18  ;;  %v4177_v6 = vsel %vm1243_vm5, %v9138_v32, 0.0 }
 0xf2c   :  { %v4047_v58 = vpop.xlane.xlu0 %4046  ;;  %v4056_v3 = vpop.xlane.xlu1 %4055  ;;  %4178 = vadd.xlane.f32.xlu1 %v4177_v6  ;;  %v4168_v62 = vsel %vm1243_vm5, %v9140_v24, 0.0 }
 0xf2d   :  { %7620 = vpow2.f32 %v4126_v37  ;;  %v4091_v20 = vsub.f32 %v9036_v44, %v4047_v58  ;;  %v4094_v49 = vsub.f32 %v9042_v40, %v4056_v3  ;;  %4169 = vadd.xlane.f32.xlu0 %v4168_v62 }
 0xf2e   :  { %v9148_v34 = vpop.eup %7612  ;;  %7622 = vpow2.f32 %v4132_v14 }
 0xf2f   :  { %v4128_v10 = vmul.f32 1.442695, %v4091_v20  ;;  %v9150_v51 = vpop.eup %7614  ;;  %v4134_v60 = vmul.f32 1.442695, %v4094_v49  ;;  %v4180_v50 = vsel %vm1243_vm5, %v9148_v34, 0.0 }
 0xf30   :  { %v4050_v23 = vpop.xlane.xlu0 %4049  ;;  %v4059_v59 = vpop.xlane.xlu1 %4058  ;;  %4181 = vadd.xlane.f32.xlu1 %v4180_v50  ;;  %v4171_v40 = vsel %vm1243_vm5, %v9150_v51, 0.0 }
 0xf31   :  { %7624 = vpow2.f32 %v4128_v10  ;;  %v4092_v44 = vsub.f32 %v9044_v0, %v4050_v23  ;;  %v4095_v4 = vsub.f32 %v9050_v53, %v4059_v59  ;;  %4172 = vadd.xlane.f32.xlu0 %v4171_v40 }
 0xf32   :  { %7626 = vpow2.f32 %v4134_v60 }
 0xf33   :  { %v4130_v46 = vmul.f32 1.442695, %v4092_v44  ;;  %v9158_v42 = vpop.eup %7616  ;;  %v4136_v31 = vmul.f32 1.442695, %v4095_v4 }
 0xf34   :  { %v4062_v29 = vpop.xlane.xlu0 %4061  ;;  %v4071_v22 = vpop.xlane.xlu1 %4070  ;;  %v4174_v0 = vsel %vm1243_vm5, %v9158_v42, 0.0 }
 0xf35   :  { %7628 = vpow2.f32 %v4130_v46  ;;  %v4096_v12 = vsub.f32 %v9056_v13, %v4062_v29  ;;  %v9163_v48 = vpop.eup %7618  ;;  %v4099_v7 = vsub.f32 %v9058_v16, %v4071_v22  ;;  %4175 = vadd.xlane.f32.xlu0 %v4174_v0 }
 0xf36   :  { %7630 = vpow2.f32 %v4136_v31  ;;  %v4183_v43 = vsel %vm1243_vm5, %v9163_v48, 0.0 }
 0xf37   :  { %v9166_v53 = vpop.eup %7620  ;;  %v4138_v39 = vmul.f32 1.442695, %v4096_v12  ;;  %v4144_v19 = vmul.f32 1.442695, %v4099_v7 }
 0xf38   :  { %v4065_v41 = vpop.xlane.xlu0 %4064  ;;  %v4186_v25 = vsel %vm1243_vm5, %v9166_v53, 0.0  ;;  %v4074_v61 = vpop.xlane.xlu1 %4073 }
 0xf39   :  { %7632 = vpow2.f32 %v4138_v39  ;;  %v4097_v13 = vsub.f32 %v9064_v54, %v4065_v41  ;;  %4187 = vadd.xlane.f32.xlu1 %v4186_v25  ;;  %v9173_v36 = vpop.eup %7622  ;;  %v4100_v16 = vsub.f32 %v9066_v57, %v4074_v61  ;;  %4184 = vadd.xlane.f32.xlu0 %v4183_v43 }
 0xf3a   :  { %7634 = vpow2.f32 %v4144_v19  ;;  %v4195_v20 = vsel %vm1243_vm5, %v9173_v36, 0.0 }
 0xf3b   :  { %v9176_v18 = vpop.eup %7624  ;;  %v4140_v37 = vmul.f32 1.442695, %v4097_v13  ;;  %v4146_v14 = vmul.f32 1.442695, %v4100_v16 }
 0xf3c   :  { %v4068_v58 = vpop.xlane.xlu0 %4067  ;;  %v4189_v6 = vsel %vm1243_vm5, %v9176_v18, 0.0  ;;  %v9183_v3 = vpop.eup %7626 }
 0xf3d   :  { %7636 = vpow2.f32 %v4140_v37  ;;  %v4098_v54 = vsub.f32 %v9072_v27, %v4068_v58  ;;  %4190 = vadd.xlane.f32.xlu1 %v4189_v6  ;;  %4196 = vadd.xlane.f32.xlu0 %v4195_v20  ;;  %v4198_v10 = vsel %vm1243_vm5, %v9183_v3, 0.0  ;;  %v9217_v22 = vpop.permute.xlu1 %4711  ;;  %v7426_v58 = vunpack.i.h.bf16 %v9090_v30 }
 0xf3e   :  { %7638 = vpow2.f32 %v4146_v14  ;;  %v7425_v6 = vunpack.i.l.bf16 %v9090_v30 }
 0xf3f   :  { %v9185_v57 = vpop.eup %7628  ;;  %v4142_v62 = vmul.f32 1.442695, %v4098_v54 }
 0xf40   :  { %v4192_v49 = vsel %vm1243_vm5, %v9185_v57, 0.0  ;;  %v9191_v27 = vpop.eup %7630  ;;  %v9230_v61 = vpop.permute.xlu0 %7438 }
 0xf41   :  { %7640 = vpow2.f32 %v4142_v62  ;;  %4193 = vadd.xlane.f32.xlu1 %v4192_v49  ;;  %4199 = vadd.xlane.f32.xlu0 %v4198_v10  ;;  %v4201_v50 = vsel %vm1243_vm5, %v9191_v27, 0.0  ;;  %v9219_v0 = vpop.permute.xlu1 %4809  ;;  %v7431_v62 = vunpack.i.h.bf16 %v9092_v52  ;;  %v7430_v49 = vunpack.i.l.bf16 %v9092_v52 }
 0xf42   :  { %v7214_v10 = vpack.c.bf16 %v7426_v58, %v7425_v6 }
 0xf43   :  { %v9193_v60 = vpop.eup %7632 }
 0xf44   :  { %v4204_v23 = vsel %vm1243_vm5, %v9193_v60, 0.0  ;;  %v9199_v44 = vpop.eup %7634 }
 0xf45   :  { %4205 = vadd.xlane.f32.xlu1 %v4204_v23  ;;  %4202 = vadd.xlane.f32.xlu0 %v4201_v50  ;;  %v4213_v4 = vsel %vm1243_vm5, %v9199_v44, 0.0  ;;  %v9221_v7 = vpop.permute.xlu1 %7443 }
 0xf47   :  { %v9201_v59 = vpop.eup %7636 }
 0xf48   :  { %v4207_v40 = vsel %vm1243_vm5, %v9201_v59, 0.0  ;;  %v9207_v46 = vpop.eup %7638 }
 0xf49   :  { %4208 = vadd.xlane.f32.xlu1 %v4207_v40  ;;  %4214 = vadd.xlane.f32.xlu0 %v4213_v4  ;;  %v4216_v12 = vsel %vm1243_vm5, %v9207_v46, 0.0  ;;  %v7217_v4 = vpack.c.bf16 %v7431_v62, %v7430_v49 }
 0xf4b   :  { %v9209_v31 = vpop.eup %7640 }
 0xf4c   :  { %v4210_v29 = vsel %vm1243_vm5, %v9209_v31, 0.0 }
 0xf4d   :  { %4211 = vadd.xlane.f32.xlu1 %v4210_v29  ;;  %4217 = vadd.xlane.f32.xlu0 %v4216_v12 }
 0xf5e   :  { %5005 = vrot.lane.b32.xlu1 %v8806_v28, %s7738_s0 }
 0xf75   :  { %v4077_v39 = vpop.xlane.xlu1 %4076 }
 0xf76   :  { %v4101_v19 = vsub.f32 %v9084_v8, %v4077_v39 }
 0xf78   :  { %v4148_v41 = vmul.f32 1.442695, %v4101_v19 }
 0xf79   :  { %v9232_v43 = vpop.permute.xlu1 %7448 }
 0xf7a   :  { %7642 = vpow2.f32 %v4148_v41  ;;  %v7441_v41 = vunpack.i.h.bf16 %v9230_v61 }
 0xf84   :  { %v9224_v25 = vpop.eup %7642 }
 0xf85   :  { %v4219_v13 = vsel %vm1243_vm5, %v9224_v25, 0.0 }
 0xf86   :  { %4220 = vadd.xlane.f32.xlu0 %v4219_v13  ;;  %v7440_v13 = vunpack.i.l.bf16 %v9230_v61 }
 0xf9c   :  { %4907 = vrot.lane.b32.xlu0 %v8806_v28, %s7739_s29 }
 0xfa9   :  { %v4152_v16 = vpop.xlane.xlu0 %4151 }
 0xfaa   :  { %7644 = vrcp.f32 %v4152_v16 }
 0xfad   :  { %v4161_v37 = vpop.xlane.xlu1 %4160 }
 0xfae   :  { %7646 = vrcp.f32 %v4161_v37  ;;  %v4155_v8 = vpop.xlane.xlu0 %4154 }
 0xfaf   :  { %7648 = vrcp.f32 %v4155_v8  ;;  %v7436_v8 = vunpack.i.h.bf16 %v9098_v2 }
 0xfb1   :  { %v4164_v14 = vpop.xlane.xlu1 %4163 }
 0xfb2   :  { %7650 = vrcp.f32 %v4164_v14  ;;  %v7435_v14 = vunpack.i.l.bf16 %v9098_v2 }
 0xfb4   :  { %v7645_v54 = vpop.eup %7644 }
 0xfb5   :  { %v4246_v20 = vmul.f32 %v7645_v54, %v9106_v26  ;;  %v4167_v28 = vpop.xlane.xlu1 %4166  ;;  %v7220_v54 = vpack.c.bf16 %v7436_v8, %v7435_v14 }
 0xfb6   :  { %7652 = vrcp.f32 %v4167_v28  ;;  %v4158_v23 = vpop.xlane.xlu0 %4157 }
 0xfb7   :  { %7654 = vrcp.f32 %v4158_v23  ;;  %6873 = vmatmul.mubr.msk.f32.vlgmr.msra.gmra.mrb[86].mxu0 %vm1243_vm5, %v4246_v20 }
 0xfb8   :  { %v7647_v50 = vpop.eup %7646  ;;  %7215 = vmatpush3.bf16.msra.mxu0 %v7214_v10  ;;  %6875 = vmatprep.mubr.msk.f32.mxu0 %vm7730_vm2, %v7731_v1 }
 0xfb9   :  { %v7649_v30 = vpop.eup %7648  ;;  %v4249_v40 = vmul.f32 %v7647_v50, %v9112_v17  ;;  %v4179_v26 = vpop.xlane.xlu1 %4178  ;;  %6900 = vmatprep.subr.mxu0 %v7731_v1  ;;  %v7446_v50 = vunpack.i.h.bf16 %v9221_v7 }
 0xfba   :  { %7656 = vrcp.f32 %v4179_v26  ;;  %v4170_v52 = vpop.xlane.xlu0 %4169  ;;  %v4247_v29 = vmul.f32 %v7649_v30, %v9114_v9 }
 0xfbb   :  { %7658 = vrcp.f32 %v4170_v52  ;;  %6888 = vmatmul.mubr.msk.f32.vlgmr.msra.gmra.mrb[92].mxu1 %vm1243_vm5, %v4249_v40 }
 0xfbc   :  { %v7651_v12 = vpop.eup %7650  ;;  %6876 = vmatmul.mubr.msk.f32.gmra.mrb[88].mxu0 %vm1243_vm5, %v4247_v29  ;;  %7218 = vmatpush3.bf16.msra.mxu1 %v7217_v4  ;;  %v7451_v29 = vunpack.i.h.bf16 %v9232_v43 }
 0xfbd   :  { %6901 = vmatpush3.msra.mxu0 %v9094_v33  ;;  %v4182_v39 = vpop.xlane.xlu1 %4181  ;;  %6890 = vmatprep.mubr.msk.f32.mxu1 %vm7730_vm2, %v7731_v1  ;;  %v4250_v17 = vmul.f32 %v7651_v12, %v9122_v63 }
 0xfbe   :  { %7660 = vrcp.f32 %v4182_v39  ;;  %v4173_v19 = vpop.xlane.xlu0 %4172  ;;  %6915 = vmatprep.subr.mxu1 %v7731_v1  ;;  %6878 = vmatprep.mubr.msk.f32.mxu0 %vm7730_vm2, %v7731_v1 }
 0xfbf   :  { %7662 = vrcp.f32 %v4173_v19  ;;  %6891 = vmatmul.mubr.msk.f32.gmra.mrb[94].mxu1 %vm1243_vm5, %v4250_v17  ;;  %7219 = vmatprep.subr.bf16.mxu0 %v7726_v55 }
 0xfc0   :  { %v7653_v9 = vpop.eup %7652  ;;  %6916 = vmatpush3.msra.mxu1 %v9096_v5  ;;  %6893 = vmatprep.mubr.msk.f32.mxu1 %vm7730_vm2, %v7731_v1 }
 0xfc1   :  { %v7655_v33 = vpop.eup %7654  ;;  %v4251_v63 = vmul.f32 %v7653_v9, %v9128_v56  ;;  %7222 = vmatprep.subr.bf16.mxu1 %v7726_v55 }
 0xfc2   :  { %v4176_v16 = vpop.xlane.xlu0 %4175  ;;  %v4248_v37 = vmul.f32 %v7655_v33, %v9130_v35  ;;  %v7223_v35 = vpack.c.bf16 %v7441_v41, %v7440_v13 }
 0xfc3   :  { %7664 = vrcp.f32 %v4176_v16  ;;  %6894 = vmatmul.mubr.msk.f32.gmra.mrb[96].mxu1 %vm1243_vm5, %v4251_v63 }
 0xfc4   :  { %v7657_v5 = vpop.eup %7656  ;;  %6879 = vmatmul.mubr.msk.f32.gmra.mrb[90].mxu0 %vm1243_vm5, %v4248_v37  ;;  %6917 = vmatprep.mubr.msk.f32.mxu1 %vm7730_vm2, %v7731_v1 }
 0xfc5   :  { %v7659_v56 = vpop.eup %7658  ;;  %v4255_v58 = vmul.f32 %v7657_v5, %v9138_v32  ;;  %6902 = vmatprep.mubr.msk.f32.mxu0 %vm7730_vm2, %v7731_v1 }
 0xfc6   :  { %v4188_v61 = vpop.xlane.xlu1 %4187  ;;  %v4252_v6 = vmul.f32 %v7659_v56, %v9140_v24  ;;  %v4185_v2 = vpop.xlane.xlu0 %4184 }
 0xfc7   :  { %7666 = vrcp.f32 %v4188_v61  ;;  %6918 = vmatmul.mubr.msk.f32.vlgmr.msra.gmra.mrb[98].mxu1 %vm1243_vm5, %v4255_v58 }
 0xfc8   :  { %7668 = vrcp.f32 %v4185_v2  ;;  %v7661_v20 = vpop.eup %7660  ;;  %6903 = vmatmul.mubr.msk.f32.vlgmr.msra.gmra.mrb[92].mxu0 %vm1243_vm5, %v4252_v6  ;;  %7224 = vmatpush3.bf16.msra.mxu1 %v7223_v35 }
 0xfc9   :  { %v7663_v28 = vpop.eup %7662  ;;  %7221 = vmatpush3.bf16.msra.mxu0 %v7220_v54  ;;  %6905 = vmatprep.mubr.msk.f32.mxu0 %vm7730_vm2, %v7731_v1  ;;  %v4256_v62 = vmul.f32 %v7661_v20, %v9148_v34 }
 0xfca   :  { %v4191_v32 = vpop.xlane.xlu1 %4190  ;;  %v4197_v24 = vpop.xlane.xlu0 %4196  ;;  %6920 = vmatprep.mubr.msk.f32.mxu1 %vm7730_vm2, %v7731_v1  ;;  %6930 = vmatprep.subr.mxu0 %v7731_v1  ;;  %v4253_v49 = vmul.f32 %v7663_v28, %v9150_v51 }
 0xfcb   :  { %7670 = vrcp.f32 %v4191_v32  ;;  %6945 = vmatprep.subr.mxu1 %v7731_v1  ;;  %6921 = vmatmul.mubr.msk.f32.gmra.mrb[100].mxu1 %vm1243_vm5, %v4256_v62  ;;  %v5964_v62 = vld [vmem:[%s9572_s3 + $0xd0] sm:$0xff] }
 0xfcc   :  { %7672 = vrcp.f32 %v4197_v24  ;;  %6906 = vmatmul.mubr.msk.f32.gmra.mrb[94].mxu0 %vm1243_vm5, %v4253_v49  ;;  %6946 = vmatpush3.msra.mxu1 %v9219_v0  ;;  %v7445_v0 = vunpack.i.l.bf16 %v9221_v7  ;;  %v7450_v7 = vunpack.i.l.bf16 %v9232_v43  ;;  %v5965_v24 = vld [vmem:[%s9572_s3 + $0xd8] sm:$0xff] }
 0xfcd   :  { %v7665_v10 = vpop.eup %7664  ;;  %6931 = vmatpush3.msra.mxu0 %v9217_v22  ;;  %6908 = vmatprep.mubr.msk.f32.mxu0 %vm7730_vm2, %v7731_v1 }
 0xfce   :  { %v4194_v34 = vpop.xlane.xlu1 %4193  ;;  %v4200_v23 = vpop.xlane.xlu0 %4199  ;;  %v4254_v51 = vmul.f32 %v7665_v10, %v9158_v42  ;;  %6923 = vmatprep.mubr.msk.f32.mxu1 %vm7730_vm2, %v7731_v1  ;;  %7225 = vmatprep.subr.bf16.mxu0 %v7726_v55  ;;  %v7226_v52 = vpack.c.bf16 %v7446_v50, %v7445_v0  ;;  %v7229_v43 = vpack.c.bf16 %v7451_v29, %v7450_v7 }
 0xfcf   :  { %7674 = vrcp.f32 %v4194_v34  ;;  %7228 = vmatprep.subr.bf16.mxu1 %v7726_v55  ;;  %v7235_v10 = vpack.c.bf16 %v5965_v24, %v5964_v62 }
 0xfd0   :  { %7676 = vrcp.f32 %v4200_v23  ;;  %6909 = vmatmul.mubr.msk.f32.gmra.mrb[96].mxu0 %vm1243_vm5, %v4254_v51 }
 0xfd1   :  { %v7667_v22 = vpop.eup %7666  ;;  %6932 = vmatprep.mubr.msk.f32.mxu0 %vm7730_vm2, %v7731_v1 }
 0xfd2   :  { %v7669_v30 = vpop.eup %7668  ;;  %v4258_v40 = vmul.f32 %v7667_v22, %v9166_v53  ;;  %v4206_v26 = vpop.xlane.xlu1 %4205 }
 0xfd3   :  { %v4203_v42 = vpop.xlane.xlu0 %4202  ;;  %v4257_v4 = vmul.f32 %v7669_v30, %v9163_v48 }
 0xfd4   :  { %7678 = vrcp.f32 %v4203_v42  ;;  %6933 = vmatmul.mubr.msk.f32.vlgmr.msra.gmra.mrb[98].mxu0 %vm1243_vm5, %v4258_v40 }
 0xfd5   :  { %v7671_v55 = vpop.eup %7670  ;;  %6924 = vmatmul.mubr.msk.f32.gmra.mrb[102].mxu1 %vm1243_vm5, %v4257_v4  ;;  %7227 = vmatpush3.bf16.msra.mxu0 %v7226_v52 }
 0xfd6   :  { %v7673_v12 = vpop.eup %7672  ;;  %v4209_v53 = vpop.xlane.xlu1 %4208  ;;  %6935 = vmatprep.mubr.msk.f32.mxu0 %vm7730_vm2, %v7731_v1  ;;  %v4259_v39 = vmul.f32 %v7671_v55, %v9176_v18  ;;  %6947 = vmatprep.mubr.msk.f32.mxu1 %vm7730_vm2, %v7731_v1 }
 0xfd7   :  { %v4261_v48 = vmul.f32 %v7673_v12, %v9173_v36  ;;  %v4215_v17 = vpop.xlane.xlu0 %4214  ;;  %6960 = vmatprep.subr.mxu0 %v7731_v1 }
 0xfd8   :  { %7680 = vrcp.f32 %v4215_v17  ;;  %6936 = vmatmul.mubr.msk.f32.gmra.mrb[100].mxu0 %vm1243_vm5, %v4259_v39 }
 0xfd9   :  { %v7675_v19 = vpop.eup %7674  ;;  %6948 = vmatmul.mubr.msk.f32.vlgmr.msra.gmra.mrb[104].mxu1 %vm1243_vm5, %v4261_v48  ;;  %6938 = vmatprep.mubr.msk.f32.mxu0 %vm7730_vm2, %v7731_v1 }
 0xfda   :  { %v7677_v9 = vpop.eup %7676  ;;  %7230 = vmatpush3.bf16.msra.mxu1 %v7229_v43  ;;  %v4212_v33 = vpop.xlane.xlu1 %4211  ;;  %v4260_v36 = vmul.f32 %v7675_v19, %v9185_v57  ;;  %6950 = vmatprep.mubr.msk.f32.mxu1 %vm7730_vm2, %v7731_v1 }
 0xfdb   :  { %v4218_v18 = vpop.xlane.xlu0 %4217  ;;  %v4262_v63 = vmul.f32 %v7677_v9, %v9183_v3  ;;  %6975 = vmatprep.subr.mxu1 %v7731_v1 }
 0xfdc   :  { %7682 = vrcp.f32 %v4218_v18  ;;  %6939 = vmatmul.mubr.msk.f32.gmra.mrb[102].mxu0 %vm1243_vm5, %v4260_v36 }
 0xfdd   :  { %6951 = vmatmul.mubr.msk.f32.gmra.mrb[106].mxu1 %vm1243_vm5, %v4262_v63  ;;  %6962 = vmatprep.mubr.msk.f32.mxu0 %vm7730_vm2, %v7731_v1  ;;  %7684 = vrcp.f32 %v4206_v26 }
 0xfde   :  { %v7679_v41 = vpop.eup %7678  ;;  %v5006_v13 = vpop.permute.xlu1 %5005  ;;  %6953 = vmatprep.mubr.msk.f32.mxu1 %vm7730_vm2, %v7731_v1  ;;  %7686 = vrcp.f32 %v4209_v53 }
 0xfdf   :  { %6976 = vmatpush3.msra.mxu1 %v5006_v13  ;;  %v4263_v57 = vmul.f32 %v7679_v41, %v9191_v27  ;;  %7688 = vrcp.f32 %v4212_v33 }
 0xfe1   :  { %6954 = vmatmul.mubr.msk.f32.gmra.mrb[108].mxu1 %vm1243_vm5, %v4263_v57 }
 0xfe2   :  { %v7681_v3 = vpop.eup %7680  ;;  %6977 = vmatprep.mubr.msk.f32.mxu1 %vm7730_vm2, %v7731_v1 }
 0xfe3   :  { %v4267_v16 = vmul.f32 %v7681_v3, %v9199_v44 }
 0xfe5   :  { %6978 = vmatmul.mubr.msk.f32.vlgmr.msra.gmra.mrb[110].mxu1 %vm1243_vm5, %v4267_v16 }
 0xfe6   :  { %v7683_v37 = vpop.eup %7682  ;;  %6980 = vmatprep.mubr.msk.f32.mxu1 %vm7730_vm2, %v7731_v1 }
 0xfe7   :  { %v4268_v8 = vmul.f32 %v7683_v37, %v9207_v46  ;;  %v7685_v14 = vpop.eup %7684 }
 0xfe8   :  { %v4264_v44 = vmul.f32 %v7685_v14, %v9193_v60  ;;  %v7687_v56 = vpop.eup %7686 }
 0xfe9   :  { %6981 = vmatmul.mubr.msk.f32.gmra.mrb[112].mxu1 %vm1243_vm5, %v4268_v8  ;;  %v4265_v46 = vmul.f32 %v7687_v56, %v9201_v59  ;;  %v7689_v58 = vpop.eup %7688  ;;  %v5962_v59 = vld [vmem:[%s9572_s3 + $0xc0] sm:$0xff] }
 0xfea   :  { %6983 = vmatprep.mubr.msk.f32.mxu1 %vm7730_vm2, %v7731_v1  ;;  %v4266_v35 = vmul.f32 %v7689_v58, %v9209_v31 }
0x1013   :  { %v4221_v27 = vpop.xlane.xlu0 %4220 }
0x1014   :  { %7690 = vrcp.f32 %v4221_v27 }
0x1017   :  { %v4908_v5 = vpop.permute.xlu0 %4907 }
0x1018   :  { %6961 = vmatpush3.msra.mxu0 %v4908_v5 }
0x1019   :  { %6963 = vmatmul.mubr.msk.f32.vlgmr.msra.gmra.mrb[104].mxu0 %vm1243_vm5, %v4264_v44 }
0x101a   :  { %6965 = vmatprep.mubr.msk.f32.mxu0 %vm7730_vm2, %v7731_v1 }
0x101d   :  { %6966 = vmatmul.mubr.msk.f32.gmra.mrb[106].mxu0 %vm1243_vm5, %v4265_v46 }
0x101e   :  { %v7691_v61 = vpop.eup %7690  ;;  %6968 = vmatprep.mubr.msk.f32.mxu0 %vm7730_vm2, %v7731_v1  ;;  %v5963_v1 = vld [vmem:[%s9572_s3 + $0xc8] sm:$0xff] }
0x101f   :  { %v4269_v60 = vmul.f32 %v7691_v61, %v9224_v25  ;;  %v7231_v25 = vpack.c.bf16 %v5963_v1, %v5962_v59 }
0x1021   :  { %6969 = vmatmul.mubr.msk.f32.gmra.mrb[108].mxu0 %vm1243_vm5, %v4266_v35  ;;  %6984 = vmatmul.mubr.msk.f32.gmra.mrb[114].mxu1 %vm1243_vm5, %v4269_v60 }
0x1022   :  { %7232 = vmatprep.subr.bf16.mxu0 %v7231_v25 }
0x1023   :  { %7234 = vmatpush3.bf16.msra.mxu0 %v7231_v25 }
0x1024   :  { %7236 = vmatprep.subr.bf16.mxu0 %v7235_v10 }
0x1027   :  { %7238 = vmatpush3.bf16.msra.mxu0 %v7235_v10 }
0x108a   :  { %v9352_v6 = vpop.f32.mrb[86].mxu0 }
0x108b   :  { %v6874_v2 = vpop.f32.mrb[87].mxu0 }
0x108e   :  { %v4452_v54 = vpop.f32.mrb[92].mxu1 }
0x108f   :  { %v9360_v20 = vpop.f32.mrb[88].mxu0  ;;  %v6889_v31 = vpop.f32.mrb[93].mxu1  ;;  %4665 = vrot.lane.b32.xlu0 %v4452_v54, %s7740_s10 }
0x1090   :  { %v6877_v28 = vpop.f32.mrb[89].mxu0 }
0x1092   :  { %v4457_v32 = vpop.f32.mrb[94].mxu1 }
0x1093   :  { %v6892_v49 = vpop.f32.mrb[95].mxu1  ;;  %4667 = vrot.lane.b32.xlu1 %v4457_v32, %s7740_s10 }
0x1096   :  { %v4462_v34 = vpop.f32.mrb[96].mxu1 }
0x1097   :  { %v9370_v23 = vpop.f32.mrb[90].mxu0  ;;  %v6895_v51 = vpop.f32.mrb[97].mxu1  ;;  %4669 = vrot.lane.b32.xlu0 %v4462_v34, %s7740_s10 }
0x1098   :  { %v6880_v50 = vpop.f32.mrb[91].mxu0 }
0x109a   :  { %v4648_v0 = vpop.f32.mrb[98].mxu1 }
0x109b   :  { %v4550_v22 = vpop.f32.mrb[92].mxu0  ;;  %v6919_v30 = vpop.f32.mrb[99].mxu1 }
0x109c   :  { %4677 = vrot.lane.b32.xlu0 %v4550_v22, %s7741_s15  ;;  %v6904_v40 = vpop.f32.mrb[93].mxu0 }
0x109e   :  { %v4653_v26 = vpop.f32.mrb[100].mxu1 }
0x109f   :  { %v4555_v42 = vpop.f32.mrb[94].mxu0  ;;  %v6922_v4 = vpop.f32.mrb[101].mxu1 }
0x10a0   :  { %4689 = vrot.lane.b32.xlu0 %v4648_v0, %s7742_s16  ;;  %4679 = vrot.lane.b32.xlu1 %v4555_v42, %s7741_s15  ;;  %v6907_v52 = vpop.f32.mrb[95].mxu0 }
0x10a3   :  { %v4560_v29 = vpop.f32.mrb[96].mxu0 }
0x10a4   :  { %4691 = vrot.lane.b32.xlu1 %v4653_v26, %s7742_s16  ;;  %v6910_v7 = vpop.f32.mrb[97].mxu0 }
0x10a7   :  { %v4791_v12 = vpop.f32.mrb[98].mxu0 }
0x10a8   :  { %v4658_v55 = vpop.f32.mrb[102].mxu1  ;;  %4681 = vrot.lane.b32.xlu1 %v4560_v29, %s7741_s15  ;;  %v6934_v39 = vpop.f32.mrb[99].mxu0 }
0x10a9   :  { %v6925_v53 = vpop.f32.mrb[103].mxu1 }
0x10ab   :  { %v9378_v48 = vpop.f32.mrb[100].mxu0 }
0x10ac   :  { %v4889_v17 = vpop.f32.mrb[104].mxu1  ;;  %4693 = vrot.lane.b32.xlu1 %v4658_v55, %s7742_s16  ;;  %v6937_v19 = vpop.f32.mrb[101].mxu0 }
0x10ad   :  { %v6949_v43 = vpop.f32.mrb[105].mxu1  ;;  %5102 = vrot.lane.b32.xlu0 %v4889_v17, %s7740_s10 }
0x10af   :  { %v9382_v9 = vpop.f32.mrb[102].mxu0 }
0x10b0   :  { %v4894_v33 = vpop.f32.mrb[106].mxu1  ;;  %v6940_v18 = vpop.f32.mrb[103].mxu0 }
0x10b1   :  { %v6952_v36 = vpop.f32.mrb[107].mxu1  ;;  %5104 = vrot.lane.b32.xlu0 %v4894_v33, %s7740_s10 }
0x10b4   :  { %v4899_v63 = vpop.f32.mrb[108].mxu1 }
0x10b5   :  { %v6955_v41 = vpop.f32.mrb[109].mxu1  ;;  %5106 = vrot.lane.b32.xlu1 %v4899_v63, %s7740_s10 }
0x10b8   :  { %v5085_v13 = vpop.f32.mrb[110].mxu1 }
0x10b9   :  { %v6979_v57 = vpop.f32.mrb[111].mxu1  ;;  %5126 = vrot.lane.b32.xlu1 %v5085_v13, %s7742_s16 }
0x10bc   :  { %v5090_v3 = vpop.f32.mrb[112].mxu1 }
0x10bd   :  { %v6982_v16 = vpop.f32.mrb[113].mxu1 }
0x10ec   :  { %v4987_v37 = vpop.f32.mrb[104].mxu0 }
0x10ed   :  { %5114 = vrot.lane.b32.xlu0 %v4987_v37, %s7741_s15  ;;  %v6964_v8 = vpop.f32.mrb[105].mxu0 }
0x10f0   :  { %v4992_v27 = vpop.f32.mrb[106].mxu0 }
0x10f1   :  { %5116 = vrot.lane.b32.xlu0 %v4992_v27, %s7741_s15  ;;  %v6967_v14 = vpop.f32.mrb[107].mxu0 }
0x10f4   :  { %v4997_v44 = vpop.f32.mrb[108].mxu0  ;;  %v5095_v5 = vpop.f32.mrb[114].mxu1 }
0x10f5   :  { %v6985_v56 = vpop.f32.mrb[115].mxu1  ;;  %5128 = vrot.lane.b32.xlu0 %v5090_v3, %s7742_s16  ;;  %5118 = vrot.lane.b32.xlu1 %v4997_v44, %s7741_s15  ;;  %v6970_v46 = vpop.f32.mrb[109].mxu0 }
0x10f9   :  { %5130 = vrot.lane.b32.xlu1 %v5095_v5, %s7742_s16 }
0x1101   :  { %v4666_v58 = vpop.permute.xlu0 %4665 }
0x1102   :  { %v4698_v2 = vsel %vm401_vm3, %v9352_v6, %v4666_v58 }
0x1105   :  { %v4668_v35 = vpop.permute.xlu1 %4667 }
0x1106   :  { %v4699_v25 = vsel %vm401_vm3, %v9360_v20, %v4668_v35 }
0x1109   :  { %v4670_v61 = vpop.permute.xlu0 %4669 }
0x110a   :  { %v4700_v6 = vsel %vm401_vm3, %v9370_v23, %v4670_v61 }
0x110e   :  { %v4678_v60 = vpop.permute.xlu0 %4677 }
0x110f   :  { %v4701_v54 = vsel %vm1939_vm6, %v4698_v2, %v4678_v60 }
0x1112   :  { %v4690_v59 = vpop.permute.xlu0 %4689  ;;  %v4680_v1 = vpop.permute.xlu1 %4679 }
0x1113   :  { %v4704_v31 = vsel %vm1243_vm5, %v4701_v54, %v4690_v59  ;;  %v4702_v28 = vsel %vm1939_vm6, %v4699_v25, %v4680_v1  ;;  %v5966_v1 = vld [vmem:[%s9572_s3 + $0xe0] sm:$0xff] }
0x1114   :  { %6994 = vmatprep.mubr.msk.f32.mxu0 %vm175_vm1, %v4704_v31  ;;  %v5967_v31 = vld [vmem:[%s9572_s3 + $0xe8] sm:$0xff] }
0x1115   :  { %v7239_v25 = vpack.c.bf16 %v5967_v31, %v5966_v1 }
0x1116   :  { %v4692_v32 = vpop.permute.xlu1 %4691 }
0x1117   :  { %v4705_v62 = vsel %vm1243_vm5, %v4702_v28, %v4692_v32  ;;  %7240 = vmatprep.subr.bf16.mxu1 %v7239_v25  ;;  %v5968_v28 = vld [vmem:[%s9572_s3 + $0xf0] sm:$0xff]  ;;  %v5969_v32 = vld [vmem:[%s9572_s3 + $0xf8] sm:$0xff] }
0x1118   :  { %6995 = vmatmul.mubr.msk.f32.vlgmr.msra.gmra.mrb[110].mxu0 %vm175_vm1, %v4705_v62  ;;  %7242 = vmatpush3.bf16.msra.mxu1 %v7239_v25  ;;  %v7243_v62 = vpack.c.bf16 %v5969_v32, %v5968_v28 }
0x111a   :  { %v4682_v24 = vpop.permute.xlu1 %4681  ;;  %7244 = vmatprep.subr.bf16.mxu1 %v7243_v62 }
0x111b   :  { %v4703_v49 = vsel %vm1939_vm6, %v4700_v6, %v4682_v24 }
0x111c   :  { %7246 = vmatpush3.bf16.msra.mxu1 %v7243_v62 }
0x111e   :  { %v4694_v10 = vpop.permute.xlu1 %4693 }
0x111f   :  { %v4706_v34 = vsel %vm1243_vm5, %v4703_v49, %v4694_v10  ;;  %v5103_v51 = vpop.permute.xlu0 %5102 }
0x1120   :  { %6997 = vmatprep.mubr.msk.f32.mxu0 %vm175_vm1, %v4706_v34  ;;  %v5135_v0 = vsel %vm401_vm3, %v4791_v12, %v5103_v51 }
0x1123   :  { %v5105_v50 = vpop.permute.xlu0 %5104 }
0x1124   :  { %v5136_v42 = vsel %vm401_vm3, %v9378_v48, %v5105_v50  ;;  %v6073_v48 = vld [vmem:[%s9571_s4 + $0xb] ss:$0 sm:$0xff] }
0x1127   :  { %v5107_v20 = vpop.permute.xlu1 %5106 }
0x1128   :  { %v5137_v55 = vsel %vm401_vm3, %v9382_v9, %v5107_v20 }
0x112b   :  { %v5127_v30 = vpop.permute.xlu1 %5126 }
0x115f   :  { %v5115_v22 = vpop.permute.xlu0 %5114 }
0x1160   :  { %v5138_v40 = vsel %vm1939_vm6, %v5135_v0, %v5115_v22 }
0x1161   :  { %v5141_v26 = vsel %vm1243_vm5, %v5138_v40, %v5127_v30 }
0x1162   :  { %6998 = vmatmul.mubr.msk.f32.gmra.mrb[112].mxu0 %vm175_vm1, %v5141_v26 }
0x1163   :  { %v5117_v23 = vpop.permute.xlu0 %5116 }
0x1164   :  { %v5139_v4 = vsel %vm1939_vm6, %v5136_v42, %v5117_v23 }
0x1167   :  { %v5129_v52 = vpop.permute.xlu0 %5128  ;;  %v5119_v29 = vpop.permute.xlu1 %5118 }
0x1168   :  { %v5142_v7 = vsel %vm1243_vm5, %v5139_v4, %v5129_v52  ;;  %v5140_v12 = vsel %vm1939_vm6, %v5137_v55, %v5119_v29 }
0x1169   :  { %7000 = vmatprep.mubr.msk.f32.mxu0 %vm175_vm1, %v5142_v7 }
0x116b   :  { %v5131_v53 = vpop.permute.xlu1 %5130 }
0x116c   :  { %v5143_v39 = vsel %vm1243_vm5, %v5140_v12, %v5131_v53 }
0x116d   :  { %7001 = vmatmul.mubr.msk.f32.gmra.mrb[114].mxu0 %vm175_vm1, %v5143_v39 }
0x11eb   :  { %v6996_v17 = vpop.f32.mrb[110].mxu0 }
0x11ec   :  { %v5258_v43 = vadd.f32 %v6996_v17, %v8690_v47  ;;  %v5228_v19 = vpop.f32.mrb[111].mxu0 }
0x11ed   :  { %v5257_v33 = vadd.f32 %v5228_v19, %v8692_v45 }
0x11ee   :  { %v9426_v36 = vadd.f32 %v6073_v48, %v5258_v43 }
0x11ef   :  { %v5267_v9 = vadd.f32 %v6073_v48, %v5257_v33  ;;  %v6074_v33 = vld [vmem:[%s9571_s4 + $0xc] ss:$0 sm:$0xff] }
0x11f0   :  { %v5276_v18 = vsel %vm175_vm1, %v9426_v36, 0.0 }
0x11f1   :  { %5277 = vadd.xlane.f32.xlu1 %v5276_v18  ;;  %v5273_v63 = vsel %vm175_vm1, %v5267_v9, 0.0 }
0x11f2   :  { %5274 = vadd.xlane.f32.xlu0 %v5273_v63 }
0x1235   :  { %v6999_v41 = vpop.f32.mrb[112].mxu0 }
0x1236   :  { %v5260_v13 = vadd.f32 %v6999_v41, %v8700_v15  ;;  %v5238_v57 = vpop.f32.mrb[113].mxu0  ;;  %v6075_v41 = vld [vmem:[%s9571_s4 + $0xd] ss:$0 sm:$0xff] }
0x1237   :  { %v5259_v3 = vadd.f32 %v5238_v57, %v8702_v38 }
0x1238   :  { %v5270_v47 = vadd.f32 %v6073_v48, %v5260_v13 }
0x1239   :  { %v9433_v16 = vadd.f32 %v6073_v48, %v5259_v3 }
0x123a   :  { %v5282_v45 = vsel %vm175_vm1, %v5270_v47, 0.0 }
0x123b   :  { %5283 = vadd.xlane.f32.xlu0 %v5282_v45  ;;  %v5279_v37 = vsel %vm175_vm1, %v9433_v16, 0.0 }
0x123f   :  { %5280 = vadd.xlane.f32.xlu0 %v5279_v37 }
0x1240   :  { %v7002_v8 = vpop.f32.mrb[114].mxu0 }
0x1241   :  { %v5262_v27 = vadd.f32 %v7002_v8, %v8710_v11  ;;  %v5248_v14 = vpop.f32.mrb[115].mxu0 }
0x1242   :  { %v5261_v44 = vadd.f32 %v5248_v14, %v8712_v21 }
0x1243   :  { %v9440_v15 = vadd.f32 %v6073_v48, %v5262_v27 }
0x1244   :  { %v9442_v5 = vadd.f32 %v6073_v48, %v5261_v44 }
0x1245   :  { %v5288_v38 = vsel %vm175_vm1, %v9440_v15, 0.0 }
0x1246   :  { %5289 = vadd.xlane.f32.xlu1 %v5288_v38  ;;  %v5285_v56 = vsel %vm175_vm1, %v9442_v5, 0.0 }
0x1247   :  { %5286 = vadd.xlane.f32.xlu0 %v5285_v56 }
0x127e   :  { %v5278_v46 = vpop.xlane.xlu1 %5277 }
0x127f   :  { %v5292_v58 = vmul.f32 0.03125, %v5278_v46  ;;  %v5275_v61 = vpop.xlane.xlu0 %5274 }
0x1280   :  { %v5291_v35 = vmul.f32 0.03125, %v5275_v61 }
0x1281   :  { %v5298_v11 = vsub.f32 %v9426_v36, %v5292_v58 }
0x1282   :  { %v5297_v60 = vsub.f32 %v5267_v9, %v5291_v35 }
0x1283   :  { %v5304_v21 = vmul.f32 %v5298_v11, %v5298_v11 }
0x1284   :  { %v5303_v2 = vmul.f32 %v5297_v60, %v5297_v60 }
0x1285   :  { %v5312_v54 = vsel %vm175_vm1, %v5304_v21, 0.0 }
0x1286   :  { %5313 = vadd.xlane.f32.xlu1 %v5312_v54  ;;  %v5309_v59 = vsel %vm175_vm1, %v5303_v2, 0.0 }
0x1287   :  { %5310 = vadd.xlane.f32.xlu0 %v5309_v59 }
0x12c8   :  { %v5284_v24 = vpop.xlane.xlu0 %5283 }
0x12c9   :  { %v5294_v6 = vmul.f32 0.03125, %v5284_v24 }
0x12cb   :  { %v5300_v49 = vsub.f32 %v5270_v47, %v5294_v6 }
0x12cc   :  { %v5281_v10 = vpop.xlane.xlu0 %5280 }
0x12cd   :  { %v5293_v34 = vmul.f32 0.03125, %v5281_v10  ;;  %v5306_v51 = vmul.f32 %v5300_v49, %v5300_v49 }
0x12cf   :  { %v5299_v20 = vsub.f32 %v9433_v16, %v5293_v34  ;;  %v5318_v50 = vsel %vm175_vm1, %v5306_v51, 0.0  ;;  %v5971_v51 = vld [vmem:[%s9572_s3 + $0x108] sm:$0xff] }
0x12d0   :  { %5319 = vadd.xlane.f32.xlu1 %v5318_v50  ;;  %v5972_v50 = vld [vmem:[%s9572_s3 + $0x110] sm:$0xff] }
0x12d1   :  { %v5305_v0 = vmul.f32 %v5299_v20, %v5299_v20 }
0x12d3   :  { %v5290_v22 = vpop.xlane.xlu1 %5289  ;;  %v5315_v30 = vsel %vm175_vm1, %v5305_v0, 0.0  ;;  %v5973_v0 = vld [vmem:[%s9572_s3 + $0x118] sm:$0xff] }
0x12d4   :  { %v5296_v40 = vmul.f32 0.03125, %v5290_v22  ;;  %5316 = vadd.xlane.f32.xlu0 %v5315_v30  ;;  %v5287_v26 = vpop.xlane.xlu0 %5286  ;;  %v7251_v22 = vpack.c.bf16 %v5973_v0, %v5972_v50  ;;  %v5974_v30 = vld [vmem:[%s9572_s3 + $0x120] sm:$0xff] }
0x12d5   :  { %v5295_v23 = vmul.f32 0.03125, %v5287_v26 }
0x12d6   :  { %v5302_v42 = vsub.f32 %v9440_v15, %v5296_v40  ;;  %v5975_v40 = vld [vmem:[%s9572_s3 + $0x128] sm:$0xff] }
0x12d7   :  { %v5301_v4 = vsub.f32 %v9442_v5, %v5295_v23  ;;  %v7255_v26 = vpack.c.bf16 %v5975_v40, %v5974_v30  ;;  %v5976_v23 = vld [vmem:[%s9572_s3 + $0x130] sm:$0xff] }
0x12d8   :  { %v5308_v52 = vmul.f32 %v5302_v42, %v5302_v42 }
0x12d9   :  { %v5307_v29 = vmul.f32 %v5301_v4, %v5301_v4 }
0x12da   :  { %v5324_v7 = vsel %vm175_vm1, %v5308_v52, 0.0  ;;  %v6076_v52 = vld [vmem:[%s9571_s4 + $0xe] ss:$0 sm:$0xff] }
0x12db   :  { %5325 = vadd.xlane.f32.xlu1 %v5324_v7  ;;  %v5321_v55 = vsel %vm175_vm1, %v5307_v29, 0.0 }
0x12dc   :  { %5322 = vadd.xlane.f32.xlu0 %v5321_v55 }
0x1313   :  { %v5314_v12 = vpop.xlane.xlu1 %5313 }
0x1314   :  { %v5328_v53 = vmul.f32 0.03125, %v5314_v12  ;;  %v5311_v39 = vpop.xlane.xlu0 %5310 }
0x1315   :  { %v5327_v48 = vmul.f32 0.03125, %v5311_v39 }
0x1316   :  { %v5334_v17 = vadd.f32 1e-12, %v5328_v53 }
0x1317   :  { %v5333_v43 = vadd.f32 1e-12, %v5327_v48 }
0x1318   :  { %7692 = vrsqrt.f32 %v5334_v17 }
0x1319   :  { %7694 = vrsqrt.f32 %v5333_v43 }
0x1322   :  { %v7693_v19 = vpop.eup %7692 }
0x1323   :  { %v7695_v9 = vpop.eup %7694  ;;  %v5346_v18 = vmul.f32 %v7693_v19, %v5298_v11 }
0x1324   :  { %v5345_v63 = vmul.f32 %v7695_v9, %v5297_v60 }
0x1325   :  { %v5356_v13 = vmul.f32 %v6074_v33, %v5346_v18 }
0x1326   :  { %v5355_v57 = vmul.f32 %v6074_v33, %v5345_v63 }
0x1327   :  { %v5366_v47 = vadd.f32 %v6075_v41, %v5356_v13 }
0x1328   :  { %v5365_v3 = vadd.f32 %v6075_v41, %v5355_v57 }
0x132a   :  { %7011 = vmatprep.mubr.msk.f32.mxu1 %vm175_vm1, %v5365_v3 }
0x132b   :  { %7012 = vmatmul.mubr.msk.f32.vlgmr.msra.gmra.mrb[116].mxu1 %vm175_vm1, %v5366_v47 }
0x135d   :  { %v5320_v45 = vpop.xlane.xlu1 %5319 }
0x135e   :  { %v5330_v37 = vmul.f32 0.03125, %v5320_v45 }
0x1360   :  { %v5336_v8 = vadd.f32 1e-12, %v5330_v37 }
0x1361   :  { %v5317_v27 = vpop.xlane.xlu0 %5316 }
0x1362   :  { %7696 = vrsqrt.f32 %v5336_v8  ;;  %v5329_v14 = vmul.f32 0.03125, %v5317_v27 }
0x1364   :  { %v5335_v44 = vadd.f32 1e-12, %v5329_v14 }
0x1366   :  { %7698 = vrsqrt.f32 %v5335_v44 }
0x1368   :  { %v5326_v38 = vpop.xlane.xlu1 %5325 }
0x1369   :  { %v5332_v56 = vmul.f32 0.03125, %v5326_v38  ;;  %v5323_v46 = vpop.xlane.xlu0 %5322 }
0x136a   :  { %v5331_v58 = vmul.f32 0.03125, %v5323_v46 }
0x136b   :  { %v5338_v61 = vadd.f32 1e-12, %v5332_v56 }
0x136c   :  { %v7697_v35 = vpop.eup %7696  ;;  %v5337_v11 = vadd.f32 1e-12, %v5331_v58 }
0x136d   :  { %7700 = vrsqrt.f32 %v5338_v61  ;;  %v5348_v60 = vmul.f32 %v7697_v35, %v5300_v49  ;;  %v5970_v49 = vld [vmem:[%s9572_s3 + $0x100] sm:$0xff] }
0x136e   :  { %7702 = vrsqrt.f32 %v5337_v11 }
0x136f   :  { %v5358_v54 = vmul.f32 %v6074_v33, %v5348_v60 }
0x1370   :  { %v7699_v21 = vpop.eup %7698 }
0x1371   :  { %v5347_v2 = vmul.f32 %v7699_v21, %v5299_v20  ;;  %v5368_v31 = vadd.f32 %v6075_v41, %v5358_v54  ;;  %v7247_v20 = vpack.c.bf16 %v5971_v51, %v5970_v49 }
0x1373   :  { %v5357_v59 = vmul.f32 %v6074_v33, %v5347_v2  ;;  %7248 = vmatprep.subr.bf16.mxu0 %v7247_v20 }
0x1374   :  { %7250 = vmatpush3.bf16.msra.mxu0 %v7247_v20 }
0x1375   :  { %v5367_v1 = vadd.f32 %v6075_v41, %v5357_v59  ;;  %7252 = vmatprep.subr.bf16.mxu0 %v7251_v22 }
0x1377   :  { %v7701_v25 = vpop.eup %7700  ;;  %7014 = vmatprep.mubr.msk.f32.mxu1 %vm175_vm1, %v5367_v1 }
0x1378   :  { %v7703_v28 = vpop.eup %7702  ;;  %7015 = vmatmul.mubr.msk.f32.gmra.mrb[118].mxu1 %vm175_vm1, %v5368_v31  ;;  %v5350_v32 = vmul.f32 %v7701_v25, %v5302_v42  ;;  %7254 = vmatpush3.bf16.msra.mxu0 %v7251_v22  ;;  %v5977_v42 = vld [vmem:[%s9572_s3 + $0x138] sm:$0xff] }
0x1379   :  { %v5349_v62 = vmul.f32 %v7703_v28, %v5301_v4  ;;  %7256 = vmatprep.subr.bf16.mxu0 %v7255_v26  ;;  %v7259_v4 = vpack.c.bf16 %v5977_v42, %v5976_v23 }
0x137a   :  { %v5360_v24 = vmul.f32 %v6074_v33, %v5350_v32 }
0x137b   :  { %v5359_v6 = vmul.f32 %v6074_v33, %v5349_v62 }
0x137c   :  { %v5370_v34 = vadd.f32 %v6075_v41, %v5360_v24  ;;  %7258 = vmatpush3.bf16.msra.mxu0 %v7255_v26 }
0x137d   :  { %v5369_v10 = vadd.f32 %v6075_v41, %v5359_v6  ;;  %7260 = vmatprep.subr.bf16.mxu0 %v7259_v4 }
0x137f   :  { %7017 = vmatprep.mubr.msk.f32.mxu1 %vm175_vm1, %v5369_v10 }
0x1380   :  { %7018 = vmatmul.mubr.msk.f32.gmra.mrb[120].mxu1 %vm175_vm1, %v5370_v34  ;;  %7262 = vmatpush3.bf16.msra.mxu0 %v7259_v4 }
0x13fe   :  { %v7013_v29 = vpop.f32.mrb[116].mxu1 }
0x13ff   :  { %v5465_v7 = vadd.f32 %v7013_v29, %v6076_v52  ;;  %v5459_v55 = vpop.f32.mrb[117].mxu1 }
0x1400   :  { %v5460_v12 = vadd.f32 %v6076_v52, %v5459_v55 }
0x1401   :  { %v5495_v53 = vmul.f32 0.044715, %v5465_v7  ;;  %v5489_v45 = vmul.f32 0.5, %v5465_v7 }
0x1402   :  { %v5494_v39 = vmul.f32 0.044715, %v5460_v12  ;;  %v5488_v3 = vmul.f32 0.5, %v5460_v12 }
0x1403   :  { %v5501_v48 = vmul.f32 %v5495_v53, %v5465_v7 }
0x1404   :  { %v5500_v17 = vmul.f32 %v5494_v39, %v5460_v12 }
0x1405   :  { %v5507_v43 = vmul.f32 %v5501_v48, %v5465_v7  ;;  %v6089_v48 = vld [vmem:[%s9571_s4 + $0xf] ss:$0 sm:$0xff] }
0x1406   :  { %v5506_v19 = vmul.f32 %v5500_v17, %v5460_v12 }
0x1407   :  { %v5513_v33 = vadd.f32 %v5507_v43, %v5465_v7 }
0x1408   :  { %v5512_v9 = vadd.f32 %v5506_v19, %v5460_v12 }
0x1409   :  { %v5519_v18 = vmul.f32 0.7978846, %v5513_v33 }
0x140a   :  { %v5518_v63 = vmul.f32 0.7978846, %v5512_v9 }
0x140b   :  { %7704 = vtanh.f32 %v5519_v18 }
0x140c   :  { %7706 = vtanh.f32 %v5518_v63 }
0x1415   :  { %v7705_v41 = vpop.eup %7704 }
0x1416   :  { %v7707_v13 = vpop.eup %7706  ;;  %v5531_v57 = vadd.f32 1.0, %v7705_v41 }
0x1417   :  { %v5530_v47 = vadd.f32 1.0, %v7707_v13 }
0x1418   :  { %v5537_v8 = vmul.f32 %v5531_v57, %v5489_v45 }
0x1419   :  { %v5536_v37 = vmul.f32 %v5530_v47, %v5488_v3 }
0x141b   :  { %7036 = vmatprep.mubr.msk.f32.mxu0 %vm2781_vm7, %v5536_v37 }
0x141c   :  { %7037 = vmatmul.mubr.msk.f32.vlgmr.msra.gmra.mrb[116].mxu0 %vm2781_vm7, %v5537_v8 }
0x144b   :  { %v7016_v27 = vpop.f32.mrb[118].mxu1 }
0x144c   :  { %v5475_v14 = vadd.f32 %v7016_v27, %v6076_v52  ;;  %v5469_v44 = vpop.f32.mrb[119].mxu1 }
0x144d   :  { %v5470_v38 = vadd.f32 %v6076_v52, %v5469_v44 }
0x144e   :  { %v5497_v56 = vmul.f32 0.044715, %v5475_v14  ;;  %v5491_v26 = vmul.f32 0.5, %v5475_v14 }
0x144f   :  { %v5496_v46 = vmul.f32 0.044715, %v5470_v38  ;;  %v5490_v30 = vmul.f32 0.5, %v5470_v38 }
0x1450   :  { %v5503_v58 = vmul.f32 %v5497_v56, %v5475_v14 }
0x1451   :  { %v5502_v61 = vmul.f32 %v5496_v46, %v5470_v38 }
0x1452   :  { %v5509_v35 = vmul.f32 %v5503_v58, %v5475_v14 }
0x1453   :  { %v5508_v11 = vmul.f32 %v5502_v61, %v5470_v38  ;;  %v7019_v60 = vpop.f32.mrb[120].mxu1 }
0x1454   :  { %v5515_v21 = vadd.f32 %v5509_v35, %v5475_v14  ;;  %v5485_v2 = vadd.f32 %v7019_v60, %v6076_v52  ;;  %v5479_v54 = vpop.f32.mrb[121].mxu1 }
0x1455   :  { %v5514_v59 = vadd.f32 %v5508_v11, %v5470_v38  ;;  %v5480_v1 = vadd.f32 %v6076_v52, %v5479_v54 }
0x1456   :  { %v5499_v31 = vmul.f32 0.044715, %v5485_v2  ;;  %v5521_v25 = vmul.f32 0.7978846, %v5515_v21  ;;  %v5493_v12 = vmul.f32 0.5, %v5485_v2 }
0x1457   :  { %v5498_v28 = vmul.f32 0.044715, %v5480_v1  ;;  %v5520_v32 = vmul.f32 0.7978846, %v5514_v59  ;;  %v5492_v7 = vmul.f32 0.5, %v5480_v1 }
0x1458   :  { %v5505_v62 = vmul.f32 %v5499_v31, %v5485_v2  ;;  %7708 = vtanh.f32 %v5521_v25 }
0x1459   :  { %v5504_v24 = vmul.f32 %v5498_v28, %v5480_v1  ;;  %7710 = vtanh.f32 %v5520_v32  ;;  %v5736_v32 = vld [vmem:[%s9573_s5] sm:$0xff] }
0x145a   :  { %v5511_v6 = vmul.f32 %v5505_v62, %v5485_v2  ;;  %v5737_v62 = vld [vmem:[%s9573_s5 + $0x8] sm:$0xff] }
0x145b   :  { %v5510_v10 = vmul.f32 %v5504_v24, %v5480_v1  ;;  %v7263_v24 = vpack.c.bf16 %v5737_v62, %v5736_v32 }
0x145c   :  { %v5517_v34 = vadd.f32 %v5511_v6, %v5485_v2  ;;  %v5738_v6 = vld [vmem:[%s9573_s5 + $0x10] sm:$0xff] }
0x145d   :  { %v5516_v49 = vadd.f32 %v5510_v10, %v5480_v1  ;;  %7264 = vmatprep.subr.bf16.mxu1 %v7263_v24  ;;  %v5739_v10 = vld [vmem:[%s9573_s5 + $0x18] sm:$0xff] }
0x145e   :  { %v5523_v51 = vmul.f32 0.7978846, %v5517_v34  ;;  %7266 = vmatpush3.bf16.msra.mxu1 %v7263_v24  ;;  %v7267_v34 = vpack.c.bf16 %v5739_v10, %v5738_v6 }
0x145f   :  { %v5522_v20 = vmul.f32 0.7978846, %v5516_v49 }
0x1460   :  { %7712 = vtanh.f32 %v5523_v51  ;;  %7268 = vmatprep.subr.bf16.mxu1 %v7267_v34 }
0x1461   :  { %7714 = vtanh.f32 %v5522_v20 }
0x1462   :  { %v7709_v50 = vpop.eup %7708  ;;  %7270 = vmatpush3.bf16.msra.mxu1 %v7267_v34 }
0x1463   :  { %v7711_v0 = vpop.eup %7710  ;;  %v5533_v22 = vadd.f32 1.0, %v7709_v50 }
0x1464   :  { %v5532_v40 = vadd.f32 1.0, %v7711_v0  ;;  %v6090_v0 = vld [vmem:[%s9570_s6 + $0x1] ss:$0 sm:$0xff] }
0x1465   :  { %v5539_v42 = vmul.f32 %v5533_v22, %v5491_v26 }
0x1466   :  { %v5538_v23 = vmul.f32 %v5532_v40, %v5490_v30  ;;  %v6091_v30 = vld [vmem:[%s9570_s6 + $0x2] ss:$0 sm:$0xff] }
0x1468   :  { %7039 = vmatprep.mubr.msk.f32.mxu0 %vm2781_vm7, %v5538_v23 }
0x1469   :  { %7040 = vmatmul.mubr.msk.f32.gmra.mrb[118].mxu0 %vm2781_vm7, %v5539_v42 }
0x146a   :  { %v7713_v4 = vpop.eup %7712 }
0x146b   :  { %v7715_v52 = vpop.eup %7714  ;;  %v5535_v29 = vadd.f32 1.0, %v7713_v4 }
0x146c   :  { %v5534_v55 = vadd.f32 1.0, %v7715_v52 }
0x146d   :  { %v5541_v39 = vmul.f32 %v5535_v29, %v5493_v12 }
0x146e   :  { %v5540_v53 = vmul.f32 %v5534_v55, %v5492_v7 }
0x1470   :  { %7042 = vmatprep.mubr.msk.f32.mxu0 %vm2781_vm7, %v5540_v53 }
0x1471   :  { %7043 = vmatmul.mubr.msk.f32.gmra.mrb[120].mxu0 %vm2781_vm7, %v5541_v39 }
0x14ef   :  { %v7038_v17 = vpop.f32.mrb[116].mxu0 }
0x14f0   :  { %v5653_v43 = vadd.f32 %v7038_v17, %v9426_v36  ;;  %v5626_v19 = vpop.f32.mrb[117].mxu0 }
0x14f2   :  { %v5661_v33 = vadd.f32 %v6089_v48, %v5653_v43 }
0x14f4   :  { %v5668_v9 = vsel %vm175_vm1, %v5661_v33, 0.0 }
0x14f5   :  { %5669 = vadd.xlane.f32.xlu0 %v5668_v9 }
0x153c   :  { %v7041_v18 = vpop.f32.mrb[118].mxu0 }
0x153d   :  { %v5635_v63 = vpop.f32.mrb[119].mxu0 }
0x153e   :  { %v5654_v41 = vadd.f32 %v5635_v63, %v9433_v16 }
0x1540   :  { %v5662_v13 = vadd.f32 %v6089_v48, %v5654_v41 }
0x1542   :  { %v5671_v57 = vsel %vm175_vm1, %v5662_v13, 0.0 }
0x1543   :  { %5672 = vadd.xlane.f32.xlu1 %v5671_v57 }
0x1544   :  { %v7044_v3 = vpop.f32.mrb[120].mxu0 }
0x1545   :  { %v5656_v47 = vadd.f32 %v7044_v3, %v9440_v15  ;;  %v5644_v45 = vpop.f32.mrb[121].mxu0  ;;  %v6092_v3 = vld [vmem:[%s9570_s6 + $0x3] ss:$0 sm:$0xff] }
0x1546   :  { %v5655_v37 = vadd.f32 %v5644_v45, %v9442_v5 }
0x1547   :  { %v5664_v36 = vadd.f32 %v6089_v48, %v5656_v47 }
0x1548   :  { %v5663_v8 = vadd.f32 %v6089_v48, %v5655_v37 }
0x1549   :  { %v5677_v27 = vsel %vm175_vm1, %v5664_v36, 0.0 }
0x154a   :  { %5678 = vadd.xlane.f32.xlu1 %v5677_v27  ;;  %v5674_v14 = vsel %vm175_vm1, %v5663_v8, 0.0 }
0x154b   :  { %5675 = vadd.xlane.f32.xlu0 %v5674_v14 }
0x1582   :  { %v5670_v44 = vpop.xlane.xlu0 %5669 }
0x1583   :  { %v5680_v16 = vmul.f32 0.03125, %v5670_v44 }
0x1585   :  { %v5684_v38 = vsub.f32 %v5661_v33, %v5680_v16 }
0x1587   :  { %v5688_v56 = vmul.f32 %v5684_v38, %v5684_v38 }
0x1589   :  { %v5692_v46 = vsel %vm175_vm1, %v5688_v56, 0.0 }
0x158a   :  { %5693 = vadd.xlane.f32.xlu0 %v5692_v46 }
0x15d0   :  { %v5673_v58 = vpop.xlane.xlu1 %5672 }
0x15d1   :  { %v5681_v15 = vmul.f32 0.03125, %v5673_v58 }
0x15d3   :  { %v5685_v61 = vsub.f32 %v5662_v13, %v5681_v15 }
0x15d5   :  { %v5689_v35 = vmul.f32 %v5685_v61, %v5685_v61 }
0x15d7   :  { %v5679_v5 = vpop.xlane.xlu1 %5678  ;;  %v5695_v11 = vsel %vm175_vm1, %v5689_v35, 0.0 }
0x15d8   :  { %v5683_v60 = vmul.f32 0.03125, %v5679_v5  ;;  %5696 = vadd.xlane.f32.xlu1 %v5695_v11  ;;  %v5676_v21 = vpop.xlane.xlu0 %5675 }
0x15d9   :  { %v5682_v2 = vmul.f32 0.03125, %v5676_v21 }
0x15da   :  { %v5687_v54 = vsub.f32 %v5664_v36, %v5683_v60 }
0x15db   :  { %v5686_v59 = vsub.f32 %v5663_v8, %v5682_v2 }
0x15dc   :  { %v5691_v1 = vmul.f32 %v5687_v54, %v5687_v54 }
0x15dd   :  { %v5690_v31 = vmul.f32 %v5686_v59, %v5686_v59 }
0x15de   :  { %v5701_v25 = vsel %vm175_vm1, %v5691_v1, 0.0 }
0x15df   :  { %5702 = vadd.xlane.f32.xlu1 %v5701_v25  ;;  %v5698_v28 = vsel %vm175_vm1, %v5690_v31, 0.0 }
0x15e0   :  { %5699 = vadd.xlane.f32.xlu0 %v5698_v28 }
0x1617   :  { %v5694_v49 = vpop.xlane.xlu0 %5693 }
0x1618   :  { %v5704_v51 = vmul.f32 0.03125, %v5694_v49 }
0x161a   :  { %v5708_v20 = vadd.f32 1e-12, %v5704_v51 }
0x161c   :  { %7716 = vrsqrt.f32 %v5708_v20 }
0x1626   :  { %v7717_v50 = vpop.eup %7716 }
0x1627   :  { %v5716_v22 = vmul.f32 %v7717_v50, %v5684_v38 }
0x1629   :  { %v5724_v40 = vmul.f32 %v6090_v0, %v5716_v22 }
0x162b   :  { %v5732_v26 = vadd.f32 %v6091_v30, %v5724_v40 }
0x162d   :  { %7053 = vmatprep.mubr.msk.f32.mxu1 %vm175_vm1, %v5732_v26 }
0x1665   :  { %v5697_v23 = vpop.xlane.xlu1 %5696 }
0x1666   :  { %v5705_v42 = vmul.f32 0.03125, %v5697_v23 }
0x1668   :  { %v5709_v4 = vadd.f32 1e-12, %v5705_v42 }
0x166a   :  { %7718 = vrsqrt.f32 %v5709_v4 }
0x166c   :  { %v5703_v52 = vpop.xlane.xlu1 %5702 }
0x166d   :  { %v5707_v29 = vmul.f32 0.03125, %v5703_v52  ;;  %v5700_v7 = vpop.xlane.xlu0 %5699 }
0x166e   :  { %v5706_v55 = vmul.f32 0.03125, %v5700_v7 }
0x166f   :  { %v5711_v12 = vadd.f32 1e-12, %v5707_v29 }
0x1670   :  { %v5710_v53 = vadd.f32 1e-12, %v5706_v55 }
0x1671   :  { %7720 = vrsqrt.f32 %v5711_v12 }
0x1672   :  { %7722 = vrsqrt.f32 %v5710_v53 }
0x1674   :  { %v7719_v39 = vpop.eup %7718 }
0x1675   :  { %v5717_v48 = vmul.f32 %v7719_v39, %v5685_v61 }
0x1677   :  { %v5725_v17 = vmul.f32 %v6090_v0, %v5717_v48 }
0x1679   :  { %v5733_v43 = vadd.f32 %v6091_v30, %v5725_v17 }
0x167b   :  { %v7721_v19 = vpop.eup %7720  ;;  %7054 = vmatmul.mubr.msk.f32.vlgmr.msra.gmra.mrb[122].mxu1 %vm175_vm1, %v5733_v43 }
0x167c   :  { %v7723_v33 = vpop.eup %7722  ;;  %v5719_v9 = vmul.f32 %v7721_v19, %v5687_v54 }
0x167d   :  { %v5718_v18 = vmul.f32 %v7723_v33, %v5686_v59 }
0x167e   :  { %v5727_v63 = vmul.f32 %v6090_v0, %v5719_v9 }
0x167f   :  { %v5726_v41 = vmul.f32 %v6090_v0, %v5718_v18 }
0x1680   :  { %v5735_v57 = vadd.f32 %v6091_v30, %v5727_v63 }
0x1681   :  { %v5734_v13 = vadd.f32 %v6091_v30, %v5726_v41 }
0x1683   :  { %7056 = vmatprep.mubr.msk.f32.mxu1 %vm175_vm1, %v5734_v13 }
0x1684   :  { %7057 = vmatmul.mubr.msk.f32.gmra.mrb[124].mxu1 %vm175_vm1, %v5735_v57 }
0x174e   :  { %v7055_v47 = vpop.f32.mrb[122].mxu1 }
0x174f   :  { %v5828_v45 = vadd.f32 %v7055_v47, %v6092_v3  ;;  %v5822_v37 = vpop.f32.mrb[123].mxu1 }
0x1750   :  { %v5823_v36 = vadd.f32 %v6092_v3, %v5822_v37 }
0x1751   :  { %5842 = vst [vmem:[%s9574_s7 + $0x8] sm:$0xff] %v5828_v45 }
0x1752   :  { %5841 = vst [vmem:[%s9574_s7] sm:$0xff] %v5823_v36 }
0x1757   :  { %v7058_v8 = vpop.f32.mrb[124].mxu1 }
0x1758   :  { %v5838_v27 = vadd.f32 %v7058_v8, %v6092_v3  ;;  %v5832_v14 = vpop.f32.mrb[125].mxu1 }
0x1759   :  { %v5833_v44 = vadd.f32 %v6092_v3, %v5832_v14 }
0x175a   :  { %5844 = vst [vmem:[%s9574_s7 + $0x18] sm:$0xff] %v5838_v27 }
0x175b   :  { %5843 = vst [vmem:[%s9574_s7 + $0x10] sm:$0xff] %v5833_v44 }

</bundles_post_ra>
